<compile_context>
chip_gen: v7x
topology: tpu7x:2x2x1
jax: 0.10.0
libtpu: 0.0.40
codegen_flags: <defaults>
</compile_context>

<pallas_src>
import functools
import math

import jax
import jax.numpy as jnp
from jax.experimental import pallas as pl
from jax.experimental.pallas import tpu as pltpu


# --------------------------------------------------------------------------
# Pallas kernel: one fused TransformerDecoderLayer (+ optional final LN)
# --------------------------------------------------------------------------

def _decoder_layer_kernel(
        x_ref, mem_ref,
        w_qkv_s_ref, w_out_s_ref,
        w_q_c_ref, w_kv_c_ref, w_out_c_ref,
        w_ff1_ref, w_ff2_ref,
        b_qkv_s_ref, b_kv_c_ref, b_ff1_ref,
        bias_e_ref, ln_ref, fln_ref,
        o_ref,
        *, H, Dh, eps, apply_final_ln):
    """Per-batch-element fused decoder layer.

    x_ref   : (T, E) f32      mem_ref : (S, E) f32
    weights : (in, out) bf16 (pre-transposed, MXU-ready)
    bias_e  : (4, E) f32  = [b_out_self, b_q_cross, b_out_cross, b_ff2]
    ln      : (6, E) f32  = [ln1_g, ln1_b, ln2_g, ln2_b, ln3_g, ln3_b]
    fln     : (2, E) f32  = [final_ln_g, final_ln_b]  (applied iff last layer)
    """
    T = x_ref.shape[0]
    S = mem_ref.shape[0]
    E = H * Dh

    x = x_ref[...].astype(jnp.float32)          # (T, E)
    bias_e = bias_e_ref[...]                    # (4, E)
    ln = ln_ref[...]                            # (6, E)

    def mm(a_bf16, w_ref):
        # bf16 MXU inputs, f32 accumulation; weights already (in, out).
        return jnp.dot(a_bf16, w_ref[...], preferred_element_type=jnp.float32)

    def layernorm(z, g, b):
        mu = jnp.mean(z, axis=-1, keepdims=True)
        var = jnp.mean((z - mu) * (z - mu), axis=-1, keepdims=True)
        return (z - mu) * jax.lax.rsqrt(var + eps) * g + b

    def split_heads(z2, L):
        # (L, E) f32 -> (H, L, Dh) bf16: one relayout per tensor (lane axis
        # unchanged in the transpose), replacing H per-head lane slices.
        return z2.astype(jnp.bfloat16).reshape(L, H, Dh).transpose(1, 0, 2)

    def attention(q2, k2, v2, Lq, Lk):
        # q2: (Lq, E), k2/v2: (Lk, E).  Heads batched in ONE dot_general pair.
        # Softmax scale is pre-folded into the Q projection weights.
        qh = split_heads(q2, Lq)                                    # (H,Lq,Dh)
        kh = split_heads(k2, Lk)                                    # (H,Lk,Dh)
        vh = split_heads(v2, Lk)                                    # (H,Lk,Dh)
        s = jax.lax.dot_general(
            qh, kh, (((2,), (2,)), ((0,), (0,))),
            preferred_element_type=jnp.float32)                     # (H,Lq,Lk)
        m = jnp.max(s, axis=-1, keepdims=True)                      # f32 stats
        p = jnp.exp(s - m)
        p = p * pl.reciprocal(jnp.sum(p, axis=-1, keepdims=True), approx=True)
        o = jax.lax.dot_general(
            p.astype(jnp.bfloat16), vh, (((2,), (1,)), ((0,), (0,))),
            preferred_element_type=jnp.float32)                     # (H,Lq,Dh)
        return o.transpose(1, 0, 2).reshape(Lq, E)                  # (Lq, E)

    # ---- self-attention block -------------------------------------------
    qkv = mm(x.astype(jnp.bfloat16), w_qkv_s_ref) + b_qkv_s_ref[...]  # (T,3E)
    sa = attention(qkv[:, :E], qkv[:, E:2 * E], qkv[:, 2 * E:], T, T)
    sa = mm(sa.astype(jnp.bfloat16), w_out_s_ref) + bias_e[0:1, :]
    x = layernorm(x + sa, ln[0:1, :], ln[1:2, :])

    # ---- cross-attention block ------------------------------------------
    qc = mm(x.astype(jnp.bfloat16), w_q_c_ref) + bias_e[1:2, :]        # (T,E)
    kv = mm(mem_ref[...].astype(jnp.bfloat16), w_kv_c_ref) \
        + b_kv_c_ref[...]                                              # (S,2E)
    ca = attention(qc, kv[:, :E], kv[:, E:], T, S)
    ca = mm(ca.astype(jnp.bfloat16), w_out_c_ref) + bias_e[2:3, :]
    x = layernorm(x + ca, ln[2:3, :], ln[3:4, :])

    # ---- feed-forward block ---------------------------------------------
    hdn = jnp.maximum(mm(x.astype(jnp.bfloat16), w_ff1_ref)
                      + b_ff1_ref[...], 0.0)                           # (T,FF)
    ff = mm(hdn.astype(jnp.bfloat16), w_ff2_ref) + bias_e[3:4, :]
    x = layernorm(x + ff, ln[4:5, :], ln[5:6, :])

    # ---- fused final (stack) LayerNorm on the last layer -----------------
    if apply_final_ln:
        x = layernorm(x, fln_ref[0:1, :], fln_ref[1:2, :])

    o_ref[...] = x.astype(o_ref.dtype)


# --------------------------------------------------------------------------
# Wrappers
# --------------------------------------------------------------------------

def decoder_layer(x, mem, p, final_ln, nhead, apply_final_ln):
    """x: (B, T, E), mem: (B, S, E) batch-first activations."""
    B, T, E = x.shape
    S = mem.shape[1]
    Dh = E // nhead

    kernel = functools.partial(_decoder_layer_kernel,
                               H=nhead, Dh=Dh, eps=1e-5,
                               apply_final_ln=apply_final_ln)

    operands = (x, mem,
                p['w_qkv_self'], p['w_out_self'],
                p['w_q_cross'], p['w_kv_cross'], p['w_out_cross'],
                p['w_ff1'], p['w_ff2'],
                p['b_qkv_self'], p['b_kv_cross'], p['b_ff1'],
                p['bias_e'], p['ln'], final_ln)

    def row_spec(shape):
        # One batch element per grid step; whole sequence stays in the block
        # so attention remains exact.  Leading dim squeezed out of the kernel.
        return pl.BlockSpec((None,) + shape[1:], lambda b: (b, 0, 0))

    def const_spec(shape):
        # Weights / packed vectors: constant index_map -> DMA'd once, resident.
        zeros = (0,) * len(shape)
        return pl.BlockSpec(shape, lambda b: zeros)

    in_specs = ([row_spec(x.shape), row_spec(mem.shape)]
                + [const_spec(a.shape) for a in operands[2:]])

    return pl.pallas_call(
        kernel,
        grid=(B,),
        out_shape=jax.ShapeDtypeStruct((B, T, E), x.dtype),
        in_specs=in_specs,
        out_specs=row_spec((B, T, E)),
        compiler_params=pltpu.CompilerParams(
            dimension_semantics=("parallel",),
            vmem_limit_bytes=48 * 1024 * 1024),
    )(*operands)


def transformer_decoder_forward(tgt, memory, params, nhead):
    # PyTorch seq-first (L, B, E) -> batch-first (B, L, E), once for the whole
    # stack (and once back at the end).
    T, B, E = tgt.shape
    x = tgt.transpose(1, 0, 2)          # (B, T, E)
    mem = memory.transpose(1, 0, 2)     # (B, S, E)

    n_layers = len(params['layers'])
    for i, layer_p in enumerate(params['layers']):
        x = decoder_layer(x, mem, layer_p, params['final_ln'], nhead,
                          apply_final_ln=(i == n_layers - 1))
    return x.transpose(1, 0, 2)         # (T, B, E)


# --------------------------------------------------------------------------
# Deterministic parameter init
#  - weights pre-transposed to (in, out), bf16 for the MXU
#  - 1/sqrt(Dh) softmax scale folded into Q projection weights & bias
#  - small vectors (biases, LN gamma/beta) packed into a few 2-D f32 operands
# --------------------------------------------------------------------------

def init_params(key, num_layers, d_model, nhead, dim_feedforward):
    E, FF = d_model, dim_feedforward
    Dh = E // nhead
    scale = 1.0 / math.sqrt(Dh)
    wdt = jnp.bfloat16

    def nrm(k, shape, s=0.02):
        return (s * jax.random.normal(k, shape)).astype(jnp.float32)

    layers = []
    for i in range(num_layers):
        k = jax.random.fold_in(key, i)
        ks = jax.random.split(k, 8)
        # Fold softmax scale into the Q slices (equivalent forward semantics).
        w_qkv_self = nrm(ks[0], (E, 3 * E)).at[:, :E].multiply(scale)
        w_q_cross = nrm(ks[2], (E, E)) * scale
        b_qkv_self = jnp.zeros((1, 3 * E), jnp.float32)  # Q part scaled (zero)
        layers.append({
            'w_qkv_self':  w_qkv_self.astype(wdt),
            'w_out_self':  nrm(ks[1], (E, E)).astype(wdt),
            'w_q_cross':   w_q_cross.astype(wdt),
            'w_kv_cross':  nrm(ks[3], (E, 2 * E)).astype(wdt),
            'w_out_cross': nrm(ks[4], (E, E)).astype(wdt),
            'w_ff1':       nrm(ks[5], (E, FF)).astype(wdt),
            'w_ff2':       nrm(ks[6], (FF, E)).astype(wdt),
            'b_qkv_self':  b_qkv_self,
            'b_kv_cross':  jnp.zeros((1, 2 * E), jnp.float32),
            'b_ff1':       jnp.zeros((1, FF), jnp.float32),
            # [b_out_self, b_q_cross(scaled), b_out_cross, b_ff2]
            'bias_e':      jnp.zeros((4, E), jnp.float32),
            # [ln1_g, ln1_b, ln2_g, ln2_b, ln3_g, ln3_b]
            'ln':          jnp.stack([jnp.ones((E,)), jnp.zeros((E,)),
                                      jnp.ones((E,)), jnp.zeros((E,)),
                                      jnp.ones((E,)), jnp.zeros((E,))]
                                     ).astype(jnp.float32),
        })
    final_ln = jnp.stack([jnp.ones((E,)), jnp.zeros((E,))]).astype(jnp.float32)
    return {'layers': layers, 'final_ln': final_ln}


# --------------------------------------------------------------------------
# Main
# --------------------------------------------------------------------------

if __name__ == "__main__":
    # Small but lane-dense shapes (last dims multiples of 128 -> unmasked vst).
    num_layers = 2
    d_model = 128
    nhead = 4
    dim_feedforward = 256
    T, S, B = 8, 8, 2   # tgt len, memory len, batch

    key = jax.random.PRNGKey(0)
    k_tgt, k_mem, k_par = jax.random.split(key, 3)

    tgt = jax.random.normal(k_tgt, (T, B, d_model), dtype=jnp.float32)
    memory = jax.random.normal(k_mem, (S, B, d_model), dtype=jnp.float32)
    params = init_params(k_par, num_layers, d_model, nhead, dim_feedforward)

    fwd = jax.jit(transformer_decoder_forward, static_argnums=(3,))
    out = fwd(tgt, memory, params, nhead)
    out = jax.block_until_ready(out)

    assert out.shape == (T, B, d_model)
    assert bool(jnp.all(jnp.isfinite(out)))
    print("KERNEL_OK")
</pallas_src>

<mosaic_0001>
module attributes {stable_mosaic.version = 11 : i64} {
  func.func @_decoder_layer_kernel(%arg0: i32, %arg1: memref<1x8x128xf32, #tpu.memory_space<vmem>>, %arg2: memref<1x8x128xf32, #tpu.memory_space<vmem>>, %arg3: memref<128x384xbf16, #tpu.memory_space<vmem>>, %arg4: memref<128x128xbf16, #tpu.memory_space<vmem>>, %arg5: memref<128x128xbf16, #tpu.memory_space<vmem>>, %arg6: memref<128x256xbf16, #tpu.memory_space<vmem>>, %arg7: memref<128x128xbf16, #tpu.memory_space<vmem>>, %arg8: memref<128x256xbf16, #tpu.memory_space<vmem>>, %arg9: memref<256x128xbf16, #tpu.memory_space<vmem>>, %arg10: memref<1x384xf32, #tpu.memory_space<vmem>>, %arg11: memref<1x256xf32, #tpu.memory_space<vmem>>, %arg12: memref<1x256xf32, #tpu.memory_space<vmem>>, %arg13: memref<4x128xf32, #tpu.memory_space<vmem>>, %arg14: memref<6x128xf32, #tpu.memory_space<vmem>>, %arg15: memref<2x128xf32, #tpu.memory_space<vmem>>, %arg16: memref<1x8x128xf32, #tpu.memory_space<vmem>>) attributes {dimension_semantics = [#tpu.dimension_semantics<parallel>], iteration_bounds = array<i64: 2>, scalar_prefetch = 0 : i64, scratch_operands = 0 : i64, tpu.core_type = #tpu.core_type<tc>, window_params = [{transform_indices = @transform_0, window_bounds = array<i64: 1, 8, 128>}, {transform_indices = @transform_1, window_bounds = array<i64: 1, 8, 128>}, {pipeline_mode = #tpu.pipeline_mode<synchronous>, transform_indices = @transform_2, window_bounds = array<i64: 128, 384>}, {pipeline_mode = #tpu.pipeline_mode<synchronous>, transform_indices = @transform_3, window_bounds = array<i64: 128, 128>}, {pipeline_mode = #tpu.pipeline_mode<synchronous>, transform_indices = @transform_4, window_bounds = array<i64: 128, 128>}, {pipeline_mode = #tpu.pipeline_mode<synchronous>, transform_indices = @transform_5, window_bounds = array<i64: 128, 256>}, {pipeline_mode = #tpu.pipeline_mode<synchronous>, transform_indices = @transform_6, window_bounds = array<i64: 128, 128>}, {pipeline_mode = #tpu.pipeline_mode<synchronous>, transform_indices = @transform_7, window_bounds = array<i64: 128, 256>}, {pipeline_mode = #tpu.pipeline_mode<synchronous>, transform_indices = @transform_8, window_bounds = array<i64: 256, 128>}, {pipeline_mode = #tpu.pipeline_mode<synchronous>, transform_indices = @transform_9, window_bounds = array<i64: 1, 384>}, {pipeline_mode = #tpu.pipeline_mode<synchronous>, transform_indices = @transform_10, window_bounds = array<i64: 1, 256>}, {pipeline_mode = #tpu.pipeline_mode<synchronous>, transform_indices = @transform_11, window_bounds = array<i64: 1, 256>}, {pipeline_mode = #tpu.pipeline_mode<synchronous>, transform_indices = @transform_12, window_bounds = array<i64: 4, 128>}, {pipeline_mode = #tpu.pipeline_mode<synchronous>, transform_indices = @transform_13, window_bounds = array<i64: 6, 128>}, {pipeline_mode = #tpu.pipeline_mode<synchronous>, transform_indices = @transform_14, window_bounds = array<i64: 2, 128>}, {transform_indices = @transform_15, window_bounds = array<i64: 1, 8, 128>}]} {
    %c0 = arith.constant 0 : index
    %c0_0 = arith.constant 0 : index
    %c0_1 = arith.constant 0 : index
    %0 = vector.load %arg1[%c0, %c0_0, %c0_1] : memref<1x8x128xf32, #tpu.memory_space<vmem>>, vector<1x8x128xf32>
    %1 = vector.shape_cast %0 : vector<1x8x128xf32> to vector<8x128xf32>
    %c0_2 = arith.constant 0 : index
    %c0_3 = arith.constant 0 : index
    %2 = vector.load %arg13[%c0_2, %c0_3] : memref<4x128xf32, #tpu.memory_space<vmem>>, vector<4x128xf32>
    %c0_4 = arith.constant 0 : index
    %c0_5 = arith.constant 0 : index
    %3 = vector.load %arg14[%c0_4, %c0_5] : memref<6x128xf32, #tpu.memory_space<vmem>>, vector<6x128xf32>
    %4 = arith.truncf %1 : vector<8x128xf32> to vector<8x128xbf16>
    %c0_6 = arith.constant 0 : index
    %c0_7 = arith.constant 0 : index
    %5 = vector.load %arg3[%c0_6, %c0_7] : memref<128x384xbf16, #tpu.memory_space<vmem>>, vector<128x384xbf16>
    %cst = arith.constant dense<0.000000e+00> : vector<8x384xf32>
    %6 = tpu.matmul %4, %5, %cst {dimension_numbers = #tpu.dot_dimension_numbers<[1], [0], [0], [1], [0, 0, 1, 1], [], []>} : vector<8x128xbf16>, vector<128x384xbf16>, vector<8x384xf32> -> vector<8x384xf32>
    %c0_8 = arith.constant 0 : index
    %c0_9 = arith.constant 0 : index
    %7 = vector.load %arg10[%c0_8, %c0_9] : memref<1x384xf32, #tpu.memory_space<vmem>>, vector<1x384xf32>
    %8 = vector.broadcast %7 : vector<1x384xf32> to vector<8x384xf32>
    %9 = arith.addf %6, %8 : vector<8x384xf32>
    %10 = vector.extract_strided_slice %9 {offsets = [0, 0], sizes = [8, 128], strides = [1, 1]} : vector<8x384xf32> to vector<8x128xf32>
    %11 = vector.extract_strided_slice %9 {offsets = [0, 128], sizes = [8, 128], strides = [1, 1]} : vector<8x384xf32> to vector<8x128xf32>
    %12 = vector.extract_strided_slice %9 {offsets = [0, 256], sizes = [8, 128], strides = [1, 1]} : vector<8x384xf32> to vector<8x128xf32>
    %13 = arith.truncf %10 : vector<8x128xf32> to vector<8x128xbf16>
    %14 = vector.shape_cast %13 : vector<8x128xbf16> to vector<8x4x32xbf16>
    %15 = tpu.transpose %14, [1, 0, 2] : vector<8x4x32xbf16> -> vector<4x8x32xbf16>
    %16 = arith.truncf %11 : vector<8x128xf32> to vector<8x128xbf16>
    %17 = vector.shape_cast %16 : vector<8x128xbf16> to vector<8x4x32xbf16>
    %18 = tpu.transpose %17, [1, 0, 2] : vector<8x4x32xbf16> -> vector<4x8x32xbf16>
    %19 = arith.truncf %12 : vector<8x128xf32> to vector<8x128xbf16>
    %20 = vector.shape_cast %19 : vector<8x128xbf16> to vector<8x4x32xbf16>
    %21 = tpu.transpose %20, [1, 0, 2] : vector<8x4x32xbf16> -> vector<4x8x32xbf16>
    %cst_10 = arith.constant dense<0.000000e+00> : vector<4x8x8xf32>
    %22 = tpu.matmul %15, %18, %cst_10 {dimension_numbers = #tpu.dot_dimension_numbers<[2], [2], [1], [1], [0, 0, 0, 1, 1, 1], [0], [0]>} : vector<4x8x32xbf16>, vector<4x8x32xbf16>, vector<4x8x8xf32> -> vector<4x8x8xf32>
    %cst_11 = arith.constant dense<0xFF800000> : vector<4x8xf32>
    %23 = vector.multi_reduction <maximumf>, %22, %cst_11 [2] : vector<4x8x8xf32> to vector<4x8xf32>
    %24 = vector.shape_cast %23 : vector<4x8xf32> to vector<4x8x1xf32>
    %25 = vector.broadcast %24 : vector<4x8x1xf32> to vector<4x8x8xf32>
    %26 = arith.subf %22, %25 : vector<4x8x8xf32>
    %27 = math.exp %26 : vector<4x8x8xf32>
    %cst_12 = arith.constant dense<0.000000e+00> : vector<4x8xf32>
    %28 = vector.multi_reduction <add>, %27, %cst_12 [2] : vector<4x8x8xf32> to vector<4x8xf32>
    %29 = vector.shape_cast %28 : vector<4x8xf32> to vector<4x8x1xf32>
    %30 = tpu.reciprocal %29 {approx = true} : vector<4x8x1xf32> -> vector<4x8x1xf32>
    %31 = vector.broadcast %30 : vector<4x8x1xf32> to vector<4x8x8xf32>
    %32 = arith.mulf %27, %31 : vector<4x8x8xf32>
    %33 = arith.truncf %32 : vector<4x8x8xf32> to vector<4x8x8xbf16>
    %cst_13 = arith.constant dense<0.000000e+00> : vector<4x8x32xf32>
    %34 = tpu.matmul %33, %21, %cst_13 {dimension_numbers = #tpu.dot_dimension_numbers<[2], [1], [1], [2], [0, 0, 0, 1, 1, 2], [0], [0]>} : vector<4x8x8xbf16>, vector<4x8x32xbf16>, vector<4x8x32xf32> -> vector<4x8x32xf32>
    %35 = tpu.transpose %34, [1, 0, 2] : vector<4x8x32xf32> -> vector<8x4x32xf32>
    %36 = vector.shape_cast %35 : vector<8x4x32xf32> to vector<8x128xf32>
    %37 = arith.truncf %36 : vector<8x128xf32> to vector<8x128xbf16>
    %c0_14 = arith.constant 0 : index
    %c0_15 = arith.constant 0 : index
    %38 = vector.load %arg4[%c0_14, %c0_15] : memref<128x128xbf16, #tpu.memory_space<vmem>>, vector<128x128xbf16>
    %cst_16 = arith.constant dense<0.000000e+00> : vector<8x128xf32>
    %39 = tpu.matmul %37, %38, %cst_16 {dimension_numbers = #tpu.dot_dimension_numbers<[1], [0], [0], [1], [0, 0, 1, 1], [], []>} : vector<8x128xbf16>, vector<128x128xbf16>, vector<8x128xf32> -> vector<8x128xf32>
    %40 = vector.extract_strided_slice %2 {offsets = [0, 0], sizes = [1, 128], strides = [1, 1]} : vector<4x128xf32> to vector<1x128xf32>
    %41 = vector.broadcast %40 : vector<1x128xf32> to vector<8x128xf32>
    %42 = arith.addf %39, %41 : vector<8x128xf32>
    %43 = arith.addf %1, %42 : vector<8x128xf32>
    %44 = vector.extract_strided_slice %3 {offsets = [0, 0], sizes = [1, 128], strides = [1, 1]} : vector<6x128xf32> to vector<1x128xf32>
    %45 = vector.extract_strided_slice %3 {offsets = [1, 0], sizes = [1, 128], strides = [1, 1]} : vector<6x128xf32> to vector<1x128xf32>
    %cst_17 = arith.constant dense<0.000000e+00> : vector<8xf32>
    %46 = vector.multi_reduction <add>, %43, %cst_17 [1] : vector<8x128xf32> to vector<8xf32>
    %47 = vector.shape_cast %46 : vector<8xf32> to vector<8x1xf32>
    %cst_18 = arith.constant 1.280000e+02 : f32
    %48 = vector.broadcast %cst_18 : f32 to vector<8x1xf32>
    %49 = arith.divf %47, %48 : vector<8x1xf32>
    %50 = vector.broadcast %49 : vector<8x1xf32> to vector<8x128xf32>
    %51 = arith.subf %43, %50 : vector<8x128xf32>
    %52 = vector.broadcast %49 : vector<8x1xf32> to vector<8x128xf32>
    %53 = arith.subf %43, %52 : vector<8x128xf32>
    %54 = arith.mulf %51, %53 : vector<8x128xf32>
    %cst_19 = arith.constant dense<0.000000e+00> : vector<8xf32>
    %55 = vector.multi_reduction <add>, %54, %cst_19 [1] : vector<8x128xf32> to vector<8xf32>
    %56 = vector.shape_cast %55 : vector<8xf32> to vector<8x1xf32>
    %cst_20 = arith.constant 1.280000e+02 : f32
    %57 = vector.broadcast %cst_20 : f32 to vector<8x1xf32>
    %58 = arith.divf %56, %57 : vector<8x1xf32>
    %59 = vector.broadcast %49 : vector<8x1xf32> to vector<8x128xf32>
    %60 = arith.subf %43, %59 : vector<8x128xf32>
    %cst_21 = arith.constant 9.99999974E-6 : f32
    %61 = vector.broadcast %cst_21 : f32 to vector<8x1xf32>
    %62 = arith.addf %58, %61 : vector<8x1xf32>
    %63 = math.rsqrt %62 : vector<8x1xf32>
    %64 = vector.broadcast %63 : vector<8x1xf32> to vector<8x128xf32>
    %65 = arith.mulf %60, %64 : vector<8x128xf32>
    %66 = vector.broadcast %44 : vector<1x128xf32> to vector<8x128xf32>
    %67 = arith.mulf %65, %66 : vector<8x128xf32>
    %68 = vector.broadcast %45 : vector<1x128xf32> to vector<8x128xf32>
    %69 = arith.addf %67, %68 : vector<8x128xf32>
    %70 = arith.truncf %69 : vector<8x128xf32> to vector<8x128xbf16>
    %c0_22 = arith.constant 0 : index
    %c0_23 = arith.constant 0 : index
    %71 = vector.load %arg5[%c0_22, %c0_23] : memref<128x128xbf16, #tpu.memory_space<vmem>>, vector<128x128xbf16>
    %cst_24 = arith.constant dense<0.000000e+00> : vector<8x128xf32>
    %72 = tpu.matmul %70, %71, %cst_24 {dimension_numbers = #tpu.dot_dimension_numbers<[1], [0], [0], [1], [0, 0, 1, 1], [], []>} : vector<8x128xbf16>, vector<128x128xbf16>, vector<8x128xf32> -> vector<8x128xf32>
    %73 = vector.extract_strided_slice %2 {offsets = [1, 0], sizes = [1, 128], strides = [1, 1]} : vector<4x128xf32> to vector<1x128xf32>
    %74 = vector.broadcast %73 : vector<1x128xf32> to vector<8x128xf32>
    %75 = arith.addf %72, %74 : vector<8x128xf32>
    %c0_25 = arith.constant 0 : index
    %c0_26 = arith.constant 0 : index
    %c0_27 = arith.constant 0 : index
    %76 = vector.load %arg2[%c0_25, %c0_26, %c0_27] : memref<1x8x128xf32, #tpu.memory_space<vmem>>, vector<1x8x128xf32>
    %77 = vector.shape_cast %76 : vector<1x8x128xf32> to vector<8x128xf32>
    %78 = arith.truncf %77 : vector<8x128xf32> to vector<8x128xbf16>
    %c0_28 = arith.constant 0 : index
    %c0_29 = arith.constant 0 : index
    %79 = vector.load %arg6[%c0_28, %c0_29] : memref<128x256xbf16, #tpu.memory_space<vmem>>, vector<128x256xbf16>
    %cst_30 = arith.constant dense<0.000000e+00> : vector<8x256xf32>
    %80 = tpu.matmul %78, %79, %cst_30 {dimension_numbers = #tpu.dot_dimension_numbers<[1], [0], [0], [1], [0, 0, 1, 1], [], []>} : vector<8x128xbf16>, vector<128x256xbf16>, vector<8x256xf32> -> vector<8x256xf32>
    %c0_31 = arith.constant 0 : index
    %c0_32 = arith.constant 0 : index
    %81 = vector.load %arg11[%c0_31, %c0_32] : memref<1x256xf32, #tpu.memory_space<vmem>>, vector<1x256xf32>
    %82 = vector.broadcast %81 : vector<1x256xf32> to vector<8x256xf32>
    %83 = arith.addf %80, %82 : vector<8x256xf32>
    %84 = vector.extract_strided_slice %83 {offsets = [0, 0], sizes = [8, 128], strides = [1, 1]} : vector<8x256xf32> to vector<8x128xf32>
    %85 = vector.extract_strided_slice %83 {offsets = [0, 128], sizes = [8, 128], strides = [1, 1]} : vector<8x256xf32> to vector<8x128xf32>
    %86 = arith.truncf %75 : vector<8x128xf32> to vector<8x128xbf16>
    %87 = vector.shape_cast %86 : vector<8x128xbf16> to vector<8x4x32xbf16>
    %88 = tpu.transpose %87, [1, 0, 2] : vector<8x4x32xbf16> -> vector<4x8x32xbf16>
    %89 = arith.truncf %84 : vector<8x128xf32> to vector<8x128xbf16>
    %90 = vector.shape_cast %89 : vector<8x128xbf16> to vector<8x4x32xbf16>
    %91 = tpu.transpose %90, [1, 0, 2] : vector<8x4x32xbf16> -> vector<4x8x32xbf16>
    %92 = arith.truncf %85 : vector<8x128xf32> to vector<8x128xbf16>
    %93 = vector.shape_cast %92 : vector<8x128xbf16> to vector<8x4x32xbf16>
    %94 = tpu.transpose %93, [1, 0, 2] : vector<8x4x32xbf16> -> vector<4x8x32xbf16>
    %cst_33 = arith.constant dense<0.000000e+00> : vector<4x8x8xf32>
    %95 = tpu.matmul %88, %91, %cst_33 {dimension_numbers = #tpu.dot_dimension_numbers<[2], [2], [1], [1], [0, 0, 0, 1, 1, 1], [0], [0]>} : vector<4x8x32xbf16>, vector<4x8x32xbf16>, vector<4x8x8xf32> -> vector<4x8x8xf32>
    %cst_34 = arith.constant dense<0xFF800000> : vector<4x8xf32>
    %96 = vector.multi_reduction <maximumf>, %95, %cst_34 [2] : vector<4x8x8xf32> to vector<4x8xf32>
    %97 = vector.shape_cast %96 : vector<4x8xf32> to vector<4x8x1xf32>
    %98 = vector.broadcast %97 : vector<4x8x1xf32> to vector<4x8x8xf32>
    %99 = arith.subf %95, %98 : vector<4x8x8xf32>
    %100 = math.exp %99 : vector<4x8x8xf32>
    %cst_35 = arith.constant dense<0.000000e+00> : vector<4x8xf32>
    %101 = vector.multi_reduction <add>, %100, %cst_35 [2] : vector<4x8x8xf32> to vector<4x8xf32>
    %102 = vector.shape_cast %101 : vector<4x8xf32> to vector<4x8x1xf32>
    %103 = tpu.reciprocal %102 {approx = true} : vector<4x8x1xf32> -> vector<4x8x1xf32>
    %104 = vector.broadcast %103 : vector<4x8x1xf32> to vector<4x8x8xf32>
    %105 = arith.mulf %100, %104 : vector<4x8x8xf32>
    %106 = arith.truncf %105 : vector<4x8x8xf32> to vector<4x8x8xbf16>
    %cst_36 = arith.constant dense<0.000000e+00> : vector<4x8x32xf32>
    %107 = tpu.matmul %106, %94, %cst_36 {dimension_numbers = #tpu.dot_dimension_numbers<[2], [1], [1], [2], [0, 0, 0, 1, 1, 2], [0], [0]>} : vector<4x8x8xbf16>, vector<4x8x32xbf16>, vector<4x8x32xf32> -> vector<4x8x32xf32>
    %108 = tpu.transpose %107, [1, 0, 2] : vector<4x8x32xf32> -> vector<8x4x32xf32>
    %109 = vector.shape_cast %108 : vector<8x4x32xf32> to vector<8x128xf32>
    %110 = arith.truncf %109 : vector<8x128xf32> to vector<8x128xbf16>
    %c0_37 = arith.constant 0 : index
    %c0_38 = arith.constant 0 : index
    %111 = vector.load %arg7[%c0_37, %c0_38] : memref<128x128xbf16, #tpu.memory_space<vmem>>, vector<128x128xbf16>
    %cst_39 = arith.constant dense<0.000000e+00> : vector<8x128xf32>
    %112 = tpu.matmul %110, %111, %cst_39 {dimension_numbers = #tpu.dot_dimension_numbers<[1], [0], [0], [1], [0, 0, 1, 1], [], []>} : vector<8x128xbf16>, vector<128x128xbf16>, vector<8x128xf32> -> vector<8x128xf32>
    %113 = vector.extract_strided_slice %2 {offsets = [2, 0], sizes = [1, 128], strides = [1, 1]} : vector<4x128xf32> to vector<1x128xf32>
    %114 = vector.broadcast %113 : vector<1x128xf32> to vector<8x128xf32>
    %115 = arith.addf %112, %114 : vector<8x128xf32>
    %116 = arith.addf %69, %115 : vector<8x128xf32>
    %117 = vector.extract_strided_slice %3 {offsets = [2, 0], sizes = [1, 128], strides = [1, 1]} : vector<6x128xf32> to vector<1x128xf32>
    %118 = vector.extract_strided_slice %3 {offsets = [3, 0], sizes = [1, 128], strides = [1, 1]} : vector<6x128xf32> to vector<1x128xf32>
    %cst_40 = arith.constant dense<0.000000e+00> : vector<8xf32>
    %119 = vector.multi_reduction <add>, %116, %cst_40 [1] : vector<8x128xf32> to vector<8xf32>
    %120 = vector.shape_cast %119 : vector<8xf32> to vector<8x1xf32>
    %cst_41 = arith.constant 1.280000e+02 : f32
    %121 = vector.broadcast %cst_41 : f32 to vector<8x1xf32>
    %122 = arith.divf %120, %121 : vector<8x1xf32>
    %123 = vector.broadcast %122 : vector<8x1xf32> to vector<8x128xf32>
    %124 = arith.subf %116, %123 : vector<8x128xf32>
    %125 = vector.broadcast %122 : vector<8x1xf32> to vector<8x128xf32>
    %126 = arith.subf %116, %125 : vector<8x128xf32>
    %127 = arith.mulf %124, %126 : vector<8x128xf32>
    %cst_42 = arith.constant dense<0.000000e+00> : vector<8xf32>
    %128 = vector.multi_reduction <add>, %127, %cst_42 [1] : vector<8x128xf32> to vector<8xf32>
    %129 = vector.shape_cast %128 : vector<8xf32> to vector<8x1xf32>
    %cst_43 = arith.constant 1.280000e+02 : f32
    %130 = vector.broadcast %cst_43 : f32 to vector<8x1xf32>
    %131 = arith.divf %129, %130 : vector<8x1xf32>
    %132 = vector.broadcast %122 : vector<8x1xf32> to vector<8x128xf32>
    %133 = arith.subf %116, %132 : vector<8x128xf32>
    %cst_44 = arith.constant 9.99999974E-6 : f32
    %134 = vector.broadcast %cst_44 : f32 to vector<8x1xf32>
    %135 = arith.addf %131, %134 : vector<8x1xf32>
    %136 = math.rsqrt %135 : vector<8x1xf32>
    %137 = vector.broadcast %136 : vector<8x1xf32> to vector<8x128xf32>
    %138 = arith.mulf %133, %137 : vector<8x128xf32>
    %139 = vector.broadcast %117 : vector<1x128xf32> to vector<8x128xf32>
    %140 = arith.mulf %138, %139 : vector<8x128xf32>
    %141 = vector.broadcast %118 : vector<1x128xf32> to vector<8x128xf32>
    %142 = arith.addf %140, %141 : vector<8x128xf32>
    %143 = arith.truncf %142 : vector<8x128xf32> to vector<8x128xbf16>
    %c0_45 = arith.constant 0 : index
    %c0_46 = arith.constant 0 : index
    %144 = vector.load %arg8[%c0_45, %c0_46] : memref<128x256xbf16, #tpu.memory_space<vmem>>, vector<128x256xbf16>
    %cst_47 = arith.constant dense<0.000000e+00> : vector<8x256xf32>
    %145 = tpu.matmul %143, %144, %cst_47 {dimension_numbers = #tpu.dot_dimension_numbers<[1], [0], [0], [1], [0, 0, 1, 1], [], []>} : vector<8x128xbf16>, vector<128x256xbf16>, vector<8x256xf32> -> vector<8x256xf32>
    %c0_48 = arith.constant 0 : index
    %c0_49 = arith.constant 0 : index
    %146 = vector.load %arg12[%c0_48, %c0_49] : memref<1x256xf32, #tpu.memory_space<vmem>>, vector<1x256xf32>
    %147 = vector.broadcast %146 : vector<1x256xf32> to vector<8x256xf32>
    %148 = arith.addf %145, %147 : vector<8x256xf32>
    %cst_50 = arith.constant 0.000000e+00 : f32
    %149 = vector.broadcast %cst_50 : f32 to vector<8x256xf32>
    %150 = arith.maximumf %148, %149 : vector<8x256xf32>
    %151 = arith.truncf %150 : vector<8x256xf32> to vector<8x256xbf16>
    %c0_51 = arith.constant 0 : index
    %c0_52 = arith.constant 0 : index
    %152 = vector.load %arg9[%c0_51, %c0_52] : memref<256x128xbf16, #tpu.memory_space<vmem>>, vector<256x128xbf16>
    %cst_53 = arith.constant dense<0.000000e+00> : vector<8x128xf32>
    %153 = tpu.matmul %151, %152, %cst_53 {dimension_numbers = #tpu.dot_dimension_numbers<[1], [0], [0], [1], [0, 0, 1, 1], [], []>} : vector<8x256xbf16>, vector<256x128xbf16>, vector<8x128xf32> -> vector<8x128xf32>
    %154 = vector.extract_strided_slice %2 {offsets = [3, 0], sizes = [1, 128], strides = [1, 1]} : vector<4x128xf32> to vector<1x128xf32>
    %155 = vector.broadcast %154 : vector<1x128xf32> to vector<8x128xf32>
    %156 = arith.addf %153, %155 : vector<8x128xf32>
    %157 = arith.addf %142, %156 : vector<8x128xf32>
    %158 = vector.extract_strided_slice %3 {offsets = [4, 0], sizes = [1, 128], strides = [1, 1]} : vector<6x128xf32> to vector<1x128xf32>
    %159 = vector.extract_strided_slice %3 {offsets = [5, 0], sizes = [1, 128], strides = [1, 1]} : vector<6x128xf32> to vector<1x128xf32>
    %cst_54 = arith.constant dense<0.000000e+00> : vector<8xf32>
    %160 = vector.multi_reduction <add>, %157, %cst_54 [1] : vector<8x128xf32> to vector<8xf32>
    %161 = vector.shape_cast %160 : vector<8xf32> to vector<8x1xf32>
    %cst_55 = arith.constant 1.280000e+02 : f32
    %162 = vector.broadcast %cst_55 : f32 to vector<8x1xf32>
    %163 = arith.divf %161, %162 : vector<8x1xf32>
    %164 = vector.broadcast %163 : vector<8x1xf32> to vector<8x128xf32>
    %165 = arith.subf %157, %164 : vector<8x128xf32>
    %166 = vector.broadcast %163 : vector<8x1xf32> to vector<8x128xf32>
    %167 = arith.subf %157, %166 : vector<8x128xf32>
    %168 = arith.mulf %165, %167 : vector<8x128xf32>
    %cst_56 = arith.constant dense<0.000000e+00> : vector<8xf32>
    %169 = vector.multi_reduction <add>, %168, %cst_56 [1] : vector<8x128xf32> to vector<8xf32>
    %170 = vector.shape_cast %169 : vector<8xf32> to vector<8x1xf32>
    %cst_57 = arith.constant 1.280000e+02 : f32
    %171 = vector.broadcast %cst_57 : f32 to vector<8x1xf32>
    %172 = arith.divf %170, %171 : vector<8x1xf32>
    %173 = vector.broadcast %163 : vector<8x1xf32> to vector<8x128xf32>
    %174 = arith.subf %157, %173 : vector<8x128xf32>
    %cst_58 = arith.constant 9.99999974E-6 : f32
    %175 = vector.broadcast %cst_58 : f32 to vector<8x1xf32>
    %176 = arith.addf %172, %175 : vector<8x1xf32>
    %177 = math.rsqrt %176 : vector<8x1xf32>
    %178 = vector.broadcast %177 : vector<8x1xf32> to vector<8x128xf32>
    %179 = arith.mulf %174, %178 : vector<8x128xf32>
    %180 = vector.broadcast %158 : vector<1x128xf32> to vector<8x128xf32>
    %181 = arith.mulf %179, %180 : vector<8x128xf32>
    %182 = vector.broadcast %159 : vector<1x128xf32> to vector<8x128xf32>
    %183 = arith.addf %181, %182 : vector<8x128xf32>
    %c0_59 = arith.constant 0 : index
    %c0_60 = arith.constant 0 : index
    %c0_61 = arith.constant 0 : index
    %184 = vector.load %arg16[%c0_59, %c0_60, %c0_61] : memref<1x8x128xf32, #tpu.memory_space<vmem>>, vector<1x8x128xf32>
    %185 = vector.shape_cast %184 : vector<1x8x128xf32> to vector<8x128xf32>
    %186 = vector.shape_cast %183 : vector<8x128xf32> to vector<1x8x128xf32>
    tpu.vector_store %arg16[%c0_59, %c0_60, %c0_61], %186 {strides = array<i32>} : memref<1x8x128xf32, #tpu.memory_space<vmem>>, vector<1x8x128xf32>,
    return
  }
  func.func @transform_0(%arg0: i32) -> (i32, i32, i32) {
    %c0_i32 = arith.constant 0 : i32
    %c0_i32_0 = arith.constant 0 : i32
    %c0_i32_1 = arith.constant 0 : i32
    return %arg0, %c0_i32, %c0_i32_0 : i32, i32, i32
  }
  func.func @transform_1(%arg0: i32) -> (i32, i32, i32) {
    %c0_i32 = arith.constant 0 : i32
    %c0_i32_0 = arith.constant 0 : i32
    %c0_i32_1 = arith.constant 0 : i32
    return %arg0, %c0_i32, %c0_i32_0 : i32, i32, i32
  }
  func.func @transform_2(%arg0: i32) -> (i32, i32) {
    %c0_i32 = arith.constant 0 : i32
    %c0_i32_0 = arith.constant 0 : i32
    %c0_i32_1 = arith.constant 0 : i32
    return %c0_i32, %c0_i32_0 : i32, i32
  }
  func.func @transform_3(%arg0: i32) -> (i32, i32) {
    %c0_i32 = arith.constant 0 : i32
    %c0_i32_0 = arith.constant 0 : i32
    %c0_i32_1 = arith.constant 0 : i32
    return %c0_i32, %c0_i32_0 : i32, i32
  }
  func.func @transform_4(%arg0: i32) -> (i32, i32) {
    %c0_i32 = arith.constant 0 : i32
    %c0_i32_0 = arith.constant 0 : i32
    %c0_i32_1 = arith.constant 0 : i32
    return %c0_i32, %c0_i32_0 : i32, i32
  }
  func.func @transform_5(%arg0: i32) -> (i32, i32) {
    %c0_i32 = arith.constant 0 : i32
    %c0_i32_0 = arith.constant 0 : i32
    %c0_i32_1 = arith.constant 0 : i32
    return %c0_i32, %c0_i32_0 : i32, i32
  }
  func.func @transform_6(%arg0: i32) -> (i32, i32) {
    %c0_i32 = arith.constant 0 : i32
    %c0_i32_0 = arith.constant 0 : i32
    %c0_i32_1 = arith.constant 0 : i32
    return %c0_i32, %c0_i32_0 : i32, i32
  }
  func.func @transform_7(%arg0: i32) -> (i32, i32) {
    %c0_i32 = arith.constant 0 : i32
    %c0_i32_0 = arith.constant 0 : i32
    %c0_i32_1 = arith.constant 0 : i32
    return %c0_i32, %c0_i32_0 : i32, i32
  }
  func.func @transform_8(%arg0: i32) -> (i32, i32) {
    %c0_i32 = arith.constant 0 : i32
    %c0_i32_0 = arith.constant 0 : i32
    %c0_i32_1 = arith.constant 0 : i32
    return %c0_i32, %c0_i32_0 : i32, i32
  }
  func.func @transform_9(%arg0: i32) -> (i32, i32) {
    %c0_i32 = arith.constant 0 : i32
    %c0_i32_0 = arith.constant 0 : i32
    %c0_i32_1 = arith.constant 0 : i32
    return %c0_i32, %c0_i32_0 : i32, i32
  }
  func.func @transform_10(%arg0: i32) -> (i32, i32) {
    %c0_i32 = arith.constant 0 : i32
    %c0_i32_0 = arith.constant 0 : i32
    %c0_i32_1 = arith.constant 0 : i32
    return %c0_i32, %c0_i32_0 : i32, i32
  }
  func.func @transform_11(%arg0: i32) -> (i32, i32) {
    %c0_i32 = arith.constant 0 : i32
    %c0_i32_0 = arith.constant 0 : i32
    %c0_i32_1 = arith.constant 0 : i32
    return %c0_i32, %c0_i32_0 : i32, i32
  }
  func.func @transform_12(%arg0: i32) -> (i32, i32) {
    %c0_i32 = arith.constant 0 : i32
    %c0_i32_0 = arith.constant 0 : i32
    %c0_i32_1 = arith.constant 0 : i32
    return %c0_i32, %c0_i32_0 : i32, i32
  }
  func.func @transform_13(%arg0: i32) -> (i32, i32) {
    %c0_i32 = arith.constant 0 : i32
    %c0_i32_0 = arith.constant 0 : i32
    %c0_i32_1 = arith.constant 0 : i32
    return %c0_i32, %c0_i32_0 : i32, i32
  }
  func.func @transform_14(%arg0: i32) -> (i32, i32) {
    %c0_i32 = arith.constant 0 : i32
    %c0_i32_0 = arith.constant 0 : i32
    %c0_i32_1 = arith.constant 0 : i32
    return %c0_i32, %c0_i32_0 : i32, i32
  }
  func.func @transform_15(%arg0: i32) -> (i32, i32, i32) {
    %c0_i32 = arith.constant 0 : i32
    %c0_i32_0 = arith.constant 0 : i32
    %c0_i32_1 = arith.constant 0 : i32
    return %arg0, %c0_i32, %c0_i32_0 : i32, i32, i32
  }
}

module attributes {stable_mosaic.version = 11 : i64} {
  func.func @_decoder_layer_kernel(%arg0: i32, %arg1: memref<1x8x128xf32, #tpu.memory_space<vmem>>, %arg2: memref<1x8x128xf32, #tpu.memory_space<vmem>>, %arg3: memref<128x384xbf16, #tpu.memory_space<vmem>>, %arg4: memref<128x128xbf16, #tpu.memory_space<vmem>>, %arg5: memref<128x128xbf16, #tpu.memory_space<vmem>>, %arg6: memref<128x256xbf16, #tpu.memory_space<vmem>>, %arg7: memref<128x128xbf16, #tpu.memory_space<vmem>>, %arg8: memref<128x256xbf16, #tpu.memory_space<vmem>>, %arg9: memref<256x128xbf16, #tpu.memory_space<vmem>>, %arg10: memref<1x384xf32, #tpu.memory_space<vmem>>, %arg11: memref<1x256xf32, #tpu.memory_space<vmem>>, %arg12: memref<1x256xf32, #tpu.memory_space<vmem>>, %arg13: memref<4x128xf32, #tpu.memory_space<vmem>>, %arg14: memref<6x128xf32, #tpu.memory_space<vmem>>, %arg15: memref<2x128xf32, #tpu.memory_space<vmem>>, %arg16: memref<1x8x128xf32, #tpu.memory_space<vmem>>) attributes {dimension_semantics = [#tpu.dimension_semantics<parallel>], iteration_bounds = array<i64: 2>, scalar_prefetch = 0 : i64, scratch_operands = 0 : i64, tpu.core_type = #tpu.core_type<tc>, window_params = [{transform_indices = @transform_0, window_bounds = array<i64: 1, 8, 128>}, {transform_indices = @transform_1, window_bounds = array<i64: 1, 8, 128>}, {pipeline_mode = #tpu.pipeline_mode<synchronous>, transform_indices = @transform_2, window_bounds = array<i64: 128, 384>}, {pipeline_mode = #tpu.pipeline_mode<synchronous>, transform_indices = @transform_3, window_bounds = array<i64: 128, 128>}, {pipeline_mode = #tpu.pipeline_mode<synchronous>, transform_indices = @transform_4, window_bounds = array<i64: 128, 128>}, {pipeline_mode = #tpu.pipeline_mode<synchronous>, transform_indices = @transform_5, window_bounds = array<i64: 128, 256>}, {pipeline_mode = #tpu.pipeline_mode<synchronous>, transform_indices = @transform_6, window_bounds = array<i64: 128, 128>}, {pipeline_mode = #tpu.pipeline_mode<synchronous>, transform_indices = @transform_7, window_bounds = array<i64: 128, 256>}, {pipeline_mode = #tpu.pipeline_mode<synchronous>, transform_indices = @transform_8, window_bounds = array<i64: 256, 128>}, {pipeline_mode = #tpu.pipeline_mode<synchronous>, transform_indices = @transform_9, window_bounds = array<i64: 1, 384>}, {pipeline_mode = #tpu.pipeline_mode<synchronous>, transform_indices = @transform_10, window_bounds = array<i64: 1, 256>}, {pipeline_mode = #tpu.pipeline_mode<synchronous>, transform_indices = @transform_11, window_bounds = array<i64: 1, 256>}, {pipeline_mode = #tpu.pipeline_mode<synchronous>, transform_indices = @transform_12, window_bounds = array<i64: 4, 128>}, {pipeline_mode = #tpu.pipeline_mode<synchronous>, transform_indices = @transform_13, window_bounds = array<i64: 6, 128>}, {pipeline_mode = #tpu.pipeline_mode<synchronous>, transform_indices = @transform_14, window_bounds = array<i64: 2, 128>}, {transform_indices = @transform_15, window_bounds = array<i64: 1, 8, 128>}]} {
    %c0 = arith.constant 0 : index
    %c0_0 = arith.constant 0 : index
    %c0_1 = arith.constant 0 : index
    %0 = vector.load %arg1[%c0, %c0_0, %c0_1] : memref<1x8x128xf32, #tpu.memory_space<vmem>>, vector<1x8x128xf32>
    %1 = vector.shape_cast %0 : vector<1x8x128xf32> to vector<8x128xf32>
    %c0_2 = arith.constant 0 : index
    %c0_3 = arith.constant 0 : index
    %2 = vector.load %arg13[%c0_2, %c0_3] : memref<4x128xf32, #tpu.memory_space<vmem>>, vector<4x128xf32>
    %c0_4 = arith.constant 0 : index
    %c0_5 = arith.constant 0 : index
    %3 = vector.load %arg14[%c0_4, %c0_5] : memref<6x128xf32, #tpu.memory_space<vmem>>, vector<6x128xf32>
    %4 = arith.truncf %1 : vector<8x128xf32> to vector<8x128xbf16>
    %c0_6 = arith.constant 0 : index
    %c0_7 = arith.constant 0 : index
    %5 = vector.load %arg3[%c0_6, %c0_7] : memref<128x384xbf16, #tpu.memory_space<vmem>>, vector<128x384xbf16>
    %cst = arith.constant dense<0.000000e+00> : vector<8x384xf32>
    %6 = tpu.matmul %4, %5, %cst {dimension_numbers = #tpu.dot_dimension_numbers<[1], [0], [0], [1], [0, 0, 1, 1], [], []>} : vector<8x128xbf16>, vector<128x384xbf16>, vector<8x384xf32> -> vector<8x384xf32>
    %c0_8 = arith.constant 0 : index
    %c0_9 = arith.constant 0 : index
    %7 = vector.load %arg10[%c0_8, %c0_9] : memref<1x384xf32, #tpu.memory_space<vmem>>, vector<1x384xf32>
    %8 = vector.broadcast %7 : vector<1x384xf32> to vector<8x384xf32>
    %9 = arith.addf %6, %8 : vector<8x384xf32>
    %10 = vector.extract_strided_slice %9 {offsets = [0, 0], sizes = [8, 128], strides = [1, 1]} : vector<8x384xf32> to vector<8x128xf32>
    %11 = vector.extract_strided_slice %9 {offsets = [0, 128], sizes = [8, 128], strides = [1, 1]} : vector<8x384xf32> to vector<8x128xf32>
    %12 = vector.extract_strided_slice %9 {offsets = [0, 256], sizes = [8, 128], strides = [1, 1]} : vector<8x384xf32> to vector<8x128xf32>
    %13 = arith.truncf %10 : vector<8x128xf32> to vector<8x128xbf16>
    %14 = vector.shape_cast %13 : vector<8x128xbf16> to vector<8x4x32xbf16>
    %15 = tpu.transpose %14, [1, 0, 2] : vector<8x4x32xbf16> -> vector<4x8x32xbf16>
    %16 = arith.truncf %11 : vector<8x128xf32> to vector<8x128xbf16>
    %17 = vector.shape_cast %16 : vector<8x128xbf16> to vector<8x4x32xbf16>
    %18 = tpu.transpose %17, [1, 0, 2] : vector<8x4x32xbf16> -> vector<4x8x32xbf16>
    %19 = arith.truncf %12 : vector<8x128xf32> to vector<8x128xbf16>
    %20 = vector.shape_cast %19 : vector<8x128xbf16> to vector<8x4x32xbf16>
    %21 = tpu.transpose %20, [1, 0, 2] : vector<8x4x32xbf16> -> vector<4x8x32xbf16>
    %cst_10 = arith.constant dense<0.000000e+00> : vector<4x8x8xf32>
    %22 = tpu.matmul %15, %18, %cst_10 {dimension_numbers = #tpu.dot_dimension_numbers<[2], [2], [1], [1], [0, 0, 0, 1, 1, 1], [0], [0]>} : vector<4x8x32xbf16>, vector<4x8x32xbf16>, vector<4x8x8xf32> -> vector<4x8x8xf32>
    %cst_11 = arith.constant dense<0xFF800000> : vector<4x8xf32>
    %23 = vector.multi_reduction <maximumf>, %22, %cst_11 [2] : vector<4x8x8xf32> to vector<4x8xf32>
    %24 = vector.shape_cast %23 : vector<4x8xf32> to vector<4x8x1xf32>
    %25 = vector.broadcast %24 : vector<4x8x1xf32> to vector<4x8x8xf32>
    %26 = arith.subf %22, %25 : vector<4x8x8xf32>
    %27 = math.exp %26 : vector<4x8x8xf32>
    %cst_12 = arith.constant dense<0.000000e+00> : vector<4x8xf32>
    %28 = vector.multi_reduction <add>, %27, %cst_12 [2] : vector<4x8x8xf32> to vector<4x8xf32>
    %29 = vector.shape_cast %28 : vector<4x8xf32> to vector<4x8x1xf32>
    %30 = tpu.reciprocal %29 {approx = true} : vector<4x8x1xf32> -> vector<4x8x1xf32>
    %31 = vector.broadcast %30 : vector<4x8x1xf32> to vector<4x8x8xf32>
    %32 = arith.mulf %27, %31 : vector<4x8x8xf32>
    %33 = arith.truncf %32 : vector<4x8x8xf32> to vector<4x8x8xbf16>
    %cst_13 = arith.constant dense<0.000000e+00> : vector<4x8x32xf32>
    %34 = tpu.matmul %33, %21, %cst_13 {dimension_numbers = #tpu.dot_dimension_numbers<[2], [1], [1], [2], [0, 0, 0, 1, 1, 2], [0], [0]>} : vector<4x8x8xbf16>, vector<4x8x32xbf16>, vector<4x8x32xf32> -> vector<4x8x32xf32>
    %35 = tpu.transpose %34, [1, 0, 2] : vector<4x8x32xf32> -> vector<8x4x32xf32>
    %36 = vector.shape_cast %35 : vector<8x4x32xf32> to vector<8x128xf32>
    %37 = arith.truncf %36 : vector<8x128xf32> to vector<8x128xbf16>
    %c0_14 = arith.constant 0 : index
    %c0_15 = arith.constant 0 : index
    %38 = vector.load %arg4[%c0_14, %c0_15] : memref<128x128xbf16, #tpu.memory_space<vmem>>, vector<128x128xbf16>
    %cst_16 = arith.constant dense<0.000000e+00> : vector<8x128xf32>
    %39 = tpu.matmul %37, %38, %cst_16 {dimension_numbers = #tpu.dot_dimension_numbers<[1], [0], [0], [1], [0, 0, 1, 1], [], []>} : vector<8x128xbf16>, vector<128x128xbf16>, vector<8x128xf32> -> vector<8x128xf32>
    %40 = vector.extract_strided_slice %2 {offsets = [0, 0], sizes = [1, 128], strides = [1, 1]} : vector<4x128xf32> to vector<1x128xf32>
    %41 = vector.broadcast %40 : vector<1x128xf32> to vector<8x128xf32>
    %42 = arith.addf %39, %41 : vector<8x128xf32>
    %43 = arith.addf %1, %42 : vector<8x128xf32>
    %44 = vector.extract_strided_slice %3 {offsets = [0, 0], sizes = [1, 128], strides = [1, 1]} : vector<6x128xf32> to vector<1x128xf32>
    %45 = vector.extract_strided_slice %3 {offsets = [1, 0], sizes = [1, 128], strides = [1, 1]} : vector<6x128xf32> to vector<1x128xf32>
    %cst_17 = arith.constant dense<0.000000e+00> : vector<8xf32>
    %46 = vector.multi_reduction <add>, %43, %cst_17 [1] : vector<8x128xf32> to vector<8xf32>
    %47 = vector.shape_cast %46 : vector<8xf32> to vector<8x1xf32>
    %cst_18 = arith.constant 1.280000e+02 : f32
    %48 = vector.broadcast %cst_18 : f32 to vector<8x1xf32>
    %49 = arith.divf %47, %48 : vector<8x1xf32>
    %50 = vector.broadcast %49 : vector<8x1xf32> to vector<8x128xf32>
    %51 = arith.subf %43, %50 : vector<8x128xf32>
    %52 = vector.broadcast %49 : vector<8x1xf32> to vector<8x128xf32>
    %53 = arith.subf %43, %52 : vector<8x128xf32>
    %54 = arith.mulf %51, %53 : vector<8x128xf32>
    %cst_19 = arith.constant dense<0.000000e+00> : vector<8xf32>
    %55 = vector.multi_reduction <add>, %54, %cst_19 [1] : vector<8x128xf32> to vector<8xf32>
    %56 = vector.shape_cast %55 : vector<8xf32> to vector<8x1xf32>
    %cst_20 = arith.constant 1.280000e+02 : f32
    %57 = vector.broadcast %cst_20 : f32 to vector<8x1xf32>
    %58 = arith.divf %56, %57 : vector<8x1xf32>
    %59 = vector.broadcast %49 : vector<8x1xf32> to vector<8x128xf32>
    %60 = arith.subf %43, %59 : vector<8x128xf32>
    %cst_21 = arith.constant 9.99999974E-6 : f32
    %61 = vector.broadcast %cst_21 : f32 to vector<8x1xf32>
    %62 = arith.addf %58, %61 : vector<8x1xf32>
    %63 = math.rsqrt %62 : vector<8x1xf32>
    %64 = vector.broadcast %63 : vector<8x1xf32> to vector<8x128xf32>
    %65 = arith.mulf %60, %64 : vector<8x128xf32>
    %66 = vector.broadcast %44 : vector<1x128xf32> to vector<8x128xf32>
    %67 = arith.mulf %65, %66 : vector<8x128xf32>
    %68 = vector.broadcast %45 : vector<1x128xf32> to vector<8x128xf32>
    %69 = arith.addf %67, %68 : vector<8x128xf32>
    %70 = arith.truncf %69 : vector<8x128xf32> to vector<8x128xbf16>
    %c0_22 = arith.constant 0 : index
    %c0_23 = arith.constant 0 : index
    %71 = vector.load %arg5[%c0_22, %c0_23] : memref<128x128xbf16, #tpu.memory_space<vmem>>, vector<128x128xbf16>
    %cst_24 = arith.constant dense<0.000000e+00> : vector<8x128xf32>
    %72 = tpu.matmul %70, %71, %cst_24 {dimension_numbers = #tpu.dot_dimension_numbers<[1], [0], [0], [1], [0, 0, 1, 1], [], []>} : vector<8x128xbf16>, vector<128x128xbf16>, vector<8x128xf32> -> vector<8x128xf32>
    %73 = vector.extract_strided_slice %2 {offsets = [1, 0], sizes = [1, 128], strides = [1, 1]} : vector<4x128xf32> to vector<1x128xf32>
    %74 = vector.broadcast %73 : vector<1x128xf32> to vector<8x128xf32>
    %75 = arith.addf %72, %74 : vector<8x128xf32>
    %c0_25 = arith.constant 0 : index
    %c0_26 = arith.constant 0 : index
    %c0_27 = arith.constant 0 : index
    %76 = vector.load %arg2[%c0_25, %c0_26, %c0_27] : memref<1x8x128xf32, #tpu.memory_space<vmem>>, vector<1x8x128xf32>
    %77 = vector.shape_cast %76 : vector<1x8x128xf32> to vector<8x128xf32>
    %78 = arith.truncf %77 : vector<8x128xf32> to vector<8x128xbf16>
    %c0_28 = arith.constant 0 : index
    %c0_29 = arith.constant 0 : index
    %79 = vector.load %arg6[%c0_28, %c0_29] : memref<128x256xbf16, #tpu.memory_space<vmem>>, vector<128x256xbf16>
    %cst_30 = arith.constant dense<0.000000e+00> : vector<8x256xf32>
    %80 = tpu.matmul %78, %79, %cst_30 {dimension_numbers = #tpu.dot_dimension_numbers<[1], [0], [0], [1], [0, 0, 1, 1], [], []>} : vector<8x128xbf16>, vector<128x256xbf16>, vector<8x256xf32> -> vector<8x256xf32>
    %c0_31 = arith.constant 0 : index
    %c0_32 = arith.constant 0 : index
    %81 = vector.load %arg11[%c0_31, %c0_32] : memref<1x256xf32, #tpu.memory_space<vmem>>, vector<1x256xf32>
    %82 = vector.broadcast %81 : vector<1x256xf32> to vector<8x256xf32>
    %83 = arith.addf %80, %82 : vector<8x256xf32>
    %84 = vector.extract_strided_slice %83 {offsets = [0, 0], sizes = [8, 128], strides = [1, 1]} : vector<8x256xf32> to vector<8x128xf32>
    %85 = vector.extract_strided_slice %83 {offsets = [0, 128], sizes = [8, 128], strides = [1, 1]} : vector<8x256xf32> to vector<8x128xf32>
    %86 = arith.truncf %75 : vector<8x128xf32> to vector<8x128xbf16>
    %87 = vector.shape_cast %86 : vector<8x128xbf16> to vector<8x4x32xbf16>
    %88 = tpu.transpose %87, [1, 0, 2] : vector<8x4x32xbf16> -> vector<4x8x32xbf16>
    %89 = arith.truncf %84 : vector<8x128xf32> to vector<8x128xbf16>
    %90 = vector.shape_cast %89 : vector<8x128xbf16> to vector<8x4x32xbf16>
    %91 = tpu.transpose %90, [1, 0, 2] : vector<8x4x32xbf16> -> vector<4x8x32xbf16>
    %92 = arith.truncf %85 : vector<8x128xf32> to vector<8x128xbf16>
    %93 = vector.shape_cast %92 : vector<8x128xbf16> to vector<8x4x32xbf16>
    %94 = tpu.transpose %93, [1, 0, 2] : vector<8x4x32xbf16> -> vector<4x8x32xbf16>
    %cst_33 = arith.constant dense<0.000000e+00> : vector<4x8x8xf32>
    %95 = tpu.matmul %88, %91, %cst_33 {dimension_numbers = #tpu.dot_dimension_numbers<[2], [2], [1], [1], [0, 0, 0, 1, 1, 1], [0], [0]>} : vector<4x8x32xbf16>, vector<4x8x32xbf16>, vector<4x8x8xf32> -> vector<4x8x8xf32>
    %cst_34 = arith.constant dense<0xFF800000> : vector<4x8xf32>
    %96 = vector.multi_reduction <maximumf>, %95, %cst_34 [2] : vector<4x8x8xf32> to vector<4x8xf32>
    %97 = vector.shape_cast %96 : vector<4x8xf32> to vector<4x8x1xf32>
    %98 = vector.broadcast %97 : vector<4x8x1xf32> to vector<4x8x8xf32>
    %99 = arith.subf %95, %98 : vector<4x8x8xf32>
    %100 = math.exp %99 : vector<4x8x8xf32>
    %cst_35 = arith.constant dense<0.000000e+00> : vector<4x8xf32>
    %101 = vector.multi_reduction <add>, %100, %cst_35 [2] : vector<4x8x8xf32> to vector<4x8xf32>
    %102 = vector.shape_cast %101 : vector<4x8xf32> to vector<4x8x1xf32>
    %103 = tpu.reciprocal %102 {approx = true} : vector<4x8x1xf32> -> vector<4x8x1xf32>
    %104 = vector.broadcast %103 : vector<4x8x1xf32> to vector<4x8x8xf32>
    %105 = arith.mulf %100, %104 : vector<4x8x8xf32>
    %106 = arith.truncf %105 : vector<4x8x8xf32> to vector<4x8x8xbf16>
    %cst_36 = arith.constant dense<0.000000e+00> : vector<4x8x32xf32>
    %107 = tpu.matmul %106, %94, %cst_36 {dimension_numbers = #tpu.dot_dimension_numbers<[2], [1], [1], [2], [0, 0, 0, 1, 1, 2], [0], [0]>} : vector<4x8x8xbf16>, vector<4x8x32xbf16>, vector<4x8x32xf32> -> vector<4x8x32xf32>
    %108 = tpu.transpose %107, [1, 0, 2] : vector<4x8x32xf32> -> vector<8x4x32xf32>
    %109 = vector.shape_cast %108 : vector<8x4x32xf32> to vector<8x128xf32>
    %110 = arith.truncf %109 : vector<8x128xf32> to vector<8x128xbf16>
    %c0_37 = arith.constant 0 : index
    %c0_38 = arith.constant 0 : index
    %111 = vector.load %arg7[%c0_37, %c0_38] : memref<128x128xbf16, #tpu.memory_space<vmem>>, vector<128x128xbf16>
    %cst_39 = arith.constant dense<0.000000e+00> : vector<8x128xf32>
    %112 = tpu.matmul %110, %111, %cst_39 {dimension_numbers = #tpu.dot_dimension_numbers<[1], [0], [0], [1], [0, 0, 1, 1], [], []>} : vector<8x128xbf16>, vector<128x128xbf16>, vector<8x128xf32> -> vector<8x128xf32>
    %113 = vector.extract_strided_slice %2 {offsets = [2, 0], sizes = [1, 128], strides = [1, 1]} : vector<4x128xf32> to vector<1x128xf32>
    %114 = vector.broadcast %113 : vector<1x128xf32> to vector<8x128xf32>
    %115 = arith.addf %112, %114 : vector<8x128xf32>
    %116 = arith.addf %69, %115 : vector<8x128xf32>
    %117 = vector.extract_strided_slice %3 {offsets = [2, 0], sizes = [1, 128], strides = [1, 1]} : vector<6x128xf32> to vector<1x128xf32>
    %118 = vector.extract_strided_slice %3 {offsets = [3, 0], sizes = [1, 128], strides = [1, 1]} : vector<6x128xf32> to vector<1x128xf32>
    %cst_40 = arith.constant dense<0.000000e+00> : vector<8xf32>
    %119 = vector.multi_reduction <add>, %116, %cst_40 [1] : vector<8x128xf32> to vector<8xf32>
    %120 = vector.shape_cast %119 : vector<8xf32> to vector<8x1xf32>
    %cst_41 = arith.constant 1.280000e+02 : f32
    %121 = vector.broadcast %cst_41 : f32 to vector<8x1xf32>
    %122 = arith.divf %120, %121 : vector<8x1xf32>
    %123 = vector.broadcast %122 : vector<8x1xf32> to vector<8x128xf32>
    %124 = arith.subf %116, %123 : vector<8x128xf32>
    %125 = vector.broadcast %122 : vector<8x1xf32> to vector<8x128xf32>
    %126 = arith.subf %116, %125 : vector<8x128xf32>
    %127 = arith.mulf %124, %126 : vector<8x128xf32>
    %cst_42 = arith.constant dense<0.000000e+00> : vector<8xf32>
    %128 = vector.multi_reduction <add>, %127, %cst_42 [1] : vector<8x128xf32> to vector<8xf32>
    %129 = vector.shape_cast %128 : vector<8xf32> to vector<8x1xf32>
    %cst_43 = arith.constant 1.280000e+02 : f32
    %130 = vector.broadcast %cst_43 : f32 to vector<8x1xf32>
    %131 = arith.divf %129, %130 : vector<8x1xf32>
    %132 = vector.broadcast %122 : vector<8x1xf32> to vector<8x128xf32>
    %133 = arith.subf %116, %132 : vector<8x128xf32>
    %cst_44 = arith.constant 9.99999974E-6 : f32
    %134 = vector.broadcast %cst_44 : f32 to vector<8x1xf32>
    %135 = arith.addf %131, %134 : vector<8x1xf32>
    %136 = math.rsqrt %135 : vector<8x1xf32>
    %137 = vector.broadcast %136 : vector<8x1xf32> to vector<8x128xf32>
    %138 = arith.mulf %133, %137 : vector<8x128xf32>
    %139 = vector.broadcast %117 : vector<1x128xf32> to vector<8x128xf32>
    %140 = arith.mulf %138, %139 : vector<8x128xf32>
    %141 = vector.broadcast %118 : vector<1x128xf32> to vector<8x128xf32>
    %142 = arith.addf %140, %141 : vector<8x128xf32>
    %143 = arith.truncf %142 : vector<8x128xf32> to vector<8x128xbf16>
    %c0_45 = arith.constant 0 : index
    %c0_46 = arith.constant 0 : index
    %144 = vector.load %arg8[%c0_45, %c0_46] : memref<128x256xbf16, #tpu.memory_space<vmem>>, vector<128x256xbf16>
    %cst_47 = arith.constant dense<0.000000e+00> : vector<8x256xf32>
    %145 = tpu.matmul %143, %144, %cst_47 {dimension_numbers = #tpu.dot_dimension_numbers<[1], [0], [0], [1], [0, 0, 1, 1], [], []>} : vector<8x128xbf16>, vector<128x256xbf16>, vector<8x256xf32> -> vector<8x256xf32>
    %c0_48 = arith.constant 0 : index
    %c0_49 = arith.constant 0 : index
    %146 = vector.load %arg12[%c0_48, %c0_49] : memref<1x256xf32, #tpu.memory_space<vmem>>, vector<1x256xf32>
    %147 = vector.broadcast %146 : vector<1x256xf32> to vector<8x256xf32>
    %148 = arith.addf %145, %147 : vector<8x256xf32>
    %cst_50 = arith.constant 0.000000e+00 : f32
    %149 = vector.broadcast %cst_50 : f32 to vector<8x256xf32>
    %150 = arith.maximumf %148, %149 : vector<8x256xf32>
    %151 = arith.truncf %150 : vector<8x256xf32> to vector<8x256xbf16>
    %c0_51 = arith.constant 0 : index
    %c0_52 = arith.constant 0 : index
    %152 = vector.load %arg9[%c0_51, %c0_52] : memref<256x128xbf16, #tpu.memory_space<vmem>>, vector<256x128xbf16>
    %cst_53 = arith.constant dense<0.000000e+00> : vector<8x128xf32>
    %153 = tpu.matmul %151, %152, %cst_53 {dimension_numbers = #tpu.dot_dimension_numbers<[1], [0], [0], [1], [0, 0, 1, 1], [], []>} : vector<8x256xbf16>, vector<256x128xbf16>, vector<8x128xf32> -> vector<8x128xf32>
    %154 = vector.extract_strided_slice %2 {offsets = [3, 0], sizes = [1, 128], strides = [1, 1]} : vector<4x128xf32> to vector<1x128xf32>
    %155 = vector.broadcast %154 : vector<1x128xf32> to vector<8x128xf32>
    %156 = arith.addf %153, %155 : vector<8x128xf32>
    %157 = arith.addf %142, %156 : vector<8x128xf32>
    %158 = vector.extract_strided_slice %3 {offsets = [4, 0], sizes = [1, 128], strides = [1, 1]} : vector<6x128xf32> to vector<1x128xf32>
    %159 = vector.extract_strided_slice %3 {offsets = [5, 0], sizes = [1, 128], strides = [1, 1]} : vector<6x128xf32> to vector<1x128xf32>
    %cst_54 = arith.constant dense<0.000000e+00> : vector<8xf32>
    %160 = vector.multi_reduction <add>, %157, %cst_54 [1] : vector<8x128xf32> to vector<8xf32>
    %161 = vector.shape_cast %160 : vector<8xf32> to vector<8x1xf32>
    %cst_55 = arith.constant 1.280000e+02 : f32
    %162 = vector.broadcast %cst_55 : f32 to vector<8x1xf32>
    %163 = arith.divf %161, %162 : vector<8x1xf32>
    %164 = vector.broadcast %163 : vector<8x1xf32> to vector<8x128xf32>
    %165 = arith.subf %157, %164 : vector<8x128xf32>
    %166 = vector.broadcast %163 : vector<8x1xf32> to vector<8x128xf32>
    %167 = arith.subf %157, %166 : vector<8x128xf32>
    %168 = arith.mulf %165, %167 : vector<8x128xf32>
    %cst_56 = arith.constant dense<0.000000e+00> : vector<8xf32>
    %169 = vector.multi_reduction <add>, %168, %cst_56 [1] : vector<8x128xf32> to vector<8xf32>
    %170 = vector.shape_cast %169 : vector<8xf32> to vector<8x1xf32>
    %cst_57 = arith.constant 1.280000e+02 : f32
    %171 = vector.broadcast %cst_57 : f32 to vector<8x1xf32>
    %172 = arith.divf %170, %171 : vector<8x1xf32>
    %173 = vector.broadcast %163 : vector<8x1xf32> to vector<8x128xf32>
    %174 = arith.subf %157, %173 : vector<8x128xf32>
    %cst_58 = arith.constant 9.99999974E-6 : f32
    %175 = vector.broadcast %cst_58 : f32 to vector<8x1xf32>
    %176 = arith.addf %172, %175 : vector<8x1xf32>
    %177 = math.rsqrt %176 : vector<8x1xf32>
    %178 = vector.broadcast %177 : vector<8x1xf32> to vector<8x128xf32>
    %179 = arith.mulf %174, %178 : vector<8x128xf32>
    %180 = vector.broadcast %158 : vector<1x128xf32> to vector<8x128xf32>
    %181 = arith.mulf %179, %180 : vector<8x128xf32>
    %182 = vector.broadcast %159 : vector<1x128xf32> to vector<8x128xf32>
    %183 = arith.addf %181, %182 : vector<8x128xf32>
    %c0_59 = arith.constant 0 : index
    %c0_60 = arith.constant 0 : index
    %184 = vector.load %arg15[%c0_59, %c0_60] : memref<2x128xf32, #tpu.memory_space<vmem>>, vector<1x128xf32>
    %c1 = arith.constant 1 : index
    %c0_61 = arith.constant 0 : index
    %185 = vector.load %arg15[%c1, %c0_61] : memref<2x128xf32, #tpu.memory_space<vmem>>, vector<1x128xf32>
    %cst_62 = arith.constant dense<0.000000e+00> : vector<8xf32>
    %186 = vector.multi_reduction <add>, %183, %cst_62 [1] : vector<8x128xf32> to vector<8xf32>
    %187 = vector.shape_cast %186 : vector<8xf32> to vector<8x1xf32>
    %cst_63 = arith.constant 1.280000e+02 : f32
    %188 = vector.broadcast %cst_63 : f32 to vector<8x1xf32>
    %189 = arith.divf %187, %188 : vector<8x1xf32>
    %190 = vector.broadcast %189 : vector<8x1xf32> to vector<8x128xf32>
    %191 = arith.subf %183, %190 : vector<8x128xf32>
    %192 = vector.broadcast %189 : vector<8x1xf32> to vector<8x128xf32>
    %193 = arith.subf %183, %192 : vector<8x128xf32>
    %194 = arith.mulf %191, %193 : vector<8x128xf32>
    %cst_64 = arith.constant dense<0.000000e+00> : vector<8xf32>
    %195 = vector.multi_reduction <add>, %194, %cst_64 [1] : vector<8x128xf32> to vector<8xf32>
    %196 = vector.shape_cast %195 : vector<8xf32> to vector<8x1xf32>
    %cst_65 = arith.constant 1.280000e+02 : f32
    %197 = vector.broadcast %cst_65 : f32 to vector<8x1xf32>
    %198 = arith.divf %196, %197 : vector<8x1xf32>
    %199 = vector.broadcast %189 : vector<8x1xf32> to vector<8x128xf32>
    %200 = arith.subf %183, %199 : vector<8x128xf32>
    %cst_66 = arith.constant 9.99999974E-6 : f32
    %201 = vector.broadcast %cst_66 : f32 to vector<8x1xf32>
    %202 = arith.addf %198, %201 : vector<8x1xf32>
    %203 = math.rsqrt %202 : vector<8x1xf32>
    %204 = vector.broadcast %203 : vector<8x1xf32> to vector<8x128xf32>
    %205 = arith.mulf %200, %204 : vector<8x128xf32>
    %206 = vector.broadcast %184 : vector<1x128xf32> to vector<8x128xf32>
    %207 = arith.mulf %205, %206 : vector<8x128xf32>
    %208 = vector.broadcast %185 : vector<1x128xf32> to vector<8x128xf32>
    %209 = arith.addf %207, %208 : vector<8x128xf32>
    %c0_67 = arith.constant 0 : index
    %c0_68 = arith.constant 0 : index
    %c0_69 = arith.constant 0 : index
    %210 = vector.load %arg16[%c0_67, %c0_68, %c0_69] : memref<1x8x128xf32, #tpu.memory_space<vmem>>, vector<1x8x128xf32>
    %211 = vector.shape_cast %210 : vector<1x8x128xf32> to vector<8x128xf32>
    %212 = vector.shape_cast %209 : vector<8x128xf32> to vector<1x8x128xf32>
    tpu.vector_store %arg16[%c0_67, %c0_68, %c0_69], %212 {strides = array<i32>} : memref<1x8x128xf32, #tpu.memory_space<vmem>>, vector<1x8x128xf32>,
    return
  }
  func.func @transform_0(%arg0: i32) -> (i32, i32, i32) {
    %c0_i32 = arith.constant 0 : i32
    %c0_i32_0 = arith.constant 0 : i32
    %c0_i32_1 = arith.constant 0 : i32
    return %arg0, %c0_i32, %c0_i32_0 : i32, i32, i32
  }
  func.func @transform_1(%arg0: i32) -> (i32, i32, i32) {
    %c0_i32 = arith.constant 0 : i32
    %c0_i32_0 = arith.constant 0 : i32
    %c0_i32_1 = arith.constant 0 : i32
    return %arg0, %c0_i32, %c0_i32_0 : i32, i32, i32
  }
  func.func @transform_2(%arg0: i32) -> (i32, i32) {
    %c0_i32 = arith.constant 0 : i32
    %c0_i32_0 = arith.constant 0 : i32
    %c0_i32_1 = arith.constant 0 : i32
    return %c0_i32, %c0_i32_0 : i32, i32
  }
  func.func @transform_3(%arg0: i32) -> (i32, i32) {
    %c0_i32 = arith.constant 0 : i32
    %c0_i32_0 = arith.constant 0 : i32
    %c0_i32_1 = arith.constant 0 : i32
    return %c0_i32, %c0_i32_0 : i32, i32
  }
  func.func @transform_4(%arg0: i32) -> (i32, i32) {
    %c0_i32 = arith.constant 0 : i32
    %c0_i32_0 = arith.constant 0 : i32
    %c0_i32_1 = arith.constant 0 : i32
    return %c0_i32, %c0_i32_0 : i32, i32
  }
  func.func @transform_5(%arg0: i32) -> (i32, i32) {
    %c0_i32 = arith.constant 0 : i32
    %c0_i32_0 = arith.constant 0 : i32
    %c0_i32_1 = arith.constant 0 : i32
    return %c0_i32, %c0_i32_0 : i32, i32
  }
  func.func @transform_6(%arg0: i32) -> (i32, i32) {
    %c0_i32 = arith.constant 0 : i32
    %c0_i32_0 = arith.constant 0 : i32
    %c0_i32_1 = arith.constant 0 : i32
    return %c0_i32, %c0_i32_0 : i32, i32
  }
  func.func @transform_7(%arg0: i32) -> (i32, i32) {
    %c0_i32 = arith.constant 0 : i32
    %c0_i32_0 = arith.constant 0 : i32
    %c0_i32_1 = arith.constant 0 : i32
    return %c0_i32, %c0_i32_0 : i32, i32
  }
  func.func @transform_8(%arg0: i32) -> (i32, i32) {
    %c0_i32 = arith.constant 0 : i32
    %c0_i32_0 = arith.constant 0 : i32
    %c0_i32_1 = arith.constant 0 : i32
    return %c0_i32, %c0_i32_0 : i32, i32
  }
  func.func @transform_9(%arg0: i32) -> (i32, i32) {
    %c0_i32 = arith.constant 0 : i32
    %c0_i32_0 = arith.constant 0 : i32
    %c0_i32_1 = arith.constant 0 : i32
    return %c0_i32, %c0_i32_0 : i32, i32
  }
  func.func @transform_10(%arg0: i32) -> (i32, i32) {
    %c0_i32 = arith.constant 0 : i32
    %c0_i32_0 = arith.constant 0 : i32
    %c0_i32_1 = arith.constant 0 : i32
    return %c0_i32, %c0_i32_0 : i32, i32
  }
  func.func @transform_11(%arg0: i32) -> (i32, i32) {
    %c0_i32 = arith.constant 0 : i32
    %c0_i32_0 = arith.constant 0 : i32
    %c0_i32_1 = arith.constant 0 : i32
    return %c0_i32, %c0_i32_0 : i32, i32
  }
  func.func @transform_12(%arg0: i32) -> (i32, i32) {
    %c0_i32 = arith.constant 0 : i32
    %c0_i32_0 = arith.constant 0 : i32
    %c0_i32_1 = arith.constant 0 : i32
    return %c0_i32, %c0_i32_0 : i32, i32
  }
  func.func @transform_13(%arg0: i32) -> (i32, i32) {
    %c0_i32 = arith.constant 0 : i32
    %c0_i32_0 = arith.constant 0 : i32
    %c0_i32_1 = arith.constant 0 : i32
    return %c0_i32, %c0_i32_0 : i32, i32
  }
  func.func @transform_14(%arg0: i32) -> (i32, i32) {
    %c0_i32 = arith.constant 0 : i32
    %c0_i32_0 = arith.constant 0 : i32
    %c0_i32_1 = arith.constant 0 : i32
    return %c0_i32, %c0_i32_0 : i32, i32
  }
  func.func @transform_15(%arg0: i32) -> (i32, i32, i32) {
    %c0_i32 = arith.constant 0 : i32
    %c0_i32_0 = arith.constant 0 : i32
    %c0_i32_1 = arith.constant 0 : i32
    return %arg0, %c0_i32, %c0_i32_0 : i32, i32, i32
  }
}

</mosaic_0001>

<bundles_post_ra>
// kernel: transformer_decoder_forward.3
= control target key start
LH: loop header
LB: loop body
LE: loop exit
PB: predicated region body
PF: predicated region fallthrough
CT: control target
= control target key end

     0   :  { %s4552_s18 = smov 0   ;;  %s5327_s0 = inlined_call_operand.vmem [shape: f32[2,8,128], index: 0, kind: input, shape index: {}]   ;;  %s5328_s1 = inlined_call_operand.vmem [shape: f32[2,8,128], index: 1, kind: input, shape index: {}]   ;;  %s5329_s2 = inlined_call_operand.vmem [shape: bf16[128,384], index: 2, kind: input, shape index: {}]   ;;  %s5330_s3 = inlined_call_operand.vmem [shape: bf16[128,128], index: 3, kind: input, shape index: {}]   ;;  %s5331_s4 = inlined_call_operand.vmem [shape: bf16[128,128], index: 4, kind: input, shape index: {}]   ;;  %s5332_s5 = inlined_call_operand.vmem [shape: bf16[128,256], index: 5, kind: input, shape index: {}]   ;;  %s5333_s6 = inlined_call_operand.vmem [shape: bf16[128,128], index: 6, kind: input, shape index: {}]   ;;  %s5334_s7 = inlined_call_operand.vmem [shape: bf16[128,256], index: 7, kind: input, shape index: {}]   ;;  %s5335_s8 = inlined_call_operand.vmem [shape: bf16[256,128], index: 8, kind: input, shape index: {}]   ;;  %s5336_s9 = inlined_call_operand.vmem [shape: f32[1,384], index: 9, kind: input, shape index: {}]   ;;  %s5337_s10 = inlined_call_operand.vmem [shape: f32[1,256], index: 10, kind: input, shape index: {}]   ;;  %s5338_s11 = inlined_call_operand.vmem [shape: f32[1,256], index: 11, kind: input, shape index: {}]   ;;  %s5339_s12 = inlined_call_operand.vmem [shape: f32[4,128], index: 12, kind: input, shape index: {}]   ;;  %s5340_s13 = inlined_call_operand.vmem [shape: f32[6,128], index: 13, kind: input, shape index: {}]   ;;  %s5341_s14 = inlined_call_operand.vmem [shape: f32[2,128], index: 14, kind: input, shape index: {}]   ;;  %s5342_s15 = inlined_call_operand.vmem [shape: f32[2,8,128], index: 15, kind: output, shape index: {}]  }
   0x1 LB: > { %s3883_s19 = sadd.s32 4294967295, %s4462_s18   ;;  %p3887_p0 = scmp.ge.s32.totalorder %s4462_s18, 1  ;;  %s4462_s18 = sphi %s4552_s18, %s25_s18  }
   0x2   : > { %p445_p1 = scmp.lt.s32.totalorder %s4462_s18, 3 }
   0x4   : > { %p446_p2 = pnand %p3887_p0, %p445_p1 }
   0x5   : > { %v4293_v0 = vld [vmem:[%s5329_s2 + $0x4] ss:$12 sps:$4 sm:$0xff] (!%p446_p2)   ;;  %v4295_v1 = vld [vmem:[%s5329_s2] ss:$12 sps:$4 sm:$0xff] (!%p446_p2)   ;;  %v4464_v2 = vmov (!%p446_p2), 0   ;;  %p495_p3 = scmp.lt.s32.totalorder (!%p446_p2), %s3883_s19, 1  ;;  %v546_v23 = vlaneseq (!%p446_p2) }
   0x6   : > { %449 = sbr.rel (%p446_p2) target bundleno = 4766 (0x129e), region = 80  ;;  %721 = vmatprep.mubr.bf16.mxu0 (!%p446_p2), %v4464_v2  ;;  %689 = vmatprep.subr.bf16.mxu0 (!%p446_p2), %v4293_v0  ;;  %v4296_v3 = vld [vmem:[%s5329_s2 + $0x1c] ss:$12 sps:$4 sm:$0xff] (!%p446_p2)   ;;  %v4298_v4 = vld [vmem:[%s5329_s2 + $0x18] ss:$12 sps:$4 sm:$0xff] (!%p446_p2)   ;;  %v4465_v20 = vmov (!%p446_p2), 0.0  }
   0x7   : > { %690 = vmatpush1.bf16.msra.mxu0 (!%p446_p2), %v4295_v1  ;;  %v4299_v5 = vld [vmem:[%s5329_s2 + $0x34] ss:$12 sps:$4 sm:$0xff] (!%p446_p2)   ;;  %v4301_v6 = vld [vmem:[%s5329_s2 + $0x30] ss:$12 sps:$4 sm:$0xff] (!%p446_p2)   ;;  %v4302_v7 = vld [vmem:[%s5329_s2 + $0x4c] ss:$12 sps:$4 sm:$0xff] (!%p446_p2)   ;;  %4101 = vmatprep.subr.bf16.mxu1 (!%p446_p2), %v4465_v20 }
   0x8   : > { %691 = vmatprep.subr.bf16.mxu0 (!%p446_p2), %v4296_v3  ;;  %v4304_v8 = vld [vmem:[%s5329_s2 + $0x48] ss:$12 sps:$4 sm:$0xff] (!%p446_p2)   ;;  %v4305_v9 = vld [vmem:[%s5329_s2 + $0x64] ss:$12 sps:$4 sm:$0xff] (!%p446_p2)   ;;  %v4307_v10 = vld [vmem:[%s5329_s2 + $0x60] ss:$12 sps:$4 sm:$0xff] (!%p446_p2)  }
   0x9   : > { %v4308_v11 = vld [vmem:[%s5329_s2 + $0x7c] ss:$12 sps:$4 sm:$0xff] (!%p446_p2)   ;;  %v4310_v12 = vld [vmem:[%s5329_s2 + $0x78] ss:$12 sps:$4 sm:$0xff] (!%p446_p2)   ;;  %v4311_v13 = vld [vmem:[%s5329_s2 + $0x94] ss:$12 sps:$4 sm:$0xff] (!%p446_p2)  }
   0xa   : > { %v4313_v14 = vld [vmem:[%s5329_s2 + $0x90] ss:$12 sps:$4 sm:$0xff] (!%p446_p2)   ;;  %v4314_v15 = vld [vmem:[%s5329_s2 + $0xac] ss:$12 sps:$4 sm:$0xff] (!%p446_p2)   ;;  %v4316_v16 = vld [vmem:[%s5329_s2 + $0xa8] ss:$12 sps:$4 sm:$0xff] (!%p446_p2)  }
   0xb   : > { %692 = vmatpush1.bf16.msra.mxu0 (!%p446_p2), %v4298_v4  ;;  %v4317_v19 = vld [vmem:[%s5329_s2 + $0x8] ss:$12 sps:$4 sm:$0xff] (!%p446_p2)   ;;  %v4318_v21 = vld [vmem:[%s5329_s2 + $0x20] ss:$12 sps:$4 sm:$0xff] (!%p446_p2)   ;;  %v4319_v22 = vld [vmem:[%s5329_s2 + $0x38] ss:$12 sps:$4 sm:$0xff] (!%p446_p2)  }
   0xc   : > { %693 = vmatprep.subr.bf16.mxu0 (!%p446_p2), %v4299_v5  ;;  %4102 = vmatpush3.bf16.msra.mxu1 (!%p446_p2), %v4317_v19  ;;  %v4632_v24 = vshrl.u32 (!%p446_p2), %v546_v23, 7  ;;  %v4320_v25 = vld [vmem:[%s5329_s2 + $0x50] ss:$12 sps:$4 sm:$0xff] (!%p446_p2)   ;;  %v4643_v27 = vld [vmem:[%s5336_s9] sm:$0x7] (!%p446_p2)  ;;  %s5343_s30 = smov (!%p446_p2), 32  }
   0xd   : > { %s5347_s19 = smov (!%p495_p3, %s3883_s19), 1  ;;  %4103 = vmatprep.subr.bf16.mxu1 %v4465_v20  ;;  %v4321_v30 = vld [vmem:[%s5329_s2 + $0x68] ss:$12 sps:$4 sm:$0xff]   ;;  %v4322_v39 = vld [vmem:[%s5329_s2 + $0x80] ss:$12 sps:$4 sm:$0xff]   ;;  %s4468_s20 = smov 64  }
   0xe   : > { %s4585_s23 = sshll.u32 %s5347_s19, 3  ;;  %v4638_v26 = vsub.s32 1, %v4632_v24  ;;  %v4646_v28 = vsub.s32 0, %v4632_v24  ;;  %s4467_s19 = smov 96   ;;  %v4323_v41 = vld [vmem:[%s5329_s2 + $0x98] ss:$12 sps:$4 sm:$0xff]  }
   0xf   : > { %694 = vmatpush1.bf16.msra.mxu0 %v4301_v6  ;;  %s4612_s27 = scalar_lea.vmem %s5327_s0, %s4585_s23  ;;  %v4324_v42 = vld [vmem:[%s5329_s2 + $0xb0] ss:$12 sps:$4 sm:$0xff]   ;;  %vm4469_vm0 = vmmov 0   ;;  %v4470_v43 = vmov 1983009808   ;;  %vm1277_vm1 = vcmask 261120   ;;  %s502_s22 = scalar_lea.vmem %s5328_s1, %s4585_s23 }
  0x10   : > { %695 = vmatprep.subr.bf16.mxu0 %v4302_v7  ;;  %v508_v17 = vld [vmem:[%s4612_s27] sm:$0xff]  ;;  %4104 = vmatpush3.bf16.msra.mxu1 %v4318_v21  ;;  %v553_v29 = vrot.slane %v4643_v27, %v4638_v26  ;;  %v549_v31 = vrot.slane %v4643_v27, %v4646_v28  ;;  %v779_v44 = vunpack.c.l.s4 %v4470_v43  ;;  %v4471_v45 = vmov 1934713408   ;;  %s5345_s26 = smov 32   ;;  %s506_s24 = scalar_lea.vmem %s5342_s15, %s4585_s23 }
  0x11   : > { %v511_v18 = vpack.c.bf16 %v508_v17, %v508_v17  ;;  %4105 = vmatprep.subr.bf16.mxu1 %v4465_v20  ;;  %4117 = vmatprep.mubr.msk.bf16.mxu1 %vm4469_vm0, %v4465_v20  ;;  %v796_v46 = vunpack.c.l.s4 %v4471_v45  ;;  %vm1462_vm2 = vcmask 64512   ;;  %vm1514_vm3 = vcmask 1043456  }
  0x12   : > { %v780_v47 = vunpack.c.0.s8 %v779_v44  ;;  %vm1845_vm4 = vcmask 523264   ;;  %vm1847_vm5 = vcmask 785408  }
  0x13   : > { %696 = vmatpush1.bf16.msra.mxu0 %v4304_v8  ;;  %v797_v48 = vunpack.c.0.s8 %v796_v46 }
  0x14   : > { %697 = vmatprep.subr.bf16.mxu0 %v4305_v9  ;;  %4106 = vmatpush3.bf16.msra.mxu1 %v4319_v22  ;;  %v4682_v49 = vsub.s32 %v780_v47, %v4632_v24 }
  0x15   : > { %4107 = vmatprep.subr.bf16.mxu1 %v4465_v20  ;;  %v4685_v52 = vsub.s32 %v797_v48, %v4632_v24 }
  0x17   : > { %698 = vmatpush1.bf16.msra.mxu0 %v4307_v10 }
  0x18   : > { %699 = vmatprep.subr.bf16.mxu0 %v4308_v11  ;;  %4108 = vmatpush3.bf16.msra.mxu1 %v4320_v25 }
  0x19   : > { %4109 = vmatprep.subr.bf16.mxu1 %v4465_v20 }
  0x1b   : > { %700 = vmatpush1.bf16.msra.mxu0 %v4310_v12 }
  0x1c   : > { %701 = vmatprep.subr.bf16.mxu0 %v4311_v13  ;;  %4110 = vmatpush3.bf16.msra.mxu1 %v4321_v30 }
  0x1d   : > { %4111 = vmatprep.subr.bf16.mxu1 %v4465_v20 }
  0x1f   : > { %702 = vmatpush1.bf16.msra.mxu0 %v4313_v14 }
  0x20   : > { %703 = vmatprep.subr.bf16.mxu0 %v4314_v15  ;;  %4112 = vmatpush3.bf16.msra.mxu1 %v4322_v39 }
  0x21   : > { %4113 = vmatprep.subr.bf16.mxu1 %v4465_v20 }
  0x23   : > { %704 = vmatpush1.bf16.msra.mxu0 %v4316_v16 }
  0x24   : > { %4145 = vmatprep.subr.bf16.mxu0 %v4465_v20  ;;  %4114 = vmatpush3.bf16.msra.mxu1 %v4323_v41 }
  0x25   : > { %4115 = vmatprep.subr.bf16.mxu1 %v4465_v20 }
  0x26   : > { %722 = vmatmul.mubr.bf16.vlgmr.msra.gmra.mrb[0].mxu0 %v511_v18 }
  0x27   : > { %4147 = vmatprep.mubr.msk.bf16.mxu0 %vm4469_vm0, %v4465_v20 }
  0x28   : > { %4116 = vmatpush3.bf16.msra.mxu1 %v4324_v42 }
  0x29   : > { %4121 = vmatprep.subr.bf16.mxu1 %v4465_v20 }
  0x2b   : > { %4118 = vmatmul.mubr.bf16.vlgmr.msra.gmra.mrb[0].mxu1 %v511_v18 }
  0x2c   : > { %4123 = vmatprep.mubr.msk.bf16.mxu1 %vm4469_vm0, %v4465_v20 }
  0xf9   : > { %v723_v32 = vpop.f32.mrb[0].mxu0 }
  0xfa   : > { %v725_v33 = vpop.f32.mrb[1].mxu0  ;;  %v724_v37 = vadd.f32 %v723_v32, %v549_v31 }
  0xfb   : > { %v726_v34 = vadd.f32 %v725_v33, %v553_v29  ;;  %v727_v35 = vpop.f32.mrb[2].mxu0 }
  0xfc   : > { %v728_v36 = vpop.f32.mrb[3].mxu0  ;;  %v770_v40 = vpack.c.bf16 %v724_v37, %v724_v37 }
  0xfd   : > { %v939_v38 = vpack.c.bf16 %v726_v34, %v726_v34 }
  0xfe   : > { %v784_v6 = vrot.slane %v770_v40, %v4682_v49 }
  0xff   : > { %945 = vrot.lane.b32.xlu1 %v939_v38, %s5343_s30  ;;  %941 = vrot.lane.b32.xlu0 %v939_v38, %s4467_s19  ;;  %v953_v62 = vrot.slane %v939_v38, %v4682_v49 }
 0x103   : > { %943 = vrot.lane.b32.xlu0 %v939_v38, %s4468_s20  ;;  %772 = vrot.lane.b32.xlu1 %v770_v40, %s4467_s19 }
 0x107   : > { %774 = vrot.lane.b32.xlu0 %v770_v40, %s4468_s20  ;;  %776 = vrot.lane.b32.xlu1 %v770_v40, %s5343_s30 }
 0x171   : > { %v946_v50 = vpop.permute.xlu1 %945  ;;  %v942_v51 = vpop.permute.xlu0 %941 }
 0x172   : > { %v995_v53 = vrot.slane %v946_v50, %v4682_v49  ;;  %v987_v54 = vrot.slane %v942_v51, %v4682_v49 }
 0x174   : > { %v996_v55 = vcombine.low %v987_v54, %v995_v53  ;;  %v997_v56 = vcombine.high %v987_v54, %v995_v53 }
 0x175   : > { %v944_v57 = vpop.permute.xlu0 %943  ;;  %v773_v58 = vpop.permute.xlu1 %772 }
 0x176   : > { %v1004_v59 = vrot.slane %v996_v55, %v4685_v52  ;;  %v1011_v60 = vrot.slane %v997_v56, %v4685_v52  ;;  %v961_v61 = vrot.slane %v944_v57, %v4682_v49  ;;  %v818_v4 = vrot.slane %v773_v58, %v4682_v49 }
 0x178   : > { %v1012_v63 = vcombine.high %v1004_v59, %v4464_v2  ;;  %v1013_v0 = vcombine.high %v1011_v60, %v4464_v2  ;;  %v962_v1 = vcombine.low %v953_v62, %v961_v61  ;;  %v963_v3 = vcombine.high %v953_v62, %v961_v61 }
 0x179   : > { %v775_v5 = vpop.permute.xlu0 %774  ;;  %v777_v7 = vpop.permute.xlu1 %776  ;;  %v1019_v8 = vshrl.u32 %v1004_v59, 16  ;;  %v1035_v9 = vshrl.u32 %v1011_v60, 16 }
 0x17a   : > { %v792_v10 = vrot.slane %v775_v5, %v4682_v49  ;;  %v826_v11 = vrot.slane %v777_v7, %v4682_v49  ;;  %v1027_v12 = vshrl.u32 %v1012_v63, 16  ;;  %v1043_v13 = vshrl.u32 %v1013_v0, 16 }
 0x17b   : > { %v970_v14 = vrot.slane %v962_v1, %v4685_v52  ;;  %v977_v15 = vrot.slane %v963_v3, %v4685_v52 }
 0x17c   : > { %v793_v16 = vcombine.low %v784_v6, %v792_v10  ;;  %v794_v17 = vcombine.high %v784_v6, %v792_v10  ;;  %v827_v18 = vcombine.low %v818_v4, %v826_v11  ;;  %v828_v19 = vcombine.high %v818_v4, %v826_v11 }
 0x17d   : > { %v978_v21 = vcombine.high %v970_v14, %v4464_v2  ;;  %v979_v22 = vcombine.high %v977_v15, %v4464_v2  ;;  %v1016_v23 = vpack.i.b16 %v1004_v59, %v970_v14  ;;  %v1018_v25 = vshrl.u32 %v970_v14, 16 }
 0x17e   : > { %v1032_v29 = vpack.i.b16 %v1011_v60, %v977_v15  ;;  %v1034_v30 = vshrl.u32 %v977_v15, 16  ;;  %v801_v31 = vrot.slane %v793_v16, %v4685_v52  ;;  %v808_v32 = vrot.slane %v794_v17, %v4685_v52 }
 0x17f   : > { %v1020_v33 = vpack.i.b16 %v1019_v8, %v1018_v25  ;;  %v1024_v34 = vpack.i.b16 %v1012_v63, %v978_v21  ;;  %v1026_v35 = vshrl.u32 %v978_v21, 16  ;;  %v1040_v36 = vpack.i.b16 %v1013_v0, %v979_v22 }
 0x180   : > { %v1036_v37 = vpack.i.b16 %v1035_v9, %v1034_v30  ;;  %v1042_v38 = vshrl.u32 %v979_v22, 16  ;;  %v1046_v39 = vcombine.low %v1016_v23, %v1032_v29  ;;  %v809_v40 = vcombine.high %v801_v31, %v4464_v2 }
 0x181   : > { %v1028_v41 = vpack.i.b16 %v1027_v12, %v1026_v35  ;;  %v1054_v42 = vcombine.low %v1024_v34, %v1040_v36  ;;  %v810_v43 = vcombine.high %v808_v32, %v4464_v2  ;;  %v849_v47 = vshrl.u32 %v801_v31, 16 }
 0x182   : > { %v1044_v44 = vpack.i.b16 %v1043_v13, %v1042_v38  ;;  %v1053_v45 = vrot.slane %v1046_v39, %v4682_v49  ;;  %v1071_v46 = vcombine.low %v1020_v33, %v1036_v37  ;;  %v857_v48 = vshrl.u32 %v809_v40, 16 }
 0x183   : > { %v865_v50 = vshrl.u32 %v808_v32, 16  ;;  %v835_v51 = vrot.slane %v827_v18, %v4685_v52  ;;  %v842_v53 = vrot.slane %v828_v19, %v4685_v52  ;;  %v873_v55 = vshrl.u32 %v810_v43, 16 }
 0x184   : > { %v1079_v54 = vcombine.low %v1028_v41, %v1044_v44  ;;  %v1061_v56 = vrot.slane %v1054_v42, %v4682_v49  ;;  %v1078_v57 = vrot.slane %v1071_v46, %v4682_v49 }
 0x185   : > { %v843_v58 = vcombine.high %v835_v51, %v4464_v2  ;;  %v844_v59 = vcombine.high %v842_v53, %v4464_v2  ;;  %v847_v60 = vpack.i.b16 %v835_v51, %v801_v31  ;;  %v850_v61 = vshrl.u32 %v835_v51, 16 }
 0x186   : > { %v863_v62 = vpack.i.b16 %v842_v53, %v808_v32  ;;  %v866_v63 = vshrl.u32 %v842_v53, 16  ;;  %v1062_v0 = vcombine.low %v1053_v45, %v1061_v56  ;;  %v1086_v1 = vrot.slane %v1079_v54, %v4682_v49 }
 0x187   : > { %v851_v3 = vpack.i.b16 %v850_v61, %v849_v47  ;;  %v855_v4 = vpack.i.b16 %v843_v58, %v809_v40  ;;  %v858_v5 = vshrl.u32 %v843_v58, 16  ;;  %v871_v6 = vpack.i.b16 %v844_v59, %v810_v43 }
 0x188   : > { %v867_v7 = vpack.i.b16 %v866_v63, %v865_v50  ;;  %v874_v8 = vshrl.u32 %v844_v59, 16  ;;  %v877_v10 = vcombine.low %v847_v60, %v863_v62  ;;  %v1087_v12 = vcombine.low %v1078_v57, %v1086_v1  ;;  %v764_v57 = vpop.f32.mrb[0].mxu1 }
 0x189   : > { %v859_v9 = vpack.i.b16 %v858_v5, %v857_v48  ;;  %v885_v11 = vcombine.low %v855_v4, %v871_v6  ;;  %v1069_v16 = vrot.slane %v1062_v0, %v4685_v52  ;;  %v4119_v58 = vpop.f32.mrb[1].mxu1 }
 0x18a   : > { %v875_v13 = vpack.i.b16 %v874_v8, %v873_v55  ;;  %v902_v14 = vcombine.low %v851_v3, %v867_v7  ;;  %v1094_v17 = vrot.slane %v1087_v12, %v4685_v52  ;;  %v884_v19 = vrot.slane %v877_v10, %v4682_v49  ;;  %v767_v59 = vpop.f32.mrb[2].mxu1 }
 0x18b   : > { %v892_v15 = vrot.slane %v885_v11, %v4682_v49  ;;  %v1099_v32 = vshrl.u32 %v1069_v16, 16  ;;  %v1070_v40 = vcombine.high %v1069_v16, %v4464_v2  ;;  %v4120_v60 = vpop.f32.mrb[3].mxu1  ;;  %v4750_v8 = vsub.s32 2, %v4632_v24 }
 0x18c   : > { %v910_v18 = vcombine.low %v859_v9, %v875_v13  ;;  %v1098_v21 = vpack.i.b16 %v1094_v17, %v1069_v16  ;;  %v909_v22 = vrot.slane %v902_v14, %v4682_v49  ;;  %v1100_v30 = vshrl.u32 %v1094_v17, 16 }
 0x18d   : > { %v893_v25 = vcombine.low %v884_v19, %v892_v15  ;;  %v1095_v38 = vcombine.high %v1094_v17, %v4464_v2  ;;  %v1105_v47 = vshrl.u32 %v1070_v40, 16  ;;  %v557_v10 = vrot.slane %v4643_v27, %v4750_v8 }
 0x18e   : > { %v917_v23 = vrot.slane %v910_v18, %v4682_v49  ;;  %v1282_v29 = vsel %vm1277_vm1, %v1098_v21, 0  ;;  %v1101_v35 = vpack.i.b16 %v1100_v30, %v1099_v32 }
 0x18f   : > { %4122 = vmatpush3.bf16.xpose.msra.mxu1 %v1282_v29  ;;  %v900_v34 = vrot.slane %v893_v25, %v4685_v52  ;;  %v1104_v42 = vpack.i.b16 %v1095_v38, %v1070_v40  ;;  %v1106_v45 = vshrl.u32 %v1095_v38, 16  ;;  %v765_v15 = vadd.f32 %v764_v57, %v557_v10 }
 0x190   : > { %v918_v31 = vcombine.low %v909_v22, %v917_v23  ;;  %4127 = vmatprep.subr.bf16.mxu1 %v4465_v20  ;;  %v1328_v37 = vsel %vm1277_vm1, %v1101_v35, 0 }
 0x191   : > { %v930_v41 = vshrl.u32 %v900_v34, 16  ;;  %v1374_v44 = vsel %vm1277_vm1, %v1104_v42, 0  ;;  %v901_v48 = vcombine.high %v900_v34, %v4464_v2  ;;  %v1107_v50 = vpack.i.b16 %v1106_v45, %v1105_v47 }
 0x192   : > { %v925_v33 = vrot.slane %v918_v31, %v4685_v52  ;;  %v1108_v17 = vpack.c.bf16 %v765_v15, %v765_v15 }
 0x193   : > { %v1420_v53 = vsel %vm1277_vm1, %v1107_v50, 0  ;;  %v936_v55 = vshrl.u32 %v901_v48, 16 }
 0x194   : > { %v929_v36 = vpack.i.b16 %v925_v33, %v900_v34  ;;  %v931_v39 = vshrl.u32 %v925_v33, 16  ;;  %v926_v46 = vcombine.high %v925_v33, %v4464_v2  ;;  %v1122_v58 = vrot.slane %v1108_v17, %v4682_v49 }
 0x196   : > { %4124 = vmatmul.mubr.msk.bf16.vlgmr.msra.gmra.mrb[4].mxu1 %vm1277_vm1, %v929_v36  ;;  %v932_v43 = vpack.i.b16 %v931_v39, %v930_v41  ;;  %v935_v51 = vpack.i.b16 %v926_v46, %v901_v48  ;;  %v937_v54 = vshrl.u32 %v926_v46, 16 }
 0x197   : > { %4128 = vmatpush3.bf16.xpose.msra.mxu1 %v1328_v37  ;;  %4129 = vmatprep.mubr.msk.bf16.mxu1 %vm4469_vm0, %v4465_v20 }
 0x198   : > { %4133 = vmatprep.subr.bf16.mxu1 %v4465_v20  ;;  %v938_v56 = vpack.i.b16 %v937_v54, %v936_v55 }
 0x19e   : > { %4130 = vmatmul.mubr.msk.bf16.vlgmr.msra.gmra.mrb[8].mxu1 %vm1277_vm1, %v932_v43 }
 0x19f   : > { %4134 = vmatpush3.bf16.xpose.msra.mxu1 %v1374_v44  ;;  %4135 = vmatprep.mubr.msk.bf16.mxu1 %vm4469_vm0, %v4465_v20 }
 0x1a0   : > { %4139 = vmatprep.subr.bf16.mxu1 %v4465_v20 }
 0x1a6   : > { %4136 = vmatmul.mubr.msk.bf16.vlgmr.msra.gmra.mrb[12].mxu1 %vm1277_vm1, %v935_v51 }
 0x1a7   : > { %4140 = vmatpush3.bf16.xpose.msra.mxu1 %v1420_v53  ;;  %4141 = vmatprep.mubr.msk.bf16.mxu1 %vm4469_vm0, %v4465_v20 }
 0x1a8   : > { %4151 = vmatprep.subr.bf16.mxu1 %v4465_v20 }
 0x1ae   : > { %4142 = vmatmul.mubr.msk.bf16.vlgmr.msra.gmra.mrb[16].mxu1 %vm1277_vm1, %v938_v56 }
 0x1af   : > { %4153 = vmatprep.mubr.msk.bf16.mxu1 %vm4469_vm0, %v4465_v20 }
 0x269   : > { %v1318_v61 = vpop.f32.mrb[4].mxu1 }
 0x26a   : > { %v4125_v62 = vpop.f32.mrb[5].mxu1  ;;  %v1463_v63 = vsel %vm1462_vm2, %v1318_v61, -inf }
 0x26b   : > { %1464 = vmax.xlane.f32.xlu0 %v1463_v63  ;;  %v1321_v0 = vpop.f32.mrb[6].mxu1 }
 0x26c   : > { %v4126_v1 = vpop.f32.mrb[7].mxu1 }
 0x271   : > { %v1364_v3 = vpop.f32.mrb[8].mxu1 }
 0x272   : > { %v4131_v4 = vpop.f32.mrb[9].mxu1  ;;  %v1466_v5 = vsel %vm1462_vm2, %v1364_v3, -inf }
 0x273   : > { %1467 = vmax.xlane.f32.xlu1 %v1466_v5  ;;  %v1367_v6 = vpop.f32.mrb[10].mxu1 }
 0x274   : > { %v4132_v7 = vpop.f32.mrb[11].mxu1 }
 0x279   : > { %v1410_v9 = vpop.f32.mrb[12].mxu1 }
 0x27a   : > { %v4137_v11 = vpop.f32.mrb[13].mxu1  ;;  %v1469_v12 = vsel %vm1462_vm2, %v1410_v9, -inf }
 0x27b   : > { %1470 = vmax.xlane.f32.xlu0 %v1469_v12  ;;  %v1413_v13 = vpop.f32.mrb[14].mxu1 }
 0x27c   : > { %v4138_v14 = vpop.f32.mrb[15].mxu1 }
 0x281   : > { %v1456_v16 = vpop.f32.mrb[16].mxu1 }
 0x282   : > { %v4143_v18 = vpop.f32.mrb[17].mxu1  ;;  %v1472_v19 = vsel %vm1462_vm2, %v1456_v16, -inf }
 0x283   : > { %1473 = vmax.xlane.f32.xlu0 %v1472_v19  ;;  %v1459_v21 = vpop.f32.mrb[18].mxu1 }
 0x284   : > { %1110 = vrot.lane.b32.xlu1 %v1108_v17, %s4467_s19  ;;  %v4144_v22 = vpop.f32.mrb[19].mxu1 }
 0x2f8   : > { %v1465_v23 = vpop.xlane.xlu0 %1464 }
 0x2f9   : > { %v1475_v25 = vsub.f32 %v1318_v61, %v1465_v23 }
 0x2fb   : > { %v1479_v27 = vmul.f32 1.442695, %v1475_v25 }
 0x2fd   : > { %4413 = vpow2.f32 %v1479_v27 }
 0x300   : > { %v1468_v29 = vpop.xlane.xlu1 %1467 }
 0x301   : > { %v1476_v30 = vsub.f32 %v1364_v3, %v1468_v29 }
 0x303   : > { %v1481_v31 = vmul.f32 1.442695, %v1476_v30 }
 0x304   : > { %v1111_v46 = vpop.permute.xlu1 %1110 }
 0x305   : > { %4415 = vpow2.f32 %v1481_v31  ;;  %v1156_v51 = vrot.slane %v1111_v46, %v4682_v49 }
 0x307   : > { %v4757_v32 = vpop.eup %4413 }
 0x308   : > { %v1487_v33 = vsel %vm1462_vm2, %v4757_v32, 0.0  ;;  %v1471_v36 = vpop.xlane.xlu0 %1470 }
 0x309   : > { %1488 = vadd.xlane.f32.xlu1 %v1487_v33  ;;  %v1477_v37 = vsub.f32 %v1410_v9, %v1471_v36 }
 0x30b   : > { %v1483_v38 = vmul.f32 1.442695, %v1477_v37 }
 0x30d   : > { %4417 = vpow2.f32 %v1483_v38 }
 0x30f   : > { %v4761_v34 = vpop.eup %4415 }
 0x310   : > { %v1490_v35 = vsel %vm1462_vm2, %v4761_v34, 0.0  ;;  %v1474_v39 = vpop.xlane.xlu0 %1473 }
 0x311   : > { %1491 = vadd.xlane.f32.xlu0 %v1490_v35  ;;  %v1478_v40 = vsub.f32 %v1456_v16, %v1474_v39 }
 0x313   : > { %v1485_v41 = vmul.f32 1.442695, %v1478_v40 }
 0x315   : > { %4419 = vpow2.f32 %v1485_v41 }
 0x317   : > { %v4767_v42 = vpop.eup %4417 }
 0x318   : > { %v1493_v43 = vsel %vm1462_vm2, %v4767_v42, 0.0 }
 0x31a   : > { %1114 = vrot.lane.b32.xlu1 %v1108_v17, %s5343_s30 }
 0x31f   : > { %v4771_v44 = vpop.eup %4419 }
 0x320   : > { %v1496_v45 = vsel %vm1462_vm2, %v4771_v44, 0.0 }
 0x327   : > { %1112 = vrot.lane.b32.xlu0 %v1108_v17, %s4468_s20 }
 0x33e   : > { %1494 = vadd.xlane.f32.xlu1 %v1493_v43 }
 0x346   : > { %1497 = vadd.xlane.f32.xlu0 %v1496_v45 }
 0x396   : > { %v1489_v47 = vpop.xlane.xlu1 %1488 }
 0x397   : > { %4421 = vrcp.f32 %v1489_v47 }
 0x39a   : > { %v1115_v48 = vpop.permute.xlu1 %1114 }
 0x39b   : > { %v1164_v50 = vrot.slane %v1115_v48, %v4682_v49 }
 0x39d   : > { %v1165_v53 = vcombine.low %v1156_v51, %v1164_v50  ;;  %v1166_v55 = vcombine.high %v1156_v51, %v1164_v50 }
 0x39e   : > { %v1492_v54 = vpop.xlane.xlu0 %1491 }
 0x39f   : > { %v1173_v56 = vrot.slane %v1165_v53, %v4685_v52  ;;  %v1180_v60 = vrot.slane %v1166_v55, %v4685_v52  ;;  %4423 = vrcp.f32 %v1492_v54 }
 0x3a1   : > { %v1181_v63 = vcombine.high %v1173_v56, %v4464_v2  ;;  %v1182_v3 = vcombine.high %v1180_v60, %v4464_v2  ;;  %v1188_v4 = vshrl.u32 %v1173_v56, 16  ;;  %v1204_v11 = vshrl.u32 %v1180_v60, 16  ;;  %v4422_v35 = vpop.eup %4421 }
 0x3a2   : > { %v1113_v57 = vpop.permute.xlu0 %1112  ;;  %v1503_v46 = vmul.f32 %v4422_v35, %v4757_v32 }
 0x3a3   : > { %v1130_v59 = vrot.slane %v1113_v57, %v4682_v49  ;;  %v1196_v10 = vshrl.u32 %v1181_v63, 16  ;;  %v1212_v18 = vshrl.u32 %v1182_v3, 16 }
 0x3a5   : > { %v1131_v61 = vcombine.low %v1122_v58, %v1130_v59  ;;  %v1132_v62 = vcombine.high %v1122_v58, %v1130_v59 }
 0x3a7   : > { %v1139_v0 = vrot.slane %v1131_v61, %v4685_v52  ;;  %v1146_v1 = vrot.slane %v1132_v62, %v4685_v52 }
 0x3a9   : > { %v1147_v5 = vcombine.high %v1139_v0, %v4464_v2  ;;  %v1148_v6 = vcombine.high %v1146_v1, %v4464_v2  ;;  %v1185_v7 = vpack.i.b16 %v1173_v56, %v1139_v0  ;;  %v1187_v9 = vshrl.u32 %v1139_v0, 16  ;;  %v4424_v37 = vpop.eup %4423 }
 0x3aa   : > { %v1201_v12 = vpack.i.b16 %v1180_v60, %v1146_v1  ;;  %v1203_v13 = vshrl.u32 %v1146_v1, 16  ;;  %v1504_v53 = vmul.f32 %v4424_v37, %v4761_v34  ;;  %v1507_v60 = vpack.c.bf16 %v1503_v46, %v1503_v46 }
 0x3ab   : > { %v1189_v14 = vpack.i.b16 %v1188_v4, %v1187_v9  ;;  %v1193_v15 = vpack.i.b16 %v1181_v63, %v1147_v5  ;;  %v1195_v16 = vshrl.u32 %v1147_v5, 16  ;;  %v1209_v17 = vpack.i.b16 %v1182_v3, %v1148_v6  ;;  %v4325_v9 = vld [vmem:[%s5330_s3] sm:$0xff]  }
 0x3ac   : > { %v1205_v19 = vpack.i.b16 %v1204_v11, %v1203_v13  ;;  %v1211_v21 = vshrl.u32 %v1148_v6, 16  ;;  %v1215_v22 = vcombine.low %v1185_v7, %v1201_v12  ;;  %v1508_v62 = vpack.c.bf16 %v1504_v53, %v1504_v53  ;;  %v4329_v11 = vld [vmem:[%s5330_s3 + $0x20] sm:$0xff]   ;;  %v4330_v12 = vld [vmem:[%s5330_s3 + $0x28] sm:$0xff]  }
 0x3ad   : > { %v1197_v23 = vpack.i.b16 %v1196_v10, %v1195_v16  ;;  %v1223_v25 = vcombine.low %v1193_v15, %v1209_v17  ;;  %v4328_v10 = vld [vmem:[%s5330_s3 + $0x18] sm:$0xff]  }
 0x3ae   : > { %v1213_v27 = vpack.i.b16 %v1212_v18, %v1211_v21  ;;  %v1240_v29 = vcombine.low %v1189_v14, %v1205_v19  ;;  %v1222_v30 = vrot.slane %v1215_v22, %v4682_v49 }
 0x3af   : > { %v1230_v31 = vrot.slane %v1223_v25, %v4682_v49 }
 0x3b0   : > { %v1248_v33 = vcombine.low %v1197_v23, %v1213_v27  ;;  %v1247_v38 = vrot.slane %v1240_v29, %v4682_v49 }
 0x3b1   : > { %v1231_v36 = vcombine.low %v1222_v30, %v1230_v31 }
 0x3b2   : > { %v1255_v39 = vrot.slane %v1248_v33, %v4682_v49 }
 0x3b3   : > { %v1238_v40 = vrot.slane %v1231_v36, %v4685_v52 }
 0x3b4   : > { %v1256_v41 = vcombine.low %v1247_v38, %v1255_v39 }
 0x3b5   : > { %v1239_v43 = vcombine.high %v1238_v40, %v4464_v2  ;;  %v1268_v48 = vshrl.u32 %v1238_v40, 16 }
 0x3b6   : > { %v1263_v45 = vrot.slane %v1256_v41, %v4685_v52 }
 0x3b7   : > { %v1274_v54 = vshrl.u32 %v1239_v43, 16 }
 0x3b8   : > { %v1267_v47 = vpack.i.b16 %v1263_v45, %v1238_v40  ;;  %v1269_v50 = vshrl.u32 %v1263_v45, 16  ;;  %v1264_v51 = vcombine.high %v1263_v45, %v4464_v2 }
 0x3ba   : > { %v1516_v55 = vsel %vm1514_vm3, %v1267_v47, 0  ;;  %v1270_v56 = vpack.i.b16 %v1269_v50, %v1268_v48  ;;  %v1273_v57 = vpack.i.b16 %v1264_v51, %v1239_v43  ;;  %v1275_v58 = vshrl.u32 %v1264_v51, 16  ;;  %v4331_v50 = vld [vmem:[%s5330_s3 + $0x30] sm:$0xff]  }
 0x3bb   : > { %4146 = vmatpush3.bf16.msra.mxu0 %v1516_v55 }
 0x3bc   : > { %v1562_v59 = vsel %vm1514_vm3, %v1270_v56, 0  ;;  %4157 = vmatprep.subr.bf16.mxu0 %v4465_v20  ;;  %v1276_v32 = vpack.i.b16 %v1275_v58, %v1274_v54  ;;  %v1608_v61 = vsel %vm1514_vm3, %v1273_v57, 0 }
 0x3bd   : > { %4152 = vmatpush3.bf16.msra.mxu1 %v1562_v59 }
 0x3be   : > { %4148 = vmatmul.mubr.msk.bf16.vlgmr.msra.gmra.mrb[4].mxu0 %vm1462_vm2, %v1507_v60  ;;  %4163 = vmatprep.subr.bf16.mxu1 %v4465_v20  ;;  %v1654_v34 = vsel %vm1514_vm3, %v1276_v32, 0 }
 0x3bf   : > { %4158 = vmatpush3.bf16.msra.mxu0 %v1608_v61  ;;  %4159 = vmatprep.mubr.msk.bf16.mxu0 %vm4469_vm0, %v4465_v20 }
 0x3c0   : > { %4154 = vmatmul.mubr.msk.bf16.vlgmr.msra.gmra.mrb[20].mxu1 %vm1462_vm2, %v1508_v62  ;;  %4169 = vmatprep.subr.bf16.mxu0 %v4465_v20 }
 0x3c1   : > { %4164 = vmatpush3.bf16.msra.mxu1 %v1654_v34  ;;  %4165 = vmatprep.mubr.msk.bf16.mxu1 %vm4469_vm0, %v4465_v20  ;;  %v4332_v34 = vld [vmem:[%s5330_s3 + $0x38] sm:$0xff]  }
 0x3c2   : > { %4189 = vmatprep.subr.bf16.mxu1 %v4465_v20 }
 0x3cb   : > { %v1495_v63 = vpop.xlane.xlu1 %1494 }
 0x3cc   : > { %4425 = vrcp.f32 %v1495_v63 }
 0x3d3   : > { %v1498_v0 = vpop.xlane.xlu0 %1497 }
 0x3d4   : > { %4427 = vrcp.f32 %v1498_v0 }
 0x3d6   : > { %v4426_v1 = vpop.eup %4425 }
 0x3d7   : > { %v1505_v3 = vmul.f32 %v4426_v1, %v4767_v42  ;;  %v4326_v42 = vld [vmem:[%s5330_s3 + $0x8] sm:$0xff]  }
 0x3d9   : > { %v1509_v4 = vpack.c.bf16 %v1505_v3, %v1505_v3 }
 0x3db   : > { %4160 = vmatmul.mubr.msk.bf16.vlgmr.msra.gmra.mrb[8].mxu0 %vm1462_vm2, %v1509_v4 }
 0x3dc   : > { %4185 = vmatprep.mubr.msk.bf16.mxu0 %vm4469_vm0, %v4465_v20  ;;  %4170 = vmatpush3.bf16.msra.mxu0 %v4325_v9 }
 0x3dd   : > { %4171 = vmatprep.subr.bf16.mxu0 %v4465_v20 }
 0x3de   : > { %v4428_v5 = vpop.eup %4427 }
 0x3df   : > { %v1506_v6 = vmul.f32 %v4428_v5, %v4771_v44  ;;  %v4327_v44 = vld [vmem:[%s5330_s3 + $0x10] sm:$0xff]  }
 0x3e0   : > { %4172 = vmatpush3.bf16.msra.mxu0 %v4326_v42 }
 0x3e1   : > { %v1510_v7 = vpack.c.bf16 %v1506_v6, %v1506_v6  ;;  %4173 = vmatprep.subr.bf16.mxu0 %v4465_v20 }
 0x3e3   : > { %4166 = vmatmul.mubr.msk.bf16.vlgmr.msra.gmra.mrb[24].mxu1 %vm1462_vm2, %v1510_v7 }
 0x3e4   : > { %4205 = vmatprep.mubr.msk.bf16.mxu1 %vm4469_vm0, %v4465_v20  ;;  %4174 = vmatpush3.bf16.msra.mxu0 %v4327_v44 }
 0x3e5   : > { %4175 = vmatprep.subr.bf16.mxu0 %v4465_v20 }
 0x3e8   : > { %4176 = vmatpush3.bf16.msra.mxu0 %v4328_v10 }
 0x3e9   : > { %4177 = vmatprep.subr.bf16.mxu0 %v4465_v20 }
 0x3ec   : > { %4178 = vmatpush3.bf16.msra.mxu0 %v4329_v11 }
 0x3ed   : > { %4179 = vmatprep.subr.bf16.mxu0 %v4465_v20 }
 0x3f0   : > { %4180 = vmatpush3.bf16.msra.mxu0 %v4330_v12 }
 0x3f1   : > { %4181 = vmatprep.subr.bf16.mxu0 %v4465_v20 }
 0x3f4   : > { %4182 = vmatpush3.bf16.msra.mxu0 %v4331_v50  ;;  %v4353_v50 = vld [vmem:[%s5332_s5 + $0x64] ss:$8 sps:$4 sm:$0xff]  }
 0x3f5   : > { %4183 = vmatprep.subr.bf16.mxu0 %v4465_v20 }
 0x3f8   : > { %4184 = vmatpush3.bf16.msra.mxu0 %v4332_v34  ;;  %v4362_v34 = vld [vmem:[%s5331_s4 + $0x28] sm:$0xff]  }
 0x491   : > { %v1552_v13 = vpop.f32.mrb[4].mxu0 }
 0x492   : > { %v4149_v14 = vpop.f32.mrb[5].mxu0 }
 0x493   : > { %v1555_v15 = vpop.f32.mrb[6].mxu0  ;;  %v1598_v16 = vpop.f32.mrb[20].mxu1 }
 0x494   : > { %v4150_v17 = vpop.f32.mrb[7].mxu0  ;;  %v4155_v18 = vpop.f32.mrb[21].mxu1 }
 0x495   : > { %v1601_v19 = vpop.f32.mrb[22].mxu1  ;;  %v4876_v18 = vld [vmem:[%s5339_s12] sm:$0xf] }
 0x496   : > { %v4156_v21 = vpop.f32.mrb[23].mxu1  ;;  %v1869_v19 = vrot.slane %v4876_v18, %v4646_v28 }
 0x4ae   : > { %v1644_v22 = vpop.f32.mrb[8].mxu0 }
 0x4af   : > { %v1696_v23 = vcombine.low %v1552_v13, %v1644_v22  ;;  %v1697_v25 = vcombine.high %v1552_v13, %v1644_v22  ;;  %v4161_v27 = vpop.f32.mrb[9].mxu0 }
 0x4b0   : > { %v1647_v29 = vpop.f32.mrb[10].mxu0 }
 0x4b1   : > { %v4162_v30 = vpop.f32.mrb[11].mxu0  ;;  %v1704_v38 = vrot.slane %v1696_v23, %v4682_v49  ;;  %v1711_v39 = vrot.slane %v1697_v25, %v4682_v49  ;;  %v4453_v29 = vld [vmem:[%s4612_s27] sm:$0xff] }
 0x4b6   : > { %v1690_v31 = vpop.f32.mrb[24].mxu1 }
 0x4b7   : > { %v1712_v33 = vcombine.low %v1598_v16, %v1690_v31  ;;  %v1713_v35 = vcombine.high %v1598_v16, %v1690_v31  ;;  %v4167_v36 = vpop.f32.mrb[25].mxu1  ;;  %v4333_v31 = vld [vmem:[%s5332_s5] ss:$8 sps:$4 sm:$0xff]  }
 0x4b8   : > { %v1693_v37 = vpop.f32.mrb[26].mxu1  ;;  %v4336_v36 = vld [vmem:[%s5332_s5 + $0x10] ss:$8 sps:$4 sm:$0xff]  }
 0x4b9   : > { %v1720_v40 = vrot.slane %v1712_v33, %v4682_v49  ;;  %v1727_v41 = vrot.slane %v1713_v35, %v4682_v49  ;;  %v4168_v43 = vpop.f32.mrb[27].mxu1  ;;  %v4335_v33 = vld [vmem:[%s5332_s5 + $0x4] ss:$8 sps:$4 sm:$0xff]   ;;  %v4338_v35 = vld [vmem:[%s5332_s5 + $0x14] ss:$8 sps:$4 sm:$0xff]  }
 0x4ba   : > { %2200 = vmatprep.subr.bf16.mxu0 %v4335_v33  ;;  %v4341_v37 = vld [vmem:[%s5332_s5 + $0x24] ss:$8 sps:$4 sm:$0xff]   ;;  %v4342_v43 = vld [vmem:[%s5332_s5 + $0x30] ss:$8 sps:$4 sm:$0xff]  }
 0x4bb   : > { %v1728_v45 = vcombine.low %v1704_v38, %v1720_v40  ;;  %v1729_v46 = vcombine.high %v1704_v38, %v1720_v40  ;;  %v1744_v47 = vcombine.low %v1711_v39, %v1727_v41  ;;  %v1745_v48 = vcombine.high %v1711_v39, %v1727_v41  ;;  %v4357_v38 = vld [vmem:[%s5331_s4] sm:$0xff]   ;;  %v4358_v40 = vld [vmem:[%s5331_s4 + $0x8] sm:$0xff]   ;;  %v4344_v41 = vld [vmem:[%s5332_s5 + $0x34] ss:$8 sps:$4 sm:$0xff]  }
 0x4bc   : > { %v4339_v39 = vld [vmem:[%s5332_s5 + $0x20] ss:$8 sps:$4 sm:$0xff]   ;;  %4190 = vmatpush3.bf16.msra.mxu1 %v4357_v38 }
 0x4bd   : > { %v1736_v51 = vrot.slane %v1728_v45, %v4685_v52  ;;  %v1743_v53 = vrot.slane %v1729_v46, %v4685_v52  ;;  %v1752_v54 = vrot.slane %v1744_v47, %v4685_v52  ;;  %v1759_v55 = vrot.slane %v1745_v48, %v4685_v52  ;;  %4191 = vmatprep.subr.bf16.mxu1 %v4465_v20  ;;  %v4347_v45 = vld [vmem:[%s5332_s5 + $0x44] ss:$8 sps:$4 sm:$0xff]   ;;  %v4345_v46 = vld [vmem:[%s5332_s5 + $0x40] ss:$8 sps:$4 sm:$0xff]   ;;  %v4350_v47 = vld [vmem:[%s5332_s5 + $0x54] ss:$8 sps:$4 sm:$0xff]  }
 0x4be   : > { %v4348_v48 = vld [vmem:[%s5332_s5 + $0x50] ss:$8 sps:$4 sm:$0xff]  }
 0x4bf   : > { %v1764_v56 = vcombine.low %v1736_v51, %v1743_v53  ;;  %v3923_v57 = vcombine.high %v1736_v51, %v1743_v53  ;;  %v1780_v58 = vcombine.low %v1752_v54, %v1759_v55  ;;  %v3924_v59 = vcombine.high %v1752_v54, %v1759_v55  ;;  %v4351_v51 = vld [vmem:[%s5332_s5 + $0x60] ss:$8 sps:$4 sm:$0xff]   ;;  %v4356_v53 = vld [vmem:[%s5332_s5 + $0x74] ss:$8 sps:$4 sm:$0xff]   ;;  %v4354_v54 = vld [vmem:[%s5332_s5 + $0x70] ss:$8 sps:$4 sm:$0xff]  }
 0x4c0   : > { %4192 = vmatpush3.bf16.msra.mxu1 %v4358_v40  ;;  %v2090_v55 = vld [vmem:[%s502_s22] sm:$0xff] }
 0x4c1   : > { %v1771_v60 = vrot.slane %v1764_v56, %v4682_v49  ;;  %v1779_v32 = vrot.slane %v3923_v57, %v4682_v49  ;;  %v1787_v61 = vrot.slane %v1780_v58, %v4682_v49  ;;  %v1795_v62 = vrot.slane %v3924_v59, %v4682_v49  ;;  %4193 = vmatprep.subr.bf16.mxu1 %v4465_v20 }
 0x4c2   : > { %v2091_v56 = vpack.c.bf16 %v2090_v55, %v2090_v55 }
 0x4c3   : > { %v1797_v63 = vcombine.high %v1771_v60, %v1779_v32  ;;  %v1813_v0 = vcombine.high %v1787_v61, %v1795_v62  ;;  %v1796_v1 = vcombine.low %v1771_v60, %v1779_v32  ;;  %v1812_v3 = vcombine.low %v1787_v61, %v1795_v62  ;;  %v4359_v32 = vld [vmem:[%s5331_s4 + $0x10] sm:$0xff]   ;;  %v4360_v61 = vld [vmem:[%s5331_s4 + $0x18] sm:$0xff]   ;;  %v4361_v62 = vld [vmem:[%s5331_s4 + $0x20] sm:$0xff]  }
 0x4c4   : > { %4194 = vmatpush3.bf16.msra.mxu1 %v4359_v32 }
 0x4c5   : > { %v1811_v4 = vrot.slane %v1797_v63, %v4685_v52  ;;  %v1827_v5 = vrot.slane %v1813_v0, %v4685_v52  ;;  %v1804_v6 = vrot.slane %v1796_v1, %v4685_v52  ;;  %v1820_v7 = vrot.slane %v1812_v3, %v4685_v52  ;;  %4195 = vmatprep.subr.bf16.mxu1 %v4465_v20  ;;  %v4363_v63 = vld [vmem:[%s5331_s4 + $0x30] sm:$0xff]   ;;  %v4364_v0 = vld [vmem:[%s5331_s4 + $0x38] sm:$0xff]   ;;  %v4971_v1 = vld [vmem:[%s5337_s10] sm:$0x3] }
 0x4c6   : > { %v2113_v3 = vrot.slane %v4971_v1, %v4646_v28 }
 0x4c7   : > { %v1830_v9 = vcombine.low %v1811_v4, %v1827_v5  ;;  %v1829_v42 = vcombine.high %v1804_v6, %v1820_v7  ;;  %v1831_v44 = vcombine.high %v1811_v4, %v1827_v5  ;;  %v1828_v10 = vcombine.low %v1804_v6, %v1820_v7 }
 0x4c8   : > { %4196 = vmatpush3.bf16.msra.mxu1 %v4360_v61 }
 0x4c9   : > { %1837 = vrot.lane.b32.xlu1 %v1830_v9, %s4468_s20  ;;  %1833 = vrot.lane.b32.xlu0 %v1829_v42, %s5343_s30 }
 0x4ca   : > { %4197 = vmatprep.subr.bf16.mxu1 %v4465_v20 }
 0x4cc   : > { %4198 = vmatpush3.bf16.msra.mxu1 %v4361_v62 }
 0x4cd   : > { %1841 = vrot.lane.b32.xlu1 %v1831_v44, %s4467_s19  ;;  %4199 = vmatprep.subr.bf16.mxu1 %v4465_v20 }
 0x4d0   : > { %4200 = vmatpush3.bf16.msra.mxu1 %v4362_v34 }
 0x4d1   : > { %4201 = vmatprep.subr.bf16.mxu1 %v4465_v20 }
 0x4d4   : > { %4202 = vmatpush3.bf16.msra.mxu1 %v4363_v63 }
 0x4d5   : > { %4203 = vmatprep.subr.bf16.mxu1 %v4465_v20 }
 0x4d8   : > { %4204 = vmatpush3.bf16.msra.mxu1 %v4364_v0 }
 0x4d9   : > { %4209 = vmatprep.subr.bf16.mxu1 %v4465_v20 }
 0x53b   : > { %v1838_v11 = vpop.permute.xlu1 %1837  ;;  %v1834_v12 = vpop.permute.xlu0 %1833 }
 0x53c   : > { %v1844_v13 = vsel %vm1277_vm1, %v1828_v10, %v1834_v12  ;;  %v4983_v12 = vld [vmem:[%s5340_s13] sm:$0x3f] }
 0x53d   : > { %v1846_v15 = vsel %vm1845_vm4, %v1844_v13, %v1838_v11  ;;  %v1974_v13 = vrot.slane %v4983_v12, %v4646_v28 }
 0x53f   : > { %v1842_v14 = vpop.permute.xlu1 %1841 }
 0x540   : > { %v1848_v16 = vsel %vm1847_vm5, %v1846_v15, %v1842_v14 }
 0x541   : > { %v1849_v17 = vpack.c.bf16 %v1848_v16, %v1848_v16  ;;  %v1979_v16 = vrot.slane %v4983_v12, %v4638_v26 }
 0x543   : > { %4186 = vmatmul.mubr.bf16.vlgmr.msra.gmra.mrb[12].mxu0 %v1849_v17 }
 0x544   : > { %2232 = vmatprep.mubr.bf16.mxu0 %v4464_v2  ;;  %2201 = vmatpush1.bf16.msra.mxu0 %v4333_v31 }
 0x545   : > { %2202 = vmatprep.subr.bf16.mxu0 %v4338_v35 }
 0x548   : > { %2203 = vmatpush1.bf16.msra.mxu0 %v4336_v36 }
 0x549   : > { %2204 = vmatprep.subr.bf16.mxu0 %v4341_v37 }
 0x54c   : > { %2205 = vmatpush1.bf16.msra.mxu0 %v4339_v39 }
 0x54d   : > { %2206 = vmatprep.subr.bf16.mxu0 %v4344_v41 }
 0x550   : > { %2207 = vmatpush1.bf16.msra.mxu0 %v4342_v43 }
 0x551   : > { %2208 = vmatprep.subr.bf16.mxu0 %v4347_v45 }
 0x554   : > { %2209 = vmatpush1.bf16.msra.mxu0 %v4345_v46 }
 0x555   : > { %2210 = vmatprep.subr.bf16.mxu0 %v4350_v47 }
 0x558   : > { %2211 = vmatpush1.bf16.msra.mxu0 %v4348_v48 }
 0x559   : > { %2212 = vmatprep.subr.bf16.mxu0 %v4353_v50 }
 0x55c   : > { %2213 = vmatpush1.bf16.msra.mxu0 %v4351_v51 }
 0x55d   : > { %2214 = vmatprep.subr.bf16.mxu0 %v4356_v53 }
 0x560   : > { %2215 = vmatpush1.bf16.msra.mxu0 %v4354_v54 }
 0x561   : > { %4233 = vmatprep.subr.bf16.mxu0 %v4465_v20 }
 0x563   : > { %2233 = vmatmul.mubr.bf16.vlgmr.msra.gmra.mrb[16].mxu0 %v2091_v56 }
 0x564   : > { %4235 = vmatprep.mubr.msk.bf16.mxu0 %vm4469_vm0, %v4465_v20 }
 0x616   : > { %v1952_v21 = vpop.f32.mrb[12].mxu0 }
 0x617   : > { %v1953_v22 = vadd.f32 %v1952_v21, %v1869_v19  ;;  %v4187_v23 = vpop.f32.mrb[13].mxu0 }
 0x618   : > { %v1955_v25 = vpop.f32.mrb[14].mxu0 }
 0x619   : > { %v4188_v27 = vpop.f32.mrb[15].mxu0  ;;  %v1958_v30 = vadd.f32 %v4453_v29, %v1953_v22 }
 0x61b   : > { %1959 = vadd.xlane.f32.xlu0 %v1958_v30 }
 0x636   : > { %v2234_v4 = vpop.f32.mrb[16].mxu0 }
 0x637   : > { %v2235_v5 = vadd.f32 %v2234_v4, %v2113_v3  ;;  %v4975_v6 = vpop.f32.mrb[17].mxu0 }
 0x638   : > { %v2238_v7 = vpop.f32.mrb[18].mxu0 }
 0x639   : > { %v2410_v9 = vpack.c.bf16 %v2235_v5, %v2235_v5  ;;  %v2239_v42 = vpop.f32.mrb[19].mxu0 }
 0x63b   : > { %2412 = vrot.lane.b32.xlu0 %v2410_v9, %s4467_s19  ;;  %v2424_v22 = vrot.slane %v2410_v9, %v4682_v49 }
 0x63f   : > { %2416 = vrot.lane.b32.xlu0 %v2410_v9, %s5345_s26 }
 0x6a8   : > { %v1960_v57 = vpop.xlane.xlu0 %1959 }
 0x6a9   : > { %v1962_v58 = vmul.f32 0.0078125, %v1960_v57 }
 0x6ab   : > { %v1963_v59 = vsub.f32 %v1958_v30, %v1962_v58 }
 0x6ad   : > { %v1964_v60 = vmul.f32 %v1963_v59, %v1963_v59  ;;  %v2413_v23 = vpop.permute.xlu0 %2412 }
 0x6ae   : > { %v2458_v31 = vrot.slane %v2413_v23, %v4682_v49 }
 0x6af   : > { %1965 = vadd.xlane.f32.xlu1 %v1964_v60 }
 0x6b1   : > { %v2417_v33 = vpop.permute.xlu0 %2416 }
 0x6b2   : > { %v2466_v37 = vrot.slane %v2417_v33, %v4682_v49  ;;  %v2001_v33 = vrot.slane %v4876_v18, %v4638_v26 }
 0x6b4   : > { %v2467_v39 = vcombine.low %v2458_v31, %v2466_v37  ;;  %v2468_v40 = vcombine.high %v2458_v31, %v2466_v37 }
 0x6b6   : > { %v2475_v45 = vrot.slane %v2467_v39, %v4685_v52  ;;  %v2482_v46 = vrot.slane %v2468_v40, %v4685_v52 }
 0x6b8   : > { %v2483_v50 = vcombine.high %v2475_v45, %v4464_v2  ;;  %v2484_v51 = vcombine.high %v2482_v46, %v4464_v2  ;;  %v2490_v54 = vshrl.u32 %v2475_v45, 16  ;;  %v2506_v57 = vshrl.u32 %v2482_v46, 16 }
 0x6ba   : > { %v2498_v60 = vshrl.u32 %v2483_v50, 16  ;;  %v2514_v62 = vshrl.u32 %v2484_v51, 16 }
 0x6c0   : > { %2414 = vrot.lane.b32.xlu1 %v2410_v9, %s4468_s20 }
 0x73c   : > { %v1966_v44 = vpop.xlane.xlu1 %1965 }
 0x73d   : > { %v1967_v10 = vmul.f32 0.0078125, %v1966_v44 }
 0x73f   : > { %v1968_v11 = vadd.f32 1e-05, %v1967_v10 }
 0x740   : > { %v2415_v25 = vpop.permute.xlu1 %2414 }
 0x741   : > { %4429 = vrsqrt.f32 %v1968_v11  ;;  %v2432_v27 = vrot.slane %v2415_v25, %v4682_v49 }
 0x743   : > { %v2433_v29 = vcombine.low %v2424_v22, %v2432_v27  ;;  %v2434_v30 = vcombine.high %v2424_v22, %v2432_v27 }
 0x745   : > { %v2441_v35 = vrot.slane %v2433_v29, %v4685_v52  ;;  %v2448_v36 = vrot.slane %v2434_v30, %v4685_v52 }
 0x747   : > { %v2449_v38 = vcombine.high %v2441_v35, %v4464_v2  ;;  %v2450_v41 = vcombine.high %v2448_v36, %v4464_v2  ;;  %v2489_v43 = vshrl.u32 %v2441_v35, 16  ;;  %v2505_v48 = vshrl.u32 %v2448_v36, 16 }
 0x748   : > { %v2487_v53 = vpack.i.b16 %v2475_v45, %v2441_v35  ;;  %v2503_v56 = vpack.i.b16 %v2482_v46, %v2448_v36 }
 0x749   : > { %v2497_v47 = vshrl.u32 %v2449_v38, 16  ;;  %v2513_v55 = vshrl.u32 %v2450_v41, 16  ;;  %v2491_v58 = vpack.i.b16 %v2490_v54, %v2489_v43  ;;  %v2511_v32 = vpack.i.b16 %v2484_v51, %v2450_v41 }
 0x74a   : > { %v2507_v61 = vpack.i.b16 %v2506_v57, %v2505_v48  ;;  %v2517_v34 = vcombine.low %v2487_v53, %v2503_v56 }
 0x74b   : > { %v4430_v14 = vpop.eup %4429  ;;  %v2499_v63 = vpack.i.b16 %v2498_v60, %v2497_v47  ;;  %v2515_v0 = vpack.i.b16 %v2514_v62, %v2513_v55 }
 0x74c   : > { %v1970_v15 = vmul.f32 %v4430_v14, %v1963_v59  ;;  %v2495_v59 = vpack.i.b16 %v2483_v50, %v2449_v38  ;;  %v2542_v4 = vcombine.low %v2491_v58, %v2507_v61  ;;  %v2524_v5 = vrot.slane %v2517_v34, %v4682_v49 }
 0x74d   : > { %v2550_v7 = vcombine.low %v2499_v63, %v2515_v0 }
 0x74e   : > { %v1975_v17 = vmul.f32 %v1974_v13, %v1970_v15  ;;  %v2525_v3 = vcombine.low %v2495_v59, %v2511_v32  ;;  %v2549_v42 = vrot.slane %v2542_v4, %v4682_v49 }
 0x74f   : > { %v2557_v44 = vrot.slane %v2550_v7, %v4682_v49 }
 0x750   : > { %v4989_v19 = vadd.f32 %v1979_v16, %v1975_v17  ;;  %v2532_v9 = vrot.slane %v2525_v3, %v4682_v49 }
 0x751   : > { %v2558_v11 = vcombine.low %v2549_v42, %v2557_v44 }
 0x752   : > { %v1981_v21 = vpack.c.bf16 %v4989_v19, %v4989_v19  ;;  %v2533_v10 = vcombine.low %v2524_v5, %v2532_v9 }
 0x753   : > { %v2565_v14 = vrot.slane %v2558_v11, %v4685_v52 }
 0x754   : > { %4206 = vmatmul.mubr.bf16.vlgmr.msra.gmra.mrb[28].mxu1 %v1981_v21  ;;  %v2540_v13 = vrot.slane %v2533_v10, %v4685_v52 }
 0x755   : > { %4211 = vmatprep.mubr.msk.bf16.mxu1 %vm4469_vm0, %v4465_v20  ;;  %v2571_v17 = vshrl.u32 %v2565_v14, 16  ;;  %v5017_v22 = vcombine.high %v2565_v14, %v4464_v2 }
 0x756   : > { %v2569_v15 = vpack.i.b16 %v2565_v14, %v2540_v13  ;;  %v2570_v16 = vshrl.u32 %v2540_v13, 16  ;;  %v5014_v21 = vcombine.high %v2540_v13, %v4464_v2 }
 0x757   : > { %v2577_v30 = vshrl.u32 %v5017_v22, 16 }
 0x758   : > { %v2752_v23 = vsel %vm1277_vm1, %v2569_v15, 0  ;;  %v5020_v25 = vpack.i.b16 %v2571_v17, %v2570_v16  ;;  %v2575_v27 = vpack.i.b16 %v5017_v22, %v5014_v21  ;;  %v2576_v29 = vshrl.u32 %v5014_v21, 16 }
 0x759   : > { %4210 = vmatpush3.bf16.xpose.msra.mxu1 %v2752_v23 }
 0x75a   : > { %4215 = vmatprep.subr.bf16.mxu1 %v4465_v20  ;;  %v5027_v31 = vpack.i.b16 %v2577_v30, %v2576_v29 }
 0x827   : > { %v2084_v35 = vpop.f32.mrb[28].mxu1 }
 0x828   : > { %v2085_v36 = vadd.f32 %v2084_v35, %v2001_v33  ;;  %v4207_v37 = vpop.f32.mrb[29].mxu1 }
 0x829   : > { %v2087_v38 = vpop.f32.mrb[30].mxu1 }
 0x82a   : > { %v2241_v39 = vpack.c.bf16 %v2085_v36, %v2085_v36  ;;  %v4208_v40 = vpop.f32.mrb[31].mxu1 }
 0x82c   : > { %2245 = vrot.lane.b32.xlu0 %v2241_v39, %s4468_s20  ;;  %2243 = vrot.lane.b32.xlu1 %v2241_v39, %s4467_s19  ;;  %v2255_v45 = vrot.slane %v2241_v39, %v4682_v49 }
 0x830   : > { %2247 = vrot.lane.b32.xlu1 %v2241_v39, %s5345_s26 }
 0x89e   : > { %v2246_v41 = vpop.permute.xlu0 %2245  ;;  %v2244_v43 = vpop.permute.xlu1 %2243 }
 0x89f   : > { %v2263_v46 = vrot.slane %v2246_v41, %v4682_v49  ;;  %v2289_v54 = vrot.slane %v2244_v43, %v4682_v49 }
 0x8a1   : > { %v2264_v47 = vcombine.low %v2255_v45, %v2263_v46  ;;  %v2265_v48 = vcombine.high %v2255_v45, %v2263_v46  ;;  %v2798_v45 = vsel %vm1277_vm1, %v5020_v25, 0 }
 0x8a2   : > { %v2248_v50 = vpop.permute.xlu1 %2247 }
 0x8a3   : > { %v2272_v51 = vrot.slane %v2264_v47, %v4685_v52  ;;  %v2297_v53 = vrot.slane %v2248_v50, %v4682_v49  ;;  %v2279_v55 = vrot.slane %v2265_v48, %v4685_v52  ;;  %v2844_v50 = vsel %vm1277_vm1, %v2575_v27, 0 }
 0x8a5   : > { %v2298_v56 = vcombine.low %v2289_v54, %v2297_v53  ;;  %v2299_v57 = vcombine.high %v2289_v54, %v2297_v53  ;;  %v2280_v58 = vcombine.high %v2272_v51, %v4464_v2  ;;  %v2281_v32 = vcombine.high %v2279_v55, %v4464_v2 }
 0x8a6   : > { %v2320_v61 = vshrl.u32 %v2272_v51, 16  ;;  %v2336_v4 = vshrl.u32 %v2279_v55, 16  ;;  %v2890_v54 = vsel %vm1277_vm1, %v5027_v31, 0 }
 0x8a7   : > { %v2306_v59 = vrot.slane %v2298_v56, %v4685_v52  ;;  %v2313_v60 = vrot.slane %v2299_v57, %v4685_v52  ;;  %v2328_v3 = vshrl.u32 %v2280_v58, 16  ;;  %v2344_v11 = vshrl.u32 %v2281_v32, 16 }
 0x8a9   : > { %v2314_v62 = vcombine.high %v2306_v59, %v4464_v2  ;;  %v2315_v34 = vcombine.high %v2313_v60, %v4464_v2  ;;  %v2318_v63 = vpack.i.b16 %v2306_v59, %v2272_v51  ;;  %v2321_v0 = vshrl.u32 %v2306_v59, 16 }
 0x8aa   : > { %v2334_v5 = vpack.i.b16 %v2313_v60, %v2279_v55  ;;  %v2337_v7 = vshrl.u32 %v2313_v60, 16 }
 0x8ab   : > { %v2322_v9 = vpack.i.b16 %v2321_v0, %v2320_v61  ;;  %v2326_v42 = vpack.i.b16 %v2314_v62, %v2280_v58  ;;  %v2329_v44 = vshrl.u32 %v2314_v62, 16  ;;  %v2342_v10 = vpack.i.b16 %v2315_v34, %v2281_v32 }
 0x8ac   : > { %v2338_v13 = vpack.i.b16 %v2337_v7, %v2336_v4  ;;  %v2345_v14 = vshrl.u32 %v2315_v34, 16  ;;  %v2348_v15 = vcombine.low %v2318_v63, %v2334_v5  ;;  %v2117_v63 = vrot.slane %v4971_v1, %v4638_v26 }
 0x8ad   : > { %v2330_v16 = vpack.i.b16 %v2329_v44, %v2328_v3  ;;  %v2356_v17 = vcombine.low %v2326_v42, %v2342_v10 }
 0x8ae   : > { %v2346_v23 = vpack.i.b16 %v2345_v14, %v2344_v11  ;;  %v2373_v29 = vcombine.low %v2322_v9, %v2338_v13  ;;  %v2355_v33 = vrot.slane %v2348_v15, %v4682_v49  ;;  %v2237_v7 = vadd.f32 %v4975_v6, %v2117_v63 }
 0x8af   : > { %v2363_v30 = vrot.slane %v2356_v17, %v4682_v49 }
 0x8b0   : > { %v2381_v35 = vcombine.low %v2330_v16, %v2346_v23  ;;  %v2380_v37 = vrot.slane %v2373_v29, %v4682_v49  ;;  %v2579_v42 = vpack.c.bf16 %v2237_v7, %v2237_v7 }
 0x8b1   : > { %v2364_v36 = vcombine.low %v2355_v33, %v2363_v30 }
 0x8b2   : > { %v2388_v38 = vrot.slane %v2381_v35, %v4682_v49 }
 0x8b3   : > { %v2371_v40 = vrot.slane %v2364_v36, %v4685_v52 }
 0x8b4   : > { %v2389_v39 = vcombine.low %v2380_v37, %v2388_v38 }
 0x8b5   : > { %v2401_v47 = vshrl.u32 %v2371_v40, 16  ;;  %v2372_v51 = vcombine.high %v2371_v40, %v4464_v2 }
 0x8b6   : > { %v2396_v41 = vrot.slane %v2389_v39, %v4685_v52 }
 0x8b7   : > { %v2407_v22 = vshrl.u32 %v2372_v51, 16 }
 0x8b8   : > { %v2400_v43 = vpack.i.b16 %v2396_v41, %v2371_v40  ;;  %v2402_v46 = vshrl.u32 %v2396_v41, 16  ;;  %v2397_v25 = vcombine.high %v2396_v41, %v4464_v2 }
 0x8ba   : > { %4212 = vmatmul.mubr.msk.bf16.vlgmr.msra.gmra.mrb[32].mxu1 %vm1277_vm1, %v2400_v43  ;;  %v2403_v48 = vpack.i.b16 %v2402_v46, %v2401_v47  ;;  %v2406_v53 = vpack.i.b16 %v2397_v25, %v2372_v51  ;;  %v2408_v21 = vshrl.u32 %v2397_v25, 16 }
 0x8bb   : > { %4216 = vmatpush3.bf16.xpose.msra.mxu1 %v2798_v45  ;;  %4217 = vmatprep.mubr.msk.bf16.mxu1 %vm4469_vm0, %v4465_v20 }
 0x8bc   : > { %4221 = vmatprep.subr.bf16.mxu1 %v4465_v20  ;;  %v2409_v27 = vpack.i.b16 %v2408_v21, %v2407_v22 }
 0x8c2   : > { %4218 = vmatmul.mubr.msk.bf16.vlgmr.msra.gmra.mrb[36].mxu1 %vm1277_vm1, %v2403_v48 }
 0x8c3   : > { %4222 = vmatpush3.bf16.xpose.msra.mxu1 %v2844_v50  ;;  %4223 = vmatprep.mubr.msk.bf16.mxu1 %vm4469_vm0, %v4465_v20 }
 0x8c4   : > { %4227 = vmatprep.subr.bf16.mxu1 %v4465_v20 }
 0x8ca   : > { %4224 = vmatmul.mubr.msk.bf16.vlgmr.msra.gmra.mrb[40].mxu1 %vm1277_vm1, %v2406_v53 }
 0x8cb   : > { %4228 = vmatpush3.bf16.xpose.msra.mxu1 %v2890_v54  ;;  %4229 = vmatprep.mubr.msk.bf16.mxu1 %vm4469_vm0, %v4465_v20 }
 0x8cc   : > { %4239 = vmatprep.subr.bf16.mxu1 %v4465_v20 }
 0x8d2   : > { %4230 = vmatmul.mubr.msk.bf16.vlgmr.msra.gmra.mrb[44].mxu1 %vm1277_vm1, %v2409_v27 }
 0x8d3   : > { %4241 = vmatprep.mubr.msk.bf16.mxu1 %vm4469_vm0, %v4465_v20 }
 0x98d   : > { %v2788_v55 = vpop.f32.mrb[32].mxu1 }
 0x98e   : > { %v4213_v56 = vpop.f32.mrb[33].mxu1  ;;  %v2932_v57 = vsel %vm1462_vm2, %v2788_v55, -inf }
 0x98f   : > { %2933 = vmax.xlane.f32.xlu0 %v2932_v57  ;;  %v2791_v31 = vpop.f32.mrb[34].mxu1 }
 0x990   : > { %v4214_v58 = vpop.f32.mrb[35].mxu1 }
 0x995   : > { %v2834_v59 = vpop.f32.mrb[36].mxu1 }
 0x996   : > { %v4219_v60 = vpop.f32.mrb[37].mxu1  ;;  %v2935_v32 = vsel %vm1462_vm2, %v2834_v59, -inf }
 0x997   : > { %2936 = vmax.xlane.f32.xlu1 %v2935_v32  ;;  %v2837_v61 = vpop.f32.mrb[38].mxu1 }
 0x998   : > { %v4220_v62 = vpop.f32.mrb[39].mxu1 }
 0x99d   : > { %v2880_v34 = vpop.f32.mrb[40].mxu1 }
 0x99e   : > { %v4225_v0 = vpop.f32.mrb[41].mxu1  ;;  %v2938_v3 = vsel %vm1462_vm2, %v2880_v34, -inf }
 0x99f   : > { %2939 = vmax.xlane.f32.xlu0 %v2938_v3  ;;  %v2883_v4 = vpop.f32.mrb[42].mxu1 }
 0x9a0   : > { %v4226_v5 = vpop.f32.mrb[43].mxu1 }
 0x9a5   : > { %v2926_v9 = vpop.f32.mrb[44].mxu1 }
 0x9a6   : > { %v4231_v44 = vpop.f32.mrb[45].mxu1  ;;  %v2941_v10 = vsel %vm1462_vm2, %v2926_v9, -inf }
 0x9a7   : > { %2942 = vmax.xlane.f32.xlu0 %v2941_v10  ;;  %v2929_v11 = vpop.f32.mrb[46].mxu1 }
 0x9a8   : > { %2581 = vrot.lane.b32.xlu1 %v2579_v42, %s4467_s19  ;;  %v4232_v13 = vpop.f32.mrb[47].mxu1 }
 0xa1c   : > { %v2934_v14 = vpop.xlane.xlu0 %2933 }
 0xa1d   : > { %v2944_v1 = vsub.f32 %v2788_v55, %v2934_v14  ;;  %v2593_v55 = vrot.slane %v2579_v42, %v4682_v49 }
 0xa1f   : > { %v2948_v15 = vmul.f32 1.442695, %v2944_v1 }
 0xa21   : > { %4431 = vpow2.f32 %v2948_v15 }
 0xa24   : > { %v2937_v16 = vpop.xlane.xlu1 %2936 }
 0xa25   : > { %v2945_v17 = vsub.f32 %v2834_v59, %v2937_v16 }
 0xa27   : > { %v2950_v23 = vmul.f32 1.442695, %v2945_v17 }
 0xa28   : > { %v2582_v47 = vpop.permute.xlu1 %2581 }
 0xa29   : > { %4433 = vpow2.f32 %v2950_v23  ;;  %v2627_v51 = vrot.slane %v2582_v47, %v4682_v49 }
 0xa2b   : > { %v5085_v29 = vpop.eup %4431 }
 0xa2c   : > { %v2956_v6 = vsel %vm1462_vm2, %v5085_v29, 0.0  ;;  %v2940_v35 = vpop.xlane.xlu0 %2939 }
 0xa2d   : > { %2957 = vadd.xlane.f32.xlu1 %v2956_v6  ;;  %v2946_v36 = vsub.f32 %v2880_v34, %v2940_v35 }
 0xa2f   : > { %v2952_v37 = vmul.f32 1.442695, %v2946_v36 }
 0xa31   : > { %4435 = vpow2.f32 %v2952_v37 }
 0xa33   : > { %v5089_v30 = vpop.eup %4433 }
 0xa34   : > { %v2959_v33 = vsel %vm1462_vm2, %v5089_v30, 0.0  ;;  %v2943_v38 = vpop.xlane.xlu0 %2942 }
 0xa35   : > { %2960 = vadd.xlane.f32.xlu0 %v2959_v33  ;;  %v2947_v39 = vsub.f32 %v2926_v9, %v2943_v38 }
 0xa37   : > { %v2954_v40 = vmul.f32 1.442695, %v2947_v39 }
 0xa39   : > { %4437 = vpow2.f32 %v2954_v40 }
 0xa3b   : > { %v5095_v41 = vpop.eup %4435 }
 0xa3c   : > { %v2962_v43 = vsel %vm1462_vm2, %v5095_v41, 0.0 }
 0xa3e   : > { %2585 = vrot.lane.b32.xlu1 %v2579_v42, %s5345_s26 }
 0xa43   : > { %v5099_v45 = vpop.eup %4437 }
 0xa44   : > { %v2965_v46 = vsel %vm1462_vm2, %v5099_v45, 0.0 }
 0xa4b   : > { %2583 = vrot.lane.b32.xlu0 %v2579_v42, %s4468_s20 }
 0xa62   : > { %2963 = vadd.xlane.f32.xlu1 %v2962_v43 }
 0xa6a   : > { %2966 = vadd.xlane.f32.xlu0 %v2965_v46 }
 0xaba   : > { %v2958_v48 = vpop.xlane.xlu1 %2957 }
 0xabb   : > { %4439 = vrcp.f32 %v2958_v48 }
 0xabe   : > { %v2586_v50 = vpop.permute.xlu1 %2585 }
 0xabf   : > { %v2635_v25 = vrot.slane %v2586_v50, %v4682_v49 }
 0xac1   : > { %v2636_v53 = vcombine.low %v2627_v51, %v2635_v25  ;;  %v2637_v21 = vcombine.high %v2627_v51, %v2635_v25 }
 0xac2   : > { %v2961_v54 = vpop.xlane.xlu0 %2960 }
 0xac3   : > { %v2644_v22 = vrot.slane %v2636_v53, %v4685_v52  ;;  %v2651_v57 = vrot.slane %v2637_v21, %v4685_v52  ;;  %4441 = vrcp.f32 %v2961_v54 }
 0xac5   : > { %v2652_v59 = vcombine.high %v2644_v22, %v4464_v2  ;;  %v2653_v61 = vcombine.high %v2651_v57, %v4464_v2  ;;  %v2659_v62 = vshrl.u32 %v2644_v22, 16  ;;  %v2675_v5 = vshrl.u32 %v2651_v57, 16  ;;  %v4440_v37 = vpop.eup %4439 }
 0xac6   : > { %v2584_v27 = vpop.permute.xlu0 %2583  ;;  %v2972_v25 = vmul.f32 %v4440_v37, %v5085_v29 }
 0xac7   : > { %v2601_v56 = vrot.slane %v2584_v27, %v4682_v49  ;;  %v2667_v4 = vshrl.u32 %v2652_v59, 16  ;;  %v2683_v13 = vshrl.u32 %v2653_v61, 16 }
 0xac9   : > { %v2602_v31 = vcombine.low %v2593_v55, %v2601_v56  ;;  %v2603_v58 = vcombine.high %v2593_v55, %v2601_v56 }
 0xacb   : > { %v2610_v60 = vrot.slane %v2602_v31, %v4685_v52  ;;  %v2617_v32 = vrot.slane %v2603_v58, %v4685_v52 }
 0xacd   : > { %v2618_v34 = vcombine.high %v2610_v60, %v4464_v2  ;;  %v2619_v63 = vcombine.high %v2617_v32, %v4464_v2  ;;  %v2656_v0 = vpack.i.b16 %v2644_v22, %v2610_v60  ;;  %v2658_v3 = vshrl.u32 %v2610_v60, 16  ;;  %v4442_v39 = vpop.eup %4441 }
 0xace   : > { %v2672_v7 = vpack.i.b16 %v2651_v57, %v2617_v32  ;;  %v2674_v9 = vshrl.u32 %v2617_v32, 16  ;;  %v2973_v22 = vmul.f32 %v4442_v39, %v5089_v30 }
 0xacf   : > { %v2660_v42 = vpack.i.b16 %v2659_v62, %v2658_v3  ;;  %v2664_v44 = vpack.i.b16 %v2652_v59, %v2618_v34  ;;  %v2666_v10 = vshrl.u32 %v2618_v34, 16  ;;  %v2680_v11 = vpack.i.b16 %v2653_v61, %v2619_v63 }
 0xad0   : > { %v2676_v14 = vpack.i.b16 %v2675_v5, %v2674_v9  ;;  %v2682_v1 = vshrl.u32 %v2619_v63, 16  ;;  %v2686_v15 = vcombine.low %v2656_v0, %v2672_v7  ;;  %v2976_v59 = vpack.c.bf16 %v2972_v25, %v2972_v25  ;;  %v4365_v7 = vld [vmem:[%s5333_s6] sm:$0xff]  }
 0xad1   : > { %v2668_v16 = vpack.i.b16 %v2667_v4, %v2666_v10  ;;  %v2694_v17 = vcombine.low %v2664_v44, %v2680_v11  ;;  %v2977_v32 = vpack.c.bf16 %v2973_v22, %v2973_v22  ;;  %v4369_v9 = vld [vmem:[%s5333_s6 + $0x20] sm:$0xff]   ;;  %v4371_v22 = vld [vmem:[%s5333_s6 + $0x30] sm:$0xff]  }
 0xad2   : > { %v2684_v23 = vpack.i.b16 %v2683_v13, %v2682_v1  ;;  %v2711_v6 = vcombine.low %v2660_v42, %v2676_v14  ;;  %v2693_v33 = vrot.slane %v2686_v15, %v4682_v49  ;;  %v4370_v42 = vld [vmem:[%s5333_s6 + $0x28] sm:$0xff]  }
 0xad3   : > { %v2701_v35 = vrot.slane %v2694_v17, %v4682_v49 }
 0xad4   : > { %v2719_v36 = vcombine.low %v2668_v16, %v2684_v23  ;;  %v2718_v40 = vrot.slane %v2711_v6, %v4682_v49 }
 0xad5   : > { %v2702_v38 = vcombine.low %v2693_v33, %v2701_v35 }
 0xad6   : > { %v2726_v43 = vrot.slane %v2719_v36, %v4682_v49 }
 0xad7   : > { %v2709_v46 = vrot.slane %v2702_v38, %v4685_v52 }
 0xad8   : > { %v2727_v47 = vcombine.low %v2718_v40, %v2726_v43 }
 0xad9   : > { %v2710_v48 = vcombine.high %v2709_v46, %v4464_v2  ;;  %v2739_v53 = vshrl.u32 %v2709_v46, 16 }
 0xada   : > { %v2734_v50 = vrot.slane %v2727_v47, %v4685_v52 }
 0xadb   : > { %v2745_v27 = vshrl.u32 %v2710_v48, 16 }
 0xadc   : > { %v2738_v51 = vpack.i.b16 %v2734_v50, %v2709_v46  ;;  %v2740_v54 = vshrl.u32 %v2734_v50, 16  ;;  %v2735_v21 = vcombine.high %v2734_v50, %v4464_v2 }
 0xade   : > { %v2984_v55 = vsel %vm1514_vm3, %v2738_v51, 0  ;;  %v2741_v56 = vpack.i.b16 %v2740_v54, %v2739_v53  ;;  %v2744_v57 = vpack.i.b16 %v2735_v21, %v2710_v48  ;;  %v2746_v31 = vshrl.u32 %v2735_v21, 16 }
 0xadf   : > { %4234 = vmatpush3.bf16.msra.mxu0 %v2984_v55 }
 0xae0   : > { %v3030_v58 = vsel %vm1514_vm3, %v2741_v56, 0  ;;  %4245 = vmatprep.subr.bf16.mxu0 %v4465_v20  ;;  %v2747_v29 = vpack.i.b16 %v2746_v31, %v2745_v27  ;;  %v3076_v60 = vsel %vm1514_vm3, %v2744_v57, 0 }
 0xae1   : > { %4240 = vmatpush3.bf16.msra.mxu1 %v3030_v58 }
 0xae2   : > { %4236 = vmatmul.mubr.msk.bf16.vlgmr.msra.gmra.mrb[20].mxu0 %vm1462_vm2, %v2976_v59  ;;  %4251 = vmatprep.subr.bf16.mxu1 %v4465_v20  ;;  %v3122_v30 = vsel %vm1514_vm3, %v2747_v29, 0 }
 0xae3   : > { %4246 = vmatpush3.bf16.msra.mxu0 %v3076_v60  ;;  %4247 = vmatprep.mubr.msk.bf16.mxu0 %vm4469_vm0, %v4465_v20  ;;  %v4372_v60 = vld [vmem:[%s5333_s6 + $0x38] sm:$0xff]  }
 0xae4   : > { %4242 = vmatmul.mubr.msk.bf16.vlgmr.msra.gmra.mrb[48].mxu1 %vm1462_vm2, %v2977_v32  ;;  %4257 = vmatprep.subr.bf16.mxu0 %v4465_v20 }
 0xae5   : > { %4252 = vmatpush3.bf16.msra.mxu1 %v3122_v30  ;;  %4253 = vmatprep.mubr.msk.bf16.mxu1 %vm4469_vm0, %v4465_v20 }
 0xaef   : > { %v2964_v61 = vpop.xlane.xlu1 %2963 }
 0xaf0   : > { %4443 = vrcp.f32 %v2964_v61 }
 0xaf7   : > { %v2967_v62 = vpop.xlane.xlu0 %2966 }
 0xaf8   : > { %4445 = vrcp.f32 %v2967_v62 }
 0xafa   : > { %v4444_v34 = vpop.eup %4443 }
 0xafb   : > { %v2974_v63 = vmul.f32 %v4444_v34, %v5095_v41  ;;  %v4366_v41 = vld [vmem:[%s5333_s6 + $0x8] sm:$0xff]  }
 0xafd   : > { %v2978_v0 = vpack.c.bf16 %v2974_v63, %v2974_v63 }
 0xaff   : > { %4248 = vmatmul.mubr.msk.bf16.vlgmr.msra.gmra.mrb[24].mxu0 %vm1462_vm2, %v2978_v0 }
 0xb00   : > { %4273 = vmatprep.mubr.msk.bf16.mxu0 %vm4469_vm0, %v4465_v20  ;;  %4258 = vmatpush3.bf16.msra.mxu0 %v4365_v7 }
 0xb01   : > { %4259 = vmatprep.subr.bf16.mxu0 %v4465_v20 }
 0xb02   : > { %v4446_v3 = vpop.eup %4445 }
 0xb03   : > { %v2975_v4 = vmul.f32 %v4446_v3, %v5099_v45  ;;  %v4367_v45 = vld [vmem:[%s5333_s6 + $0x10] sm:$0xff]  }
 0xb04   : > { %4260 = vmatpush3.bf16.msra.mxu0 %v4366_v41 }
 0xb05   : > { %v2979_v5 = vpack.c.bf16 %v2975_v4, %v2975_v4  ;;  %4261 = vmatprep.subr.bf16.mxu0 %v4465_v20 }
 0xb07   : > { %4254 = vmatmul.mubr.msk.bf16.vlgmr.msra.gmra.mrb[52].mxu1 %vm1462_vm2, %v2979_v5 }
 0xb08   : > { %3587 = vmatprep.mubr.bf16.mxu1 %v4464_v2  ;;  %4262 = vmatpush3.bf16.msra.mxu0 %v4367_v45  ;;  %v4368_v2 = vld [vmem:[%s5333_s6 + $0x18] sm:$0xff]  }
 0xb09   : > { %4263 = vmatprep.subr.bf16.mxu0 %v4465_v20 }
 0xb0c   : > { %4264 = vmatpush3.bf16.msra.mxu0 %v4368_v2 }
 0xb0d   : > { %4265 = vmatprep.subr.bf16.mxu0 %v4465_v20 }
 0xb10   : > { %4266 = vmatpush3.bf16.msra.mxu0 %v4369_v9 }
 0xb11   : > { %4267 = vmatprep.subr.bf16.mxu0 %v4465_v20 }
 0xb14   : > { %4268 = vmatpush3.bf16.msra.mxu0 %v4370_v42 }
 0xb15   : > { %4269 = vmatprep.subr.bf16.mxu0 %v4465_v20 }
 0xb18   : > { %4270 = vmatpush3.bf16.msra.mxu0 %v4371_v22  ;;  %v4394_v22 = vld [vmem:[%s5334_s7 + $0x70] ss:$8 sps:$4 sm:$0xff]  }
 0xb19   : > { %4271 = vmatprep.subr.bf16.mxu0 %v4465_v20 }
 0xb1c   : > { %4272 = vmatpush3.bf16.msra.mxu0 %v4372_v60  ;;  %v4405_v60 = vld [vmem:[%s5335_s8 + $0x60] sm:$0xff]  }
 0xbb5   : > { %v3020_v44 = vpop.f32.mrb[20].mxu0 }
 0xbb6   : > { %v4237_v10 = vpop.f32.mrb[21].mxu0 }
 0xbb7   : > { %v3023_v11 = vpop.f32.mrb[22].mxu0  ;;  %v3066_v13 = vpop.f32.mrb[48].mxu1 }
 0xbb8   : > { %v4238_v14 = vpop.f32.mrb[23].mxu0  ;;  %v4243_v1 = vpop.f32.mrb[49].mxu1 }
 0xbb9   : > { %v3069_v15 = vpop.f32.mrb[50].mxu1  ;;  %v3335_v14 = vrot.slane %v4876_v18, %v4750_v8  ;;  %v4378_v18 = vld [vmem:[%s5334_s7 + $0x14] ss:$8 sps:$4 sm:$0xff]  }
 0xbba   : > { %v4244_v16 = vpop.f32.mrb[51].mxu1 }
 0xbd2   : > { %v3112_v17 = vpop.f32.mrb[24].mxu0 }
 0xbd3   : > { %v3164_v23 = vcombine.low %v3020_v44, %v3112_v17  ;;  %v3165_v6 = vcombine.high %v3020_v44, %v3112_v17  ;;  %v4249_v33 = vpop.f32.mrb[25].mxu0 }
 0xbd4   : > { %v3115_v35 = vpop.f32.mrb[26].mxu0  ;;  %v4373_v33 = vld [vmem:[%s5334_s7] ss:$8 sps:$4 sm:$0xff]  }
 0xbd5   : > { %v4250_v36 = vpop.f32.mrb[27].mxu0  ;;  %v3172_v46 = vrot.slane %v3164_v23, %v4682_v49  ;;  %v3179_v47 = vrot.slane %v3165_v6, %v4682_v49  ;;  %v4375_v35 = vld [vmem:[%s5334_s7 + $0x4] ss:$8 sps:$4 sm:$0xff]  }
 0xbd6   : > { %3555 = vmatprep.subr.bf16.mxu1 %v4375_v35  ;;  %v4376_v36 = vld [vmem:[%s5334_s7 + $0x10] ss:$8 sps:$4 sm:$0xff]  }
 0xbd7   : > { %3556 = vmatpush1.bf16.msra.mxu1 %v4373_v33  ;;  %v4454_v33 = vld [vmem:[%s5339_s12] sm:$0xf] }
 0xbd8   : > { %3557 = vmatprep.subr.bf16.mxu1 %v4378_v18 }
 0xbda   : > { %v3158_v37 = vpop.f32.mrb[52].mxu1 }
 0xbdb   : > { %v3180_v38 = vcombine.low %v3066_v13, %v3158_v37  ;;  %v3181_v39 = vcombine.high %v3066_v13, %v3158_v37  ;;  %v4255_v40 = vpop.f32.mrb[53].mxu1  ;;  %3558 = vmatpush1.bf16.msra.mxu1 %v4376_v36  ;;  %v4379_v37 = vld [vmem:[%s5334_s7 + $0x20] ss:$8 sps:$4 sm:$0xff]  }
 0xbdc   : > { %v3161_v43 = vpop.f32.mrb[54].mxu1 }
 0xbdd   : > { %v3188_v48 = vrot.slane %v3180_v38, %v4682_v49  ;;  %v3195_v50 = vrot.slane %v3181_v39, %v4682_v49  ;;  %v4256_v25 = vpop.f32.mrb[55].mxu1 }
 0xbde   : > { %v4390_v25 = vld [vmem:[%s5334_s7 + $0x54] ss:$8 sps:$4 sm:$0xff]  }
 0xbdf   : > { %v3196_v51 = vcombine.low %v3172_v46, %v3188_v48  ;;  %v3197_v53 = vcombine.high %v3172_v46, %v3188_v48  ;;  %v3212_v54 = vcombine.low %v3179_v47, %v3195_v50  ;;  %v3213_v21 = vcombine.high %v3179_v47, %v3195_v50  ;;  %v4384_v46 = vld [vmem:[%s5334_s7 + $0x34] ss:$8 sps:$4 sm:$0xff]   ;;  %v4382_v47 = vld [vmem:[%s5334_s7 + $0x30] ss:$8 sps:$4 sm:$0xff]   ;;  %v4387_v48 = vld [vmem:[%s5334_s7 + $0x44] ss:$8 sps:$4 sm:$0xff]  }
 0xbe0   : > { %v4385_v50 = vld [vmem:[%s5334_s7 + $0x40] ss:$8 sps:$4 sm:$0xff]  }
 0xbe1   : > { %v3204_v27 = vrot.slane %v3196_v51, %v4685_v52  ;;  %v3211_v55 = vrot.slane %v3197_v53, %v4685_v52  ;;  %v3220_v56 = vrot.slane %v3212_v54, %v4685_v52  ;;  %v3227_v57 = vrot.slane %v3213_v21, %v4685_v52  ;;  %v4388_v51 = vld [vmem:[%s5334_s7 + $0x50] ss:$8 sps:$4 sm:$0xff]   ;;  %v4393_v53 = vld [vmem:[%s5334_s7 + $0x64] ss:$8 sps:$4 sm:$0xff]   ;;  %v4391_v54 = vld [vmem:[%s5334_s7 + $0x60] ss:$8 sps:$4 sm:$0xff]  }
 0xbe2   : > { %v4396_v21 = vld [vmem:[%s5334_s7 + $0x74] ss:$8 sps:$4 sm:$0xff]  }
 0xbe3   : > { %v3232_v31 = vcombine.low %v3204_v27, %v3211_v55  ;;  %v3965_v58 = vcombine.high %v3204_v27, %v3211_v55  ;;  %v3248_v59 = vcombine.low %v3220_v56, %v3227_v57  ;;  %v3966_v29 = vcombine.high %v3220_v56, %v3227_v57  ;;  %v4397_v27 = vld [vmem:[%s5335_s8 + $0x40] sm:$0xff]   ;;  %v4399_v56 = vld [vmem:[%s5335_s8 + $0x48] sm:$0xff]  }
 0xbe4   : > { %v4398_v55 = vld [vmem:[%s5335_s8] sm:$0xff]   ;;  %4079 = vmatprep.subr.bf16.mxu0 %v4397_v27  ;;  %v4400_v57 = vld [vmem:[%s5335_s8 + $0x8] sm:$0xff]  }
 0xbe5   : > { %v3239_v32 = vrot.slane %v3232_v31, %v4682_v49  ;;  %v3247_v30 = vrot.slane %v3965_v58, %v4682_v49  ;;  %v3255_v61 = vrot.slane %v3248_v59, %v4682_v49  ;;  %v3263_v62 = vrot.slane %v3966_v29, %v4682_v49  ;;  %v4401_v31 = vld [vmem:[%s5335_s8 + $0x50] sm:$0xff]   ;;  %v4403_v59 = vld [vmem:[%s5335_s8 + $0x58] sm:$0xff]  }
 0xbe6   : > { %v4402_v58 = vld [vmem:[%s5335_s8 + $0x10] sm:$0xff]   ;;  %v4404_v29 = vld [vmem:[%s5335_s8 + $0x18] sm:$0xff]  }
 0xbe7   : > { %v3265_v34 = vcombine.high %v3239_v32, %v3247_v30  ;;  %v3281_v63 = vcombine.high %v3255_v61, %v3263_v62  ;;  %v3264_v20 = vcombine.low %v3239_v32, %v3247_v30  ;;  %v3280_v0 = vcombine.low %v3255_v61, %v3263_v62  ;;  %v4406_v32 = vld [vmem:[%s5335_s8 + $0x20] sm:$0xff]   ;;  %v4407_v30 = vld [vmem:[%s5335_s8 + $0x68] sm:$0xff]  }
 0xbe8   : > { %v4408_v61 = vld [vmem:[%s5335_s8 + $0x28] sm:$0xff]  }
 0xbe9   : > { %v3279_v3 = vrot.slane %v3265_v34, %v4685_v52  ;;  %v3295_v4 = vrot.slane %v3281_v63, %v4685_v52  ;;  %v3272_v5 = vrot.slane %v3264_v20, %v4685_v52  ;;  %v3288_v7 = vrot.slane %v3280_v0, %v4685_v52 }
 0xbea   : > { %v3443_v20 = vsub.s32 3, %v4632_v24  ;;  %v3439_v0 = vrot.slane %v4983_v12, %v4750_v8  ;;  %v4411_v8 = vld [vmem:[%s5335_s8 + $0x78] sm:$0xff]  }
 0xbeb   : > { %v3298_v41 = vcombine.low %v3279_v3, %v3295_v4  ;;  %v3297_v45 = vcombine.high %v3272_v5, %v3288_v7  ;;  %v3299_v2 = vcombine.high %v3279_v3, %v3295_v4  ;;  %v3296_v9 = vcombine.low %v3272_v5, %v3288_v7 }
 0xbec   : > { %v3444_v5 = vrot.slane %v4983_v12, %v3443_v20  ;;  %v4412_v12 = vld [vmem:[%s5335_s8 + $0x38] sm:$0xff]  }
 0xbed   : > { %3305 = vrot.lane.b32.xlu1 %v3298_v41, %s4468_s20  ;;  %3301 = vrot.lane.b32.xlu0 %v3297_v45, %s5345_s26 }
 0xbf1   : > { %3309 = vrot.lane.b32.xlu1 %v3299_v2, %s4467_s19  ;;  %v4409_v2 = vld [vmem:[%s5335_s8 + $0x70] sm:$0xff]  }
 0xc5f   : > { %v3306_v49 = vpop.permute.xlu1 %3305  ;;  %v3302_v42 = vpop.permute.xlu0 %3301 }
 0xc60   : > { %v3312_v44 = vsel %vm1277_vm1, %v3296_v9, %v3302_v42  ;;  %v4410_v9 = vld [vmem:[%s5335_s8 + $0x30] sm:$0xff]  }
 0xc61   : > { %v3313_v11 = vsel %vm1845_vm4, %v3312_v44, %v3306_v49  ;;  %v3463_v49 = vld [vmem:[%s5338_s11] sm:$0x3] }
 0xc62   : > { %v3468_v42 = vrot.slane %v3463_v49, %v4646_v28  ;;  %v3472_v44 = vrot.slane %v3463_v49, %v4638_v26  ;;  %v3635_v28 = vrot.slane %v4454_v33, %v3443_v20 }
 0xc63   : > { %v3310_v10 = vpop.permute.xlu1 %3309 }
 0xc64   : > { %v3314_v13 = vsel %vm1847_vm5, %v3313_v11, %v3310_v10 }
 0xc65   : > { %v3315_v52 = vpack.c.bf16 %v3314_v13, %v3314_v13 }
 0xc67   : > { %4274 = vmatmul.mubr.bf16.vlgmr.msra.gmra.mrb[28].mxu0 %v3315_v52 }
 0xc68   : > { %4080 = vmatpush3.bf16.msra.mxu0 %v4398_v55 }
 0xc69   : > { %4081 = vmatprep.subr.bf16.mxu0 %v4399_v56 }
 0xc6c   : > { %4082 = vmatpush3.bf16.msra.mxu0 %v4400_v57 }
 0xc6d   : > { %4083 = vmatprep.subr.bf16.mxu0 %v4401_v31 }
 0xc70   : > { %4084 = vmatpush3.bf16.msra.mxu0 %v4402_v58 }
 0xc71   : > { %4085 = vmatprep.subr.bf16.mxu0 %v4403_v59 }
 0xc74   : > { %4086 = vmatpush3.bf16.msra.mxu0 %v4404_v29 }
 0xc75   : > { %4087 = vmatprep.subr.bf16.mxu0 %v4405_v60 }
 0xc78   : > { %4088 = vmatpush3.bf16.msra.mxu0 %v4406_v32  ;;  %v4007_v32 = vld [vmem:[%s5341_s14] ss:$0 sm:$0xff] }
 0xc79   : > { %4089 = vmatprep.subr.bf16.mxu0 %v4407_v30 }
 0xc7c   : > { %4090 = vmatpush3.bf16.msra.mxu0 %v4408_v61  ;;  %v4008_v61 = vld [vmem:[%s5341_s14 + $0x1] ss:$0 sm:$0xff] }
 0xc7d   : > { %4091 = vmatprep.subr.bf16.mxu0 %v4409_v2 }
 0xc80   : > { %4092 = vmatpush3.bf16.msra.mxu0 %v4410_v9 }
 0xc81   : > { %4093 = vmatprep.subr.bf16.mxu0 %v4411_v8 }
 0xc84   : > { %4094 = vmatpush3.bf16.msra.mxu0 %v4412_v12 }
 0xd3a   : > { %v3418_v1 = vpop.f32.mrb[28].mxu0 }
 0xd3b   : > { %v3419_v15 = vadd.f32 %v3418_v1, %v3335_v14  ;;  %v4275_v16 = vpop.f32.mrb[29].mxu0 }
 0xd3c   : > { %v3421_v17 = vpop.f32.mrb[30].mxu0 }
 0xd3d   : > { %v4276_v23 = vpop.f32.mrb[31].mxu0  ;;  %v3424_v6 = vadd.f32 %v3419_v15, %v4989_v19  ;;  %v4381_v19 = vld [vmem:[%s5334_s7 + $0x24] ss:$8 sps:$4 sm:$0xff]  }
 0xd3e   : > { %3559 = vmatprep.subr.bf16.mxu1 %v4381_v19 }
 0xd3f   : > { %3425 = vadd.xlane.f32.xlu0 %v3424_v6  ;;  %3560 = vmatpush1.bf16.msra.mxu1 %v4379_v37 }
 0xd40   : > { %3561 = vmatprep.subr.bf16.mxu1 %v4384_v46 }
 0xd43   : > { %3562 = vmatpush1.bf16.msra.mxu1 %v4382_v47 }
 0xd44   : > { %3563 = vmatprep.subr.bf16.mxu1 %v4387_v48 }
 0xd47   : > { %3564 = vmatpush1.bf16.msra.mxu1 %v4385_v50  ;;  %v3786_v50 = vsub.s32 4, %v4632_v24 }
 0xd48   : > { %3565 = vmatprep.subr.bf16.mxu1 %v4390_v25  ;;  %v3791_v25 = vsub.s32 5, %v4632_v24 }
 0xd4b   : > { %3566 = vmatpush1.bf16.msra.mxu1 %v4388_v51  ;;  %v4455_v51 = vld [vmem:[%s5340_s13] sm:$0x3f] }
 0xd4c   : > { %3567 = vmatprep.subr.bf16.mxu1 %v4393_v53  ;;  %v3787_v53 = vrot.slane %v4455_v51, %v3786_v50 }
 0xd4f   : > { %3568 = vmatpush1.bf16.msra.mxu1 %v4391_v54 }
 0xd50   : > { %3569 = vmatprep.subr.bf16.mxu1 %v4396_v21 }
 0xd53   : > { %3570 = vmatpush1.bf16.msra.mxu1 %v4394_v22  ;;  %v3792_v22 = vrot.slane %v4455_v51, %v3791_v25 }
 0xdcc   : > { %v3426_v38 = vpop.xlane.xlu0 %3425 }
 0xdcd   : > { %v3427_v39 = vmul.f32 0.0078125, %v3426_v38 }
 0xdcf   : > { %v3428_v40 = vsub.f32 %v3424_v6, %v3427_v39 }
 0xdd1   : > { %v3429_v43 = vmul.f32 %v3428_v40, %v3428_v40 }
 0xdd3   : > { %3430 = vadd.xlane.f32.xlu1 %v3429_v43 }
 0xe60   : > { %v3431_v62 = vpop.xlane.xlu1 %3430 }
 0xe61   : > { %v3432_v34 = vmul.f32 0.0078125, %v3431_v62 }
 0xe63   : > { %v3433_v63 = vadd.f32 1e-05, %v3432_v34 }
 0xe65   : > { %4447 = vrsqrt.f32 %v3433_v63 }
 0xe6f   : > { %v4448_v3 = vpop.eup %4447 }
 0xe70   : > { %v3435_v4 = vmul.f32 %v4448_v3, %v3428_v40 }
 0xe72   : > { %v3440_v7 = vmul.f32 %v3439_v0, %v3435_v4 }
 0xe74   : > { %v3445_v41 = vadd.f32 %v3444_v5, %v3440_v7 }
 0xe76   : > { %v3446_v45 = vpack.c.bf16 %v3445_v41, %v3445_v41 }
 0xe78   : > { %3588 = vmatmul.mubr.bf16.vlgmr.msra.gmra.mrb[56].mxu1 %v3446_v45 }
 0xf4b   : > { %v3589_v10 = vpop.f32.mrb[56].mxu1 }
 0xf4c   : > { %v3590_v11 = vadd.f32 %v3589_v10, %v3468_v42  ;;  %v3591_v13 = vpop.f32.mrb[57].mxu1 }
 0xf4d   : > { %v3592_v52 = vadd.f32 %v3591_v13, %v3472_v44  ;;  %v3593_v14 = vpop.f32.mrb[58].mxu1 }
 0xf4e   : > { %v3596_v1 = vmax.f32 %v3590_v11, 0.0  ;;  %v3594_v15 = vpop.f32.mrb[59].mxu1 }
 0xf4f   : > { %v3597_v16 = vmax.f32 %v3592_v52, 0.0 }
 0xf50   : > { %v3598_v23 = vpack.c.bf16 %v3596_v1, %v3596_v1 }
 0xf51   : > { %v3599_v17 = vpack.c.bf16 %v3597_v16, %v3597_v16 }
 0xf53   : > { %3764 = vmatprep.mubr.bf16.mxu0 %v3599_v17 }
 0xf54   : > { %3765 = vmatmul.mubr.bf16.vlgmr.msra.gmra.mrb[32].mxu0 %v3598_v23 }
0x1027   : > { %v4095_v6 = vpop.f32.mrb[32].mxu0 }
0x1028   : > { %v4096_v35 = vpop.f32.mrb[33].mxu0 }
0x1029   : > { %v4097_v26 = vadd.f32 %v4096_v35, %v4095_v6  ;;  %v4098_v18 = vpop.f32.mrb[34].mxu0 }
0x102a   : > { %v4099_v36 = vpop.f32.mrb[35].mxu0 }
0x102b   : > { %v3767_v19 = vadd.f32 %v4097_v26, %v3635_v28 }
0x102d   : > { %v3772_v37 = vadd.f32 %v3767_v19, %v3445_v41 }
0x102f   : > { %3773 = vadd.xlane.f32.xlu0 %v3772_v37 }
0x10bc   : > { %v3774_v38 = vpop.xlane.xlu0 %3773 }
0x10bd   : > { %v3775_v39 = vmul.f32 0.0078125, %v3774_v38 }
0x10bf   : > { %v3776_v40 = vsub.f32 %v3772_v37, %v3775_v39 }
0x10c1   : > { %v3777_v43 = vmul.f32 %v3776_v40, %v3776_v40 }
0x10c3   : > { %3778 = vadd.xlane.f32.xlu0 %v3777_v43 }
0x1150   : > { %v3779_v46 = vpop.xlane.xlu0 %3778 }
0x1151   : > { %v3780_v47 = vmul.f32 0.0078125, %v3779_v46 }
0x1153   : > { %v3781_v48 = vadd.f32 1e-05, %v3780_v47 }
0x1155   : > { %4449 = vrsqrt.f32 %v3781_v48 }
0x115f   : > { %v4450_v54 = vpop.eup %4449 }
0x1160   : > { %v3783_v21 = vmul.f32 %v4450_v54, %v3776_v40 }
0x1162   : > { %v3788_v27 = vmul.f32 %v3787_v53, %v3783_v21 }
0x1164   : > { %v3793_v55 = vadd.f32 %v3792_v22, %v3788_v27 }
0x1166   : > { %3796 = vadd.xlane.f32.xlu1 %v3793_v55 }
0x11f3   : > { %v3797_v56 = vpop.xlane.xlu1 %3796 }
0x11f4   : > { %v3798_v57 = vmul.f32 0.0078125, %v3797_v56 }
0x11f6   : > { %v3799_v31 = vsub.f32 %v3793_v55, %v3798_v57 }
0x11f8   : > { %v3800_v58 = vmul.f32 %v3799_v31, %v3799_v31 }
0x11fa   : > { %3801 = vadd.xlane.f32.xlu0 %v3800_v58 }
0x1287   : > { %v3802_v59 = vpop.xlane.xlu0 %3801 }
0x1288   : > { %v3803_v29 = vmul.f32 0.0078125, %v3802_v59 }
0x128a   : > { %v3804_v24 = vadd.f32 1e-05, %v3803_v29 }
0x128c   : > { %4451 = vrsqrt.f32 %v3804_v24 }
0x1296   : > { %v4452_v60 = vpop.eup %4451 }
0x1297   : > { %v3806_v30 = vmul.f32 %v4452_v60, %v3799_v31 }
0x1299   : > { %v3811_v62 = vmul.f32 %v4007_v32, %v3806_v30 }
0x129b   : > { %v3816_v34 = vadd.f32 %v4008_v61, %v3811_v62 }
0x129d   : > { %3817 = vst [vmem:[%s506_s24] sm:$0xff] %v3816_v34 }
0x129e PF: > { %s25_s18 = sadd.s32 1, %s4462_s18  }
0x129f   : > { %p22_p4 = scmp.ge.s32.totalorder %s25_s18, 4  }
0x12a1   :  { %24 = sbr.rel (!%p22_p4) target bundleno = 1 (0x1), region = 113 }

// kernel: transformer_decoder_forward.2
= control target key start
LH: loop header
LB: loop body
LE: loop exit
PB: predicated region body
PF: predicated region fallthrough
CT: control target
= control target key end

     0   :  { %s5632_s0 = inlined_call_operand.vmem [shape: f32[2,8,128], index: 0, kind: input, shape index: {}]   ;;  %s5633_s1 = inlined_call_operand.vmem [shape: f32[2,8,128], index: 1, kind: input, shape index: {}]   ;;  %s5634_s2 = inlined_call_operand.hbm [shape: bf16[128,384], index: 2, kind: input, shape index: {}]   ;;  %s5635_s3 = inlined_call_operand.vmem [shape: bf16[128,128], index: 3, kind: input, shape index: {}]   ;;  %s5636_s4 = inlined_call_operand.hbm [shape: bf16[128,128], index: 4, kind: input, shape index: {}]   ;;  %s5637_s5 = inlined_call_operand.hbm [shape: bf16[128,256], index: 5, kind: input, shape index: {}]   ;;  %s5638_s6 = inlined_call_operand.hbm [shape: bf16[128,128], index: 6, kind: input, shape index: {}]   ;;  %s5639_s7 = inlined_call_operand.hbm [shape: bf16[128,256], index: 7, kind: input, shape index: {}]   ;;  %s5640_s8 = inlined_call_operand.hbm [shape: bf16[256,128], index: 8, kind: input, shape index: {}]   ;;  %s5641_s9 = inlined_call_operand.vmem [shape: f32[1,384], index: 9, kind: input, shape index: {}]   ;;  %s5642_s10 = inlined_call_operand.vmem [shape: f32[1,256], index: 10, kind: input, shape index: {}]   ;;  %s5643_s11 = inlined_call_operand.vmem [shape: f32[1,256], index: 11, kind: input, shape index: {}]   ;;  %s5644_s12 = inlined_call_operand.vmem [shape: f32[4,128], index: 12, kind: input, shape index: {}]   ;;  %s5645_s13 = inlined_call_operand.vmem [shape: f32[6,128], index: 13, kind: input, shape index: {}]   ;;  %s5646_s14 = inlined_call_operand.vmem [shape: f32[2,128], index: 14, kind: input, shape index: {}]   ;;  %s5647_s15 = inlined_call_operand.vmem [shape: f32[2,8,128], index: 15, kind: output, shape index: {}]  }
   0x1   :  { %5653 = sst [smem:[#allocation17_spill]] %s5634_s2 }
   0x2   :  { %5654 = sst [smem:[#allocation18_spill]] %s5636_s4 }
   0x3   :  { %5655 = sst [smem:[#allocation19_spill]] %s5643_s11 }
   0x4   :  { %5656 = sst [smem:[#allocation20_spill]] %s5647_s15 }
   0x5   :  { %20 = vsyncpa [#allocation3], 0 }
   0x6   :  { %21 = vsyncpa [#allocation5], 0 }
   0x7   :  { %22 = vsyncpa [#allocation8], 0 }
   0x8   :  { %23 = vsyncpa [#allocation11], 0  ;;  %s4948_s18 = smov 0  }
   0x9 LB: > { %5657 = sst [smem:[#allocation16_spill]] %s4846_s18  ;;  %s4848_s19 = smov [#allocation4]   ;;  %s4846_s18 = sphi %s4948_s18, %s29_s18  }
   0xa   : > { %s413_s20 = sshll.u32 %s4848_s19, 4  ;;  %s4954_s14 = sadd.s32 4294967295, %s4846_s18   ;;  %s4959_s20 = int_to_ptr.vmem [resolvable:$true] %s413_s20 }
   0xb   : > { %p4010_p0 = scmp.ge.s32.totalorder %s4846_s18, 1  ;;  %p385_p1 = scmp.lt.s32.totalorder %s4846_s18, 3 }
   0xc   : > { %p5651_p2 = scmp.eq.s32.totalorder %s4954_s14, 0  ;;  %s4849_s22 = smov [#allocation7]  }
   0xd   : > { %p4961_p3 = pnand %p4010_p0, %p385_p1  ;;  %s439_s23 = sshll.u32 %s4849_s22, 4  ;;  %s4967_s23 = int_to_ptr.vmem [resolvable:$true] %s439_s23 }
   0xe   : > { %s4850_s25 = smov [#allocation2]   ;;  %s5660_s4 = sld [smem:[#allocation18_spill]] }
   0xf   : > { %s5658_s21 = scalar_select %p4961_p3, 1, 0 }
  0x10   : > { %p4436_p4 = pneg %p4961_p3  ;;  %s397_s26 = sshll.u32 %s4850_s25, 4  ;;  %s4975_s26 = int_to_ptr.vmem [resolvable:$true] %s397_s26 }
  0x12   : > { %p4971_p5 = pnand %p5651_p2, %p4436_p4 }
  0x14   : > { %s4656_s29 = scalar_lea.hbm %s5660_s4, 1024  ;;  %p4985_p7 = pneg %p4971_p5 }
  0x15   : > { %p4657_p6 = scmp.ne.s32.totalorder %s5660_s4, %s4656_s29  ;;  %p4663_p10 = scmp.lt.u32.totalorder %s4656_s29, %s5660_s4 }
  0x17   : > { %p4659_p8 = pnand %p4985_p7, %p4657_p6 }
  0x19   : > { %p4660_p9 = pneg %p4659_p8 }
  0x1b   : > { %p4665_p11 = pnand %p4663_p10, %p4660_p9 }
  0x1d   : > { %4668 = shalt.err (!%p4665_p11)
}
  0x1e   : > { %s4669_s25 = scalar_lea.vmem %s4959_s20, 1024  ;;  %p4677_p1 = scmp.lt.s32.totalorder %s4959_s20, %s4959_s20 }
  0x1f   : > { %p4670_p12 = scmp.ne.s32.totalorder %s4959_s20, %s4669_s25  ;;  %p4678_p4 = scmp.lt.s32.totalorder %s4669_s25, %s4669_s25 }
  0x21   : > { %p4672_p13 = pnand %p4670_p12, %p4985_p7  ;;  %p4679_p6 = por %p4678_p4, %p4677_p1 }
  0x23   : > { %p4673_p0 = pneg %p4672_p13 }
  0x25   : > { %p4680_p8 = pnand %p4679_p6, %p4673_p0 }
  0x27   : > { %4683 = shalt.err (!%p4680_p8)
}
  0x28   : > { %s5649_s27 = smov 64   ;;  %s5650_s28 = smov 4  }
  0x29   : > { %4442 = dma.hbm_to_vmem [thread:$0]  (!%p4971_p5), %s5660_s4, 1024, %s4959_s20, [#allocation5], %s5649_s27, %s5649_s27, %s5650_s28  }
  0x2a   : > { %s4684_s22 = scalar_lea.hbm %s5638_s6, 1024 }
  0x2b   : > { %p4685_p9 = scmp.ne.s32.totalorder %s5638_s6, %s4684_s22  ;;  %p4691_p12 = scmp.lt.u32.totalorder %s4684_s22, %s5638_s6 }
  0x2d   : > { %p4687_p10 = pnand %p4685_p9, %p4985_p7 }
  0x2f   : > { %p4688_p11 = pneg %p4687_p10 }
  0x31   : > { %p4693_p13 = pnand %p4691_p12, %p4688_p11 }
  0x33   : > { %4696 = shalt.err (!%p4693_p13)
}
  0x34   : > { %s4697_s20 = scalar_lea.vmem %s4967_s23, 1024  ;;  %p4705_p6 = scmp.lt.s32.totalorder %s4967_s23, %s4967_s23 }
  0x35   : > { %p4698_p0 = scmp.ne.s32.totalorder %s4967_s23, %s4697_s20  ;;  %p4706_p8 = scmp.lt.s32.totalorder %s4697_s20, %s4697_s20 }
  0x37   : > { %p4700_p1 = pnand %p4698_p0, %p4985_p7  ;;  %p4707_p9 = por %p4706_p8, %p4705_p6 }
  0x39   : > { %p4701_p4 = pneg %p4700_p1 }
  0x3b   : > { %p4708_p10 = pnand %p4707_p9, %p4701_p4 }
  0x3d   : > { %4711 = shalt.err (!%p4708_p10)
}
  0x3e   : > { %4448 = dma.hbm_to_vmem [thread:$0]  (!%p4971_p5), %s5638_s6, 1024, %s4967_s23, [#allocation8], %s5649_s27, %s5649_s27, %s5650_s28  }
  0x3f   : > { %s5662_s2 = sld [smem:[#allocation17_spill]] }
  0x45   : > { %s4712_s30 = scalar_lea.hbm %s5662_s2, 3072 }
  0x46   : > { %p4713_p11 = scmp.ne.s32.totalorder %s5662_s2, %s4712_s30  ;;  %p4719_p0 = scmp.lt.u32.totalorder %s4712_s30, %s5662_s2 }
  0x48   : > { %p4715_p12 = pnand %p4713_p11, %p4985_p7 }
  0x4a   : > { %p4716_p13 = pneg %p4715_p12 }
  0x4c   : > { %p4721_p1 = pnand %p4719_p0, %p4716_p13 }
  0x4e   : > { %4724 = shalt.err (!%p4721_p1)
}
  0x4f   : > { %s4725_s23 = scalar_lea.vmem %s4975_s26, 3072  ;;  %p4733_p9 = scmp.lt.s32.totalorder %s4975_s26, %s4975_s26 }
  0x50   : > { %p4726_p4 = scmp.ne.s32.totalorder %s4975_s26, %s4725_s23  ;;  %p4734_p10 = scmp.lt.s32.totalorder %s4725_s23, %s4725_s23 }
  0x52   : > { %p4728_p6 = pnand %p4726_p4, %p4985_p7  ;;  %p4735_p11 = por %p4734_p10, %p4733_p9 }
  0x54   : > { %p4729_p8 = pneg %p4728_p6 }
  0x56   : > { %p4736_p12 = pnand %p4735_p11, %p4729_p8 }
  0x58   : > { %4739 = shalt.err (!%p4736_p12)
}
  0x59   : > { %s4853_s20 = smov 192   ;;  %s4854_s11 = smov 12  }
  0x5a   : > { %4439 = dma.hbm_to_vmem [thread:$0]  (!%p4971_p5), %s5662_s2, 3072, %s4975_s26, [#allocation3], %s4853_s20, %s4853_s20, %s4854_s11  }
  0x5b   : > { %s4855_s29 = smov [#allocation6]   ;;  %s4740_s22 = scalar_lea.hbm %s5637_s5, 2048 }
  0x5c   : > { %s426_s30 = sshll.u32 %s4855_s29, 4  ;;  %p4741_p13 = scmp.ne.s32.totalorder %s5637_s5, %s4740_s22  ;;  %s427_s30 = int_to_ptr.vmem [resolvable:$true] %s426_s30 }
  0x5d   : > { %p4747_p4 = scmp.lt.u32.totalorder %s4740_s22, %s5637_s5 }
  0x5e   : > { %p4743_p0 = pnand %p4741_p13, %p4985_p7 }
  0x60   : > { %p4744_p1 = pneg %p4743_p0 }
  0x62   : > { %p4749_p6 = pnand %p4747_p4, %p4744_p1 }
  0x64   : > { %4752 = shalt.err (!%p4749_p6)
}
  0x65   : > { %s4753_s26 = scalar_lea.vmem %s427_s30, 2048  ;;  %p4761_p11 = scmp.lt.s32.totalorder %s427_s30, %s427_s30 }
  0x66   : > { %p4754_p8 = scmp.ne.s32.totalorder %s427_s30, %s4753_s26  ;;  %p4762_p12 = scmp.lt.s32.totalorder %s4753_s26, %s4753_s26 }
  0x68   : > { %p4756_p9 = pnand %p4754_p8, %p4985_p7  ;;  %p4763_p2 = por %p4762_p12, %p4761_p11 }
  0x6a   : > { %p4757_p10 = pneg %p4756_p9 }
  0x6c   : > { %p4764_p3 = pnand %p4763_p2, %p4757_p10 }
  0x6e   : > { %4767 = shalt.err (!%p4764_p3)
}
  0x6f   : > { %s4856_s20 = smov 128   ;;  %s4857_s11 = smov 8  }
  0x70   : > { %4445 = dma.hbm_to_vmem [thread:$0]  (!%p4971_p5), %s5637_s5, 2048, %s427_s30, [#allocation5], %s4856_s20, %s4856_s20, %s4857_s11  }
  0x71   : > { %s4858_s15 = smov [#allocation9]   ;;  %s4859_s29 = smov [#allocation10]  }
  0x72   : > { %s452_s18 = sshll.u32 %s4858_s15, 4  ;;  %s465_s16 = sshll.u32 %s4859_s29, 4  ;;  %s453_s18 = int_to_ptr.vmem [resolvable:$true] %s452_s18  ;;  %s466_s16 = int_to_ptr.vmem [resolvable:$true] %s465_s16 }
  0x73   : > { %s4768_s25 = scalar_lea.hbm %s5639_s7, 2048 }
  0x74   : > { %p4769_p2 = scmp.ne.s32.totalorder %s5639_s7, %s4768_s25  ;;  %p4775_p0 = scmp.lt.u32.totalorder %s4768_s25, %s5639_s7 }
  0x76   : > { %p4771_p3 = pnand %p4769_p2, %p4985_p7 }
  0x78   : > { %p4772_p13 = pneg %p4771_p3 }
  0x7a   : > { %p4777_p1 = pnand %p4775_p0, %p4772_p13 }
  0x7c   : > { %4780 = shalt.err (!%p4777_p1)
}
  0x7d   : > { %s4781_s30 = scalar_lea.vmem %s453_s18, 2048  ;;  %p4789_p9 = scmp.lt.s32.totalorder %s453_s18, %s453_s18 }
  0x7e   : > { %p4782_p4 = scmp.ne.s32.totalorder %s453_s18, %s4781_s30  ;;  %p4790_p10 = scmp.lt.s32.totalorder %s4781_s30, %s4781_s30 }
  0x80   : > { %p4784_p6 = pnand %p4782_p4, %p4985_p7  ;;  %p4791_p11 = por %p4790_p10, %p4789_p9 }
  0x82   : > { %p4785_p8 = pneg %p4784_p6 }
  0x84   : > { %p4792_p12 = pnand %p4791_p11, %p4785_p8 }
  0x86   : > { %4795 = shalt.err (!%p4792_p12)
}
  0x87   : > { %4451 = dma.hbm_to_vmem [thread:$0]  (!%p4971_p5), %s5639_s7, 2048, %s453_s18, [#allocation8], %s4856_s20, %s4856_s20, %s4857_s11  }
  0x88   : > { %s4796_s15 = scalar_lea.hbm %s5640_s8, 2048 }
  0x89   : > { %p4797_p2 = scmp.ne.s32.totalorder %s5640_s8, %s4796_s15  ;;  %p4803_p0 = scmp.lt.u32.totalorder %s4796_s15, %s5640_s8 }
  0x8b   : > { %p4799_p3 = pnand %p4797_p2, %p4985_p7 }
  0x8d   : > { %p4800_p13 = pneg %p4799_p3 }
  0x8f   : > { %p4805_p1 = pnand %p4803_p0, %p4800_p13 }
  0x91   : > { %4808 = shalt.err (!%p4805_p1)
}
  0x92   : > { %s4809_s23 = scalar_lea.vmem %s466_s16, 2048  ;;  %p4817_p9 = scmp.lt.s32.totalorder %s466_s16, %s466_s16 }
  0x93   : > { %p4810_p4 = scmp.ne.s32.totalorder %s466_s16, %s4809_s23  ;;  %p4818_p10 = scmp.lt.s32.totalorder %s4809_s23, %s4809_s23 }
  0x95   : > { %p4812_p6 = pnand %p4810_p4, %p4985_p7  ;;  %p4819_p11 = por %p4818_p10, %p4817_p9 }
  0x97   : > { %p4813_p8 = pneg %p4812_p6 }
  0x99   : > { %p4820_p12 = pnand %p4819_p11, %p4813_p8 }
  0x9b   : > { %4823 = shalt.err (!%p4820_p12)
}
  0x9c   : > { %s5663_s20 = smov 4   ;;  %s5664_s11 = smov 64  }
  0x9d   : > { %4454 = dma.hbm_to_vmem [thread:$0]  (!%p4971_p5), %s5640_s8, 2048, %s466_s16, [#allocation11], %s5664_s11, %s5664_s11, %s5663_s20  }
  0x9e   : > { %p5665_p2 = scmp.ne.s32.totalorder %s5658_s21, 0 }
  0x9f   : > { %p5666_p7 = scmp.eq.s32.totalorder (!%p5665_p2), %s4954_s14, 0 }
  0xa0   : > { %513 = sbr.rel (%p5665_p2) target bundleno = 4628 (0x1214), region = 80 }
  0xa7   : > { %4829 = dma.done.wait (%p5666_p7), [#allocation3], 3072   ;;  %p5667_p3 = pmov %p5666_p7 }
  0xa9   : > { %4831 = vsyncadd (%p5667_p3), [#allocation3], 4294964224  ;;  %p5668_p13 = pmov %p5667_p3 }
  0xaa   : > { %p5669_p0 = pmov %p5667_p3 }
  0xab   : > { %4833 = dma.done.wait (%p5668_p13), [#allocation5], 3072  }
  0xac   : > { %4835 = vsyncadd (%p5669_p0), [#allocation5], 4294964224  ;;  %p5670_p1 = pmov %p5669_p0 }
  0xad   : > { %p5671_p5 = pmov %p5669_p0 }
  0xae   : > { %4837 = dma.done.wait (%p5670_p1), [#allocation8], 3072  }
  0xaf   : > { %4839 = vsyncadd (%p5671_p5), [#allocation8], 4294964224  ;;  %p5672_p4 = pmov %p5669_p0 }
  0xb0   : > { %p5673_p6 = pmov %p5669_p0 }
  0xb1   : > { %4841 = dma.done.wait (%p5672_p4), [#allocation11], 2048  }
  0xb2   : > { %4843 = vsyncadd (%p5673_p6), [#allocation11], 4294965248  ;;  %v4860_v0 = vmov 0   ;;  %v4495_v1 = vld [vmem:[#allocation2 + $0x4] ss:$12 sps:$4 sm:$0xff]   ;;  %p583_p8 = scmp.lt.s32.totalorder %s4954_s14, 1  ;;  %v634_v23 = vlaneseq }
  0xb3   : > { %809 = vmatprep.mubr.bf16.mxu0 %v4860_v0  ;;  %v4497_v2 = vld [vmem:[#allocation2] ss:$12 sps:$4 sm:$0xff]   ;;  %777 = vmatprep.subr.bf16.mxu0 %v4495_v1  ;;  %v4498_v3 = vld [vmem:[#allocation2 + $0x1c] ss:$12 sps:$4 sm:$0xff]   ;;  %v4500_v4 = vld [vmem:[#allocation2 + $0x18] ss:$12 sps:$4 sm:$0xff]  }
  0xb4   : > { %778 = vmatpush1.bf16.msra.mxu0 %v4497_v2  ;;  %v4501_v5 = vld [vmem:[#allocation2 + $0x34] ss:$12 sps:$4 sm:$0xff]   ;;  %s5678_s14 = smov (!%p583_p8, %s4954_s14), 1  ;;  %v4503_v6 = vld [vmem:[#allocation2 + $0x30] ss:$12 sps:$4 sm:$0xff]   ;;  %v4861_v20 = vmov 0.0  }
  0xb5   : > { %779 = vmatprep.subr.bf16.mxu0 %v4498_v3  ;;  %v4504_v7 = vld [vmem:[#allocation2 + $0x4c] ss:$12 sps:$4 sm:$0xff]   ;;  %v4506_v8 = vld [vmem:[#allocation2 + $0x48] ss:$12 sps:$4 sm:$0xff]   ;;  %s5136_s21 = sshll.u32 %s5678_s14, 3  ;;  %4236 = vmatprep.subr.bf16.mxu1 %v4861_v20  ;;  %v5150_v24 = vshrl.u32 %v634_v23, 7 }
  0xb6   : > { %v4507_v9 = vld [vmem:[#allocation2 + $0x64] ss:$12 sps:$4 sm:$0xff]   ;;  %v4509_v10 = vld [vmem:[#allocation2 + $0x60] ss:$12 sps:$4 sm:$0xff]   ;;  %v4510_v11 = vld [vmem:[#allocation2 + $0x7c] ss:$12 sps:$4 sm:$0xff]   ;;  %s5142_s16 = scalar_lea.vmem %s5632_s0, %s5136_s21  ;;  %s590_s22 = scalar_lea.vmem %s5633_s1, %s5136_s21 }
  0xb7   : > { %v4512_v12 = vld [vmem:[#allocation2 + $0x78] ss:$12 sps:$4 sm:$0xff]   ;;  %v4513_v13 = vld [vmem:[#allocation2 + $0x94] ss:$12 sps:$4 sm:$0xff]   ;;  %v4515_v14 = vld [vmem:[#allocation2 + $0x90] ss:$12 sps:$4 sm:$0xff]  }
  0xb8   : > { %780 = vmatpush1.bf16.msra.mxu0 %v4500_v4  ;;  %v4516_v15 = vld [vmem:[#allocation2 + $0xac] ss:$12 sps:$4 sm:$0xff]   ;;  %v4518_v16 = vld [vmem:[#allocation2 + $0xa8] ss:$12 sps:$4 sm:$0xff]   ;;  %v4522_v25 = vld [vmem:[#allocation2 + $0x50] ss:$12 sps:$4 sm:$0xff]  }
  0xb9   : > { %781 = vmatprep.subr.bf16.mxu0 %v4501_v5  ;;  %v596_v17 = vld [vmem:[%s5142_s16] sm:$0xff]  ;;  %v4520_v21 = vld [vmem:[#allocation2 + $0x20] ss:$12 sps:$4 sm:$0xff]   ;;  %v4521_v22 = vld [vmem:[#allocation2 + $0x38] ss:$12 sps:$4 sm:$0xff]   ;;  %v5153_v26 = vsub.s32 1, %v5150_v24 }
  0xba   : > { %v599_v18 = vpack.c.bf16 %v596_v17, %v596_v17  ;;  %v4519_v19 = vld [vmem:[#allocation2 + $0x8] ss:$12 sps:$4 sm:$0xff]   ;;  %v5158_v27 = vld [vmem:[%s5641_s9] sm:$0x7]  ;;  %v5161_v28 = vsub.s32 0, %v5150_v24  ;;  %s4862_s27 = smov 32  }
  0xbb   : > { %4237 = vmatpush3.bf16.msra.mxu1 %v4519_v19  ;;  %v641_v29 = vrot.slane %v5158_v27, %v5153_v26  ;;  %v4523_v30 = vld [vmem:[#allocation2 + $0x68] ss:$12 sps:$4 sm:$0xff]   ;;  %s4863_s28 = smov 96   ;;  %v4524_v39 = vld [vmem:[#allocation2 + $0x80] ss:$12 sps:$4 sm:$0xff]   ;;  %s4864_s2 = smov 64  }
  0xbc   : > { %782 = vmatpush1.bf16.msra.mxu0 %v4503_v6  ;;  %4238 = vmatprep.subr.bf16.mxu1 %v4861_v20  ;;  %v637_v31 = vrot.slane %v5158_v27, %v5161_v28  ;;  %v4525_v41 = vld [vmem:[#allocation2 + $0x98] ss:$12 sps:$4 sm:$0xff]   ;;  %v4526_v42 = vld [vmem:[#allocation2 + $0xb0] ss:$12 sps:$4 sm:$0xff]   ;;  %vm4865_vm0 = vmmov 0   ;;  %vm1365_vm1 = vcmask 261120  }
  0xbd   : > { %783 = vmatprep.subr.bf16.mxu0 %v4504_v7  ;;  %4252 = vmatprep.mubr.msk.bf16.mxu1 %vm4865_vm0, %v4861_v20  ;;  %v4866_v43 = vmov 1983009808   ;;  %v4867_v45 = vmov 1934713408   ;;  %vm1550_vm2 = vcmask 64512   ;;  %vm1602_vm3 = vcmask 1043456  }
  0xbe   : > { %v867_v44 = vunpack.c.l.s4 %v4866_v43  ;;  %v884_v46 = vunpack.c.l.s4 %v4867_v45  ;;  %vm1933_vm4 = vcmask 523264   ;;  %vm1935_vm5 = vcmask 785408   ;;  %s5675_s4 = sld [smem:[#allocation20_spill]] }
  0xbf   : > { %4239 = vmatpush3.bf16.msra.mxu1 %v4520_v21 }
  0xc0   : > { %784 = vmatpush1.bf16.msra.mxu0 %v4506_v8  ;;  %4240 = vmatprep.subr.bf16.mxu1 %v4861_v20  ;;  %v868_v47 = vunpack.c.0.s8 %v867_v44  ;;  %v885_v48 = vunpack.c.0.s8 %v884_v46 }
  0xc1   : > { %785 = vmatprep.subr.bf16.mxu0 %v4507_v9 }
  0xc2   : > { %v5185_v49 = vsub.s32 %v868_v47, %v5150_v24  ;;  %v5188_v52 = vsub.s32 %v885_v48, %v5150_v24 }
  0xc3   : > { %4241 = vmatpush3.bf16.msra.mxu1 %v4521_v22 }
  0xc4   : > { %786 = vmatpush1.bf16.msra.mxu0 %v4509_v10  ;;  %4242 = vmatprep.subr.bf16.mxu1 %v4861_v20  ;;  %s594_s15 = scalar_lea.vmem %s5675_s4, %s5136_s21 }
  0xc5   : > { %787 = vmatprep.subr.bf16.mxu0 %v4510_v11 }
  0xc7   : > { %4243 = vmatpush3.bf16.msra.mxu1 %v4522_v25 }
  0xc8   : > { %788 = vmatpush1.bf16.msra.mxu0 %v4512_v12  ;;  %4244 = vmatprep.subr.bf16.mxu1 %v4861_v20 }
  0xc9   : > { %789 = vmatprep.subr.bf16.mxu0 %v4513_v13 }
  0xcb   : > { %4245 = vmatpush3.bf16.msra.mxu1 %v4523_v30 }
  0xcc   : > { %790 = vmatpush1.bf16.msra.mxu0 %v4515_v14  ;;  %4246 = vmatprep.subr.bf16.mxu1 %v4861_v20 }
  0xcd   : > { %791 = vmatprep.subr.bf16.mxu0 %v4516_v15 }
  0xcf   : > { %4247 = vmatpush3.bf16.msra.mxu1 %v4524_v39 }
  0xd0   : > { %792 = vmatpush1.bf16.msra.mxu0 %v4518_v16  ;;  %4248 = vmatprep.subr.bf16.mxu1 %v4861_v20 }
  0xd1   : > { %4280 = vmatprep.subr.bf16.mxu0 %v4861_v20 }
  0xd3   : > { %810 = vmatmul.mubr.bf16.vlgmr.msra.gmra.mrb[0].mxu0 %v599_v18  ;;  %4249 = vmatpush3.bf16.msra.mxu1 %v4525_v41 }
  0xd4   : > { %4250 = vmatprep.subr.bf16.mxu1 %v4861_v20  ;;  %4282 = vmatprep.mubr.msk.bf16.mxu0 %vm4865_vm0, %v4861_v20 }
  0xd7   : > { %4251 = vmatpush3.bf16.msra.mxu1 %v4526_v42 }
  0xd8   : > { %4256 = vmatprep.subr.bf16.mxu1 %v4861_v20 }
  0xda   : > { %4253 = vmatmul.mubr.bf16.vlgmr.msra.gmra.mrb[0].mxu1 %v599_v18 }
  0xdb   : > { %4258 = vmatprep.mubr.msk.bf16.mxu1 %vm4865_vm0, %v4861_v20 }
 0x1a6   : > { %v811_v32 = vpop.f32.mrb[0].mxu0 }
 0x1a7   : > { %v813_v33 = vpop.f32.mrb[1].mxu0  ;;  %v812_v37 = vadd.f32 %v811_v32, %v637_v31 }
 0x1a8   : > { %v814_v34 = vadd.f32 %v813_v33, %v641_v29  ;;  %v815_v35 = vpop.f32.mrb[2].mxu0 }
 0x1a9   : > { %v816_v36 = vpop.f32.mrb[3].mxu0  ;;  %v858_v40 = vpack.c.bf16 %v812_v37, %v812_v37 }
 0x1aa   : > { %v1027_v38 = vpack.c.bf16 %v814_v34, %v814_v34 }
 0x1ab   : > { %v872_v6 = vrot.slane %v858_v40, %v5185_v49 }
 0x1ac   : > { %1033 = vrot.lane.b32.xlu1 %v1027_v38, %s4862_s27  ;;  %1029 = vrot.lane.b32.xlu0 %v1027_v38, %s4863_s28  ;;  %v1041_v62 = vrot.slane %v1027_v38, %v5185_v49 }
 0x1b0   : > { %1031 = vrot.lane.b32.xlu0 %v1027_v38, %s4864_s2  ;;  %860 = vrot.lane.b32.xlu1 %v858_v40, %s4863_s28 }
 0x1b4   : > { %862 = vrot.lane.b32.xlu0 %v858_v40, %s4864_s2  ;;  %864 = vrot.lane.b32.xlu1 %v858_v40, %s4862_s27 }
 0x21e   : > { %v1034_v50 = vpop.permute.xlu1 %1033  ;;  %v1030_v51 = vpop.permute.xlu0 %1029 }
 0x21f   : > { %v1083_v53 = vrot.slane %v1034_v50, %v5185_v49  ;;  %v1075_v54 = vrot.slane %v1030_v51, %v5185_v49 }
 0x221   : > { %v1084_v55 = vcombine.low %v1075_v54, %v1083_v53  ;;  %v1085_v56 = vcombine.high %v1075_v54, %v1083_v53 }
 0x222   : > { %v1032_v57 = vpop.permute.xlu0 %1031  ;;  %v861_v58 = vpop.permute.xlu1 %860 }
 0x223   : > { %v1092_v59 = vrot.slane %v1084_v55, %v5188_v52  ;;  %v1099_v60 = vrot.slane %v1085_v56, %v5188_v52  ;;  %v1049_v61 = vrot.slane %v1032_v57, %v5185_v49  ;;  %v906_v4 = vrot.slane %v861_v58, %v5185_v49 }
 0x225   : > { %v1100_v63 = vcombine.high %v1092_v59, %v4860_v0  ;;  %v1101_v1 = vcombine.high %v1099_v60, %v4860_v0  ;;  %v1050_v2 = vcombine.low %v1041_v62, %v1049_v61  ;;  %v1051_v3 = vcombine.high %v1041_v62, %v1049_v61 }
 0x226   : > { %v863_v5 = vpop.permute.xlu0 %862  ;;  %v865_v7 = vpop.permute.xlu1 %864  ;;  %v1107_v8 = vshrl.u32 %v1092_v59, 16  ;;  %v1123_v9 = vshrl.u32 %v1099_v60, 16 }
 0x227   : > { %v880_v10 = vrot.slane %v863_v5, %v5185_v49  ;;  %v914_v11 = vrot.slane %v865_v7, %v5185_v49  ;;  %v1115_v12 = vshrl.u32 %v1100_v63, 16  ;;  %v1131_v13 = vshrl.u32 %v1101_v1, 16 }
 0x228   : > { %v1058_v14 = vrot.slane %v1050_v2, %v5188_v52  ;;  %v1065_v15 = vrot.slane %v1051_v3, %v5188_v52 }
 0x229   : > { %v881_v16 = vcombine.low %v872_v6, %v880_v10  ;;  %v882_v17 = vcombine.high %v872_v6, %v880_v10  ;;  %v915_v18 = vcombine.low %v906_v4, %v914_v11  ;;  %v916_v19 = vcombine.high %v906_v4, %v914_v11 }
 0x22a   : > { %v1066_v21 = vcombine.high %v1058_v14, %v4860_v0  ;;  %v1067_v22 = vcombine.high %v1065_v15, %v4860_v0  ;;  %v1104_v23 = vpack.i.b16 %v1092_v59, %v1058_v14  ;;  %v1106_v25 = vshrl.u32 %v1058_v14, 16 }
 0x22b   : > { %v1120_v29 = vpack.i.b16 %v1099_v60, %v1065_v15  ;;  %v1122_v30 = vshrl.u32 %v1065_v15, 16  ;;  %v889_v31 = vrot.slane %v881_v16, %v5188_v52  ;;  %v896_v32 = vrot.slane %v882_v17, %v5188_v52 }
 0x22c   : > { %v1108_v33 = vpack.i.b16 %v1107_v8, %v1106_v25  ;;  %v1112_v34 = vpack.i.b16 %v1100_v63, %v1066_v21  ;;  %v1114_v35 = vshrl.u32 %v1066_v21, 16  ;;  %v1128_v36 = vpack.i.b16 %v1101_v1, %v1067_v22 }
 0x22d   : > { %v1124_v37 = vpack.i.b16 %v1123_v9, %v1122_v30  ;;  %v1130_v38 = vshrl.u32 %v1067_v22, 16  ;;  %v1134_v39 = vcombine.low %v1104_v23, %v1120_v29  ;;  %v897_v40 = vcombine.high %v889_v31, %v4860_v0 }
 0x22e   : > { %v1116_v41 = vpack.i.b16 %v1115_v12, %v1114_v35  ;;  %v1142_v42 = vcombine.low %v1112_v34, %v1128_v36  ;;  %v898_v43 = vcombine.high %v896_v32, %v4860_v0  ;;  %v937_v47 = vshrl.u32 %v889_v31, 16 }
 0x22f   : > { %v1132_v44 = vpack.i.b16 %v1131_v13, %v1130_v38  ;;  %v1141_v45 = vrot.slane %v1134_v39, %v5185_v49  ;;  %v1159_v46 = vcombine.low %v1108_v33, %v1124_v37  ;;  %v945_v48 = vshrl.u32 %v897_v40, 16 }
 0x230   : > { %v953_v50 = vshrl.u32 %v896_v32, 16  ;;  %v923_v51 = vrot.slane %v915_v18, %v5188_v52  ;;  %v930_v53 = vrot.slane %v916_v19, %v5188_v52  ;;  %v961_v55 = vshrl.u32 %v898_v43, 16 }
 0x231   : > { %v1167_v54 = vcombine.low %v1116_v41, %v1132_v44  ;;  %v1149_v56 = vrot.slane %v1142_v42, %v5185_v49  ;;  %v1166_v57 = vrot.slane %v1159_v46, %v5185_v49 }
 0x232   : > { %v931_v58 = vcombine.high %v923_v51, %v4860_v0  ;;  %v932_v59 = vcombine.high %v930_v53, %v4860_v0  ;;  %v935_v60 = vpack.i.b16 %v923_v51, %v889_v31  ;;  %v938_v61 = vshrl.u32 %v923_v51, 16 }
 0x233   : > { %v951_v62 = vpack.i.b16 %v930_v53, %v896_v32  ;;  %v954_v63 = vshrl.u32 %v930_v53, 16  ;;  %v1150_v1 = vcombine.low %v1141_v45, %v1149_v56  ;;  %v1174_v2 = vrot.slane %v1167_v54, %v5185_v49 }
 0x234   : > { %v939_v3 = vpack.i.b16 %v938_v61, %v937_v47  ;;  %v943_v4 = vpack.i.b16 %v931_v58, %v897_v40  ;;  %v946_v5 = vshrl.u32 %v931_v58, 16  ;;  %v959_v6 = vpack.i.b16 %v932_v59, %v898_v43 }
 0x235   : > { %v955_v7 = vpack.i.b16 %v954_v63, %v953_v50  ;;  %v962_v8 = vshrl.u32 %v932_v59, 16  ;;  %v965_v10 = vcombine.low %v935_v60, %v951_v62  ;;  %v1175_v12 = vcombine.low %v1166_v57, %v1174_v2  ;;  %v852_v57 = vpop.f32.mrb[0].mxu1 }
 0x236   : > { %v947_v9 = vpack.i.b16 %v946_v5, %v945_v48  ;;  %v973_v11 = vcombine.low %v943_v4, %v959_v6  ;;  %v1157_v16 = vrot.slane %v1150_v1, %v5188_v52  ;;  %v4254_v58 = vpop.f32.mrb[1].mxu1 }
 0x237   : > { %v963_v13 = vpack.i.b16 %v962_v8, %v961_v55  ;;  %v990_v14 = vcombine.low %v939_v3, %v955_v7  ;;  %v1182_v17 = vrot.slane %v1175_v12, %v5188_v52  ;;  %v972_v19 = vrot.slane %v965_v10, %v5185_v49  ;;  %v855_v59 = vpop.f32.mrb[2].mxu1 }
 0x238   : > { %v980_v15 = vrot.slane %v973_v11, %v5185_v49  ;;  %v1187_v32 = vshrl.u32 %v1157_v16, 16  ;;  %v1158_v40 = vcombine.high %v1157_v16, %v4860_v0  ;;  %v4255_v60 = vpop.f32.mrb[3].mxu1  ;;  %v5253_v8 = vsub.s32 2, %v5150_v24 }
 0x239   : > { %v998_v18 = vcombine.low %v947_v9, %v963_v13  ;;  %v1186_v21 = vpack.i.b16 %v1182_v17, %v1157_v16  ;;  %v997_v22 = vrot.slane %v990_v14, %v5185_v49  ;;  %v1188_v30 = vshrl.u32 %v1182_v17, 16 }
 0x23a   : > { %v981_v25 = vcombine.low %v972_v19, %v980_v15  ;;  %v1183_v38 = vcombine.high %v1182_v17, %v4860_v0  ;;  %v1193_v47 = vshrl.u32 %v1158_v40, 16  ;;  %v645_v10 = vrot.slane %v5158_v27, %v5253_v8 }
 0x23b   : > { %v1005_v23 = vrot.slane %v998_v18, %v5185_v49  ;;  %v1370_v29 = vsel %vm1365_vm1, %v1186_v21, 0  ;;  %v1189_v35 = vpack.i.b16 %v1188_v30, %v1187_v32 }
 0x23c   : > { %4257 = vmatpush3.bf16.xpose.msra.mxu1 %v1370_v29  ;;  %v988_v34 = vrot.slane %v981_v25, %v5188_v52  ;;  %v1192_v42 = vpack.i.b16 %v1183_v38, %v1158_v40  ;;  %v1194_v45 = vshrl.u32 %v1183_v38, 16  ;;  %v853_v15 = vadd.f32 %v852_v57, %v645_v10 }
 0x23d   : > { %v1006_v31 = vcombine.low %v997_v22, %v1005_v23  ;;  %4262 = vmatprep.subr.bf16.mxu1 %v4861_v20  ;;  %v1416_v37 = vsel %vm1365_vm1, %v1189_v35, 0 }
 0x23e   : > { %v1018_v41 = vshrl.u32 %v988_v34, 16  ;;  %v1462_v44 = vsel %vm1365_vm1, %v1192_v42, 0  ;;  %v989_v48 = vcombine.high %v988_v34, %v4860_v0  ;;  %v1195_v50 = vpack.i.b16 %v1194_v45, %v1193_v47 }
 0x23f   : > { %v1013_v33 = vrot.slane %v1006_v31, %v5188_v52  ;;  %v1196_v17 = vpack.c.bf16 %v853_v15, %v853_v15 }
 0x240   : > { %v1508_v53 = vsel %vm1365_vm1, %v1195_v50, 0  ;;  %v1024_v55 = vshrl.u32 %v989_v48, 16 }
 0x241   : > { %v1017_v36 = vpack.i.b16 %v1013_v33, %v988_v34  ;;  %v1019_v39 = vshrl.u32 %v1013_v33, 16  ;;  %v1014_v46 = vcombine.high %v1013_v33, %v4860_v0  ;;  %v1210_v58 = vrot.slane %v1196_v17, %v5185_v49 }
 0x243   : > { %4259 = vmatmul.mubr.msk.bf16.vlgmr.msra.gmra.mrb[4].mxu1 %vm1365_vm1, %v1017_v36  ;;  %v1020_v43 = vpack.i.b16 %v1019_v39, %v1018_v41  ;;  %v1023_v51 = vpack.i.b16 %v1014_v46, %v989_v48  ;;  %v1025_v54 = vshrl.u32 %v1014_v46, 16 }
 0x244   : > { %4263 = vmatpush3.bf16.xpose.msra.mxu1 %v1416_v37  ;;  %4264 = vmatprep.mubr.msk.bf16.mxu1 %vm4865_vm0, %v4861_v20 }
 0x245   : > { %4268 = vmatprep.subr.bf16.mxu1 %v4861_v20  ;;  %v1026_v56 = vpack.i.b16 %v1025_v54, %v1024_v55 }
 0x24b   : > { %4265 = vmatmul.mubr.msk.bf16.vlgmr.msra.gmra.mrb[8].mxu1 %vm1365_vm1, %v1020_v43 }
 0x24c   : > { %4269 = vmatpush3.bf16.xpose.msra.mxu1 %v1462_v44  ;;  %4270 = vmatprep.mubr.msk.bf16.mxu1 %vm4865_vm0, %v4861_v20 }
 0x24d   : > { %4274 = vmatprep.subr.bf16.mxu1 %v4861_v20 }
 0x253   : > { %4271 = vmatmul.mubr.msk.bf16.vlgmr.msra.gmra.mrb[12].mxu1 %vm1365_vm1, %v1023_v51 }
 0x254   : > { %4275 = vmatpush3.bf16.xpose.msra.mxu1 %v1508_v53  ;;  %4276 = vmatprep.mubr.msk.bf16.mxu1 %vm4865_vm0, %v4861_v20 }
 0x255   : > { %4286 = vmatprep.subr.bf16.mxu1 %v4861_v20 }
 0x25b   : > { %4277 = vmatmul.mubr.msk.bf16.vlgmr.msra.gmra.mrb[16].mxu1 %vm1365_vm1, %v1026_v56 }
 0x25c   : > { %4288 = vmatprep.mubr.msk.bf16.mxu1 %vm4865_vm0, %v4861_v20 }
 0x316   : > { %v1406_v61 = vpop.f32.mrb[4].mxu1 }
 0x317   : > { %v4260_v62 = vpop.f32.mrb[5].mxu1  ;;  %v1551_v63 = vsel %vm1550_vm2, %v1406_v61, -inf }
 0x318   : > { %1552 = vmax.xlane.f32.xlu0 %v1551_v63  ;;  %v1409_v1 = vpop.f32.mrb[6].mxu1 }
 0x319   : > { %v4261_v2 = vpop.f32.mrb[7].mxu1 }
 0x31e   : > { %v1452_v3 = vpop.f32.mrb[8].mxu1 }
 0x31f   : > { %v4266_v4 = vpop.f32.mrb[9].mxu1  ;;  %v1554_v5 = vsel %vm1550_vm2, %v1452_v3, -inf }
 0x320   : > { %1555 = vmax.xlane.f32.xlu1 %v1554_v5  ;;  %v1455_v6 = vpop.f32.mrb[10].mxu1 }
 0x321   : > { %v4267_v7 = vpop.f32.mrb[11].mxu1 }
 0x326   : > { %v1498_v9 = vpop.f32.mrb[12].mxu1 }
 0x327   : > { %v4272_v11 = vpop.f32.mrb[13].mxu1  ;;  %v1557_v12 = vsel %vm1550_vm2, %v1498_v9, -inf }
 0x328   : > { %1558 = vmax.xlane.f32.xlu0 %v1557_v12  ;;  %v1501_v13 = vpop.f32.mrb[14].mxu1 }
 0x329   : > { %v4273_v14 = vpop.f32.mrb[15].mxu1 }
 0x32e   : > { %v1544_v16 = vpop.f32.mrb[16].mxu1 }
 0x32f   : > { %v4278_v18 = vpop.f32.mrb[17].mxu1  ;;  %v1560_v19 = vsel %vm1550_vm2, %v1544_v16, -inf }
 0x330   : > { %1561 = vmax.xlane.f32.xlu0 %v1560_v19  ;;  %v1547_v21 = vpop.f32.mrb[18].mxu1 }
 0x331   : > { %1198 = vrot.lane.b32.xlu1 %v1196_v17, %s4863_s28  ;;  %v4279_v22 = vpop.f32.mrb[19].mxu1 }
 0x3a5   : > { %v1553_v23 = vpop.xlane.xlu0 %1552 }
 0x3a6   : > { %v1563_v25 = vsub.f32 %v1406_v61, %v1553_v23 }
 0x3a8   : > { %v1567_v27 = vmul.f32 1.442695, %v1563_v25 }
 0x3aa   : > { %4615 = vpow2.f32 %v1567_v27 }
 0x3ad   : > { %v1556_v29 = vpop.xlane.xlu1 %1555 }
 0x3ae   : > { %v1564_v30 = vsub.f32 %v1452_v3, %v1556_v29 }
 0x3b0   : > { %v1569_v31 = vmul.f32 1.442695, %v1564_v30 }
 0x3b1   : > { %v1199_v46 = vpop.permute.xlu1 %1198 }
 0x3b2   : > { %4617 = vpow2.f32 %v1569_v31  ;;  %v1244_v51 = vrot.slane %v1199_v46, %v5185_v49 }
 0x3b4   : > { %v5260_v32 = vpop.eup %4615 }
 0x3b5   : > { %v1575_v33 = vsel %vm1550_vm2, %v5260_v32, 0.0  ;;  %v1559_v36 = vpop.xlane.xlu0 %1558 }
 0x3b6   : > { %1576 = vadd.xlane.f32.xlu1 %v1575_v33  ;;  %v1565_v37 = vsub.f32 %v1498_v9, %v1559_v36 }
 0x3b8   : > { %v1571_v38 = vmul.f32 1.442695, %v1565_v37 }
 0x3ba   : > { %4619 = vpow2.f32 %v1571_v38 }
 0x3bc   : > { %v5264_v34 = vpop.eup %4617 }
 0x3bd   : > { %v1578_v35 = vsel %vm1550_vm2, %v5264_v34, 0.0  ;;  %v1562_v39 = vpop.xlane.xlu0 %1561 }
 0x3be   : > { %1579 = vadd.xlane.f32.xlu0 %v1578_v35  ;;  %v1566_v40 = vsub.f32 %v1544_v16, %v1562_v39 }
 0x3c0   : > { %v1573_v41 = vmul.f32 1.442695, %v1566_v40 }
 0x3c2   : > { %4621 = vpow2.f32 %v1573_v41 }
 0x3c4   : > { %v5270_v42 = vpop.eup %4619 }
 0x3c5   : > { %v1581_v43 = vsel %vm1550_vm2, %v5270_v42, 0.0 }
 0x3c7   : > { %1202 = vrot.lane.b32.xlu1 %v1196_v17, %s4862_s27 }
 0x3cc   : > { %v5274_v44 = vpop.eup %4621 }
 0x3cd   : > { %v1584_v45 = vsel %vm1550_vm2, %v5274_v44, 0.0 }
 0x3d4   : > { %1200 = vrot.lane.b32.xlu0 %v1196_v17, %s4864_s2 }
 0x3eb   : > { %1582 = vadd.xlane.f32.xlu1 %v1581_v43 }
 0x3f3   : > { %1585 = vadd.xlane.f32.xlu0 %v1584_v45 }
 0x443   : > { %v1577_v47 = vpop.xlane.xlu1 %1576 }
 0x444   : > { %4623 = vrcp.f32 %v1577_v47 }
 0x447   : > { %v1203_v48 = vpop.permute.xlu1 %1202 }
 0x448   : > { %v1252_v50 = vrot.slane %v1203_v48, %v5185_v49 }
 0x44a   : > { %v1253_v53 = vcombine.low %v1244_v51, %v1252_v50  ;;  %v1254_v55 = vcombine.high %v1244_v51, %v1252_v50 }
 0x44b   : > { %v1580_v54 = vpop.xlane.xlu0 %1579 }
 0x44c   : > { %v1261_v56 = vrot.slane %v1253_v53, %v5188_v52  ;;  %v1268_v60 = vrot.slane %v1254_v55, %v5188_v52  ;;  %4625 = vrcp.f32 %v1580_v54 }
 0x44e   : > { %v1269_v63 = vcombine.high %v1261_v56, %v4860_v0  ;;  %v1270_v3 = vcombine.high %v1268_v60, %v4860_v0  ;;  %v1276_v4 = vshrl.u32 %v1261_v56, 16  ;;  %v1292_v11 = vshrl.u32 %v1268_v60, 16  ;;  %v4624_v35 = vpop.eup %4623 }
 0x44f   : > { %v1201_v57 = vpop.permute.xlu0 %1200  ;;  %v1591_v46 = vmul.f32 %v4624_v35, %v5260_v32 }
 0x450   : > { %v1218_v59 = vrot.slane %v1201_v57, %v5185_v49  ;;  %v1284_v10 = vshrl.u32 %v1269_v63, 16  ;;  %v1300_v18 = vshrl.u32 %v1270_v3, 16 }
 0x452   : > { %v1219_v61 = vcombine.low %v1210_v58, %v1218_v59  ;;  %v1220_v62 = vcombine.high %v1210_v58, %v1218_v59 }
 0x454   : > { %v1227_v1 = vrot.slane %v1219_v61, %v5188_v52  ;;  %v1234_v2 = vrot.slane %v1220_v62, %v5188_v52 }
 0x456   : > { %v1235_v5 = vcombine.high %v1227_v1, %v4860_v0  ;;  %v1236_v6 = vcombine.high %v1234_v2, %v4860_v0  ;;  %v1273_v7 = vpack.i.b16 %v1261_v56, %v1227_v1  ;;  %v1275_v9 = vshrl.u32 %v1227_v1, 16  ;;  %v4626_v37 = vpop.eup %4625 }
 0x457   : > { %v1289_v12 = vpack.i.b16 %v1268_v60, %v1234_v2  ;;  %v1291_v13 = vshrl.u32 %v1234_v2, 16  ;;  %v1592_v53 = vmul.f32 %v4626_v37, %v5264_v34  ;;  %v1595_v60 = vpack.c.bf16 %v1591_v46, %v1591_v46 }
 0x458   : > { %v1277_v14 = vpack.i.b16 %v1276_v4, %v1275_v9  ;;  %v1281_v15 = vpack.i.b16 %v1269_v63, %v1235_v5  ;;  %v1283_v16 = vshrl.u32 %v1235_v5, 16  ;;  %v1297_v17 = vpack.i.b16 %v1270_v3, %v1236_v6  ;;  %v4527_v9 = vld [vmem:[%s5635_s3] sm:$0xff]  }
 0x459   : > { %v1293_v19 = vpack.i.b16 %v1292_v11, %v1291_v13  ;;  %v1299_v21 = vshrl.u32 %v1236_v6, 16  ;;  %v1303_v22 = vcombine.low %v1273_v7, %v1289_v12  ;;  %v1596_v62 = vpack.c.bf16 %v1592_v53, %v1592_v53  ;;  %v4531_v11 = vld [vmem:[%s5635_s3 + $0x20] sm:$0xff]   ;;  %v4532_v12 = vld [vmem:[%s5635_s3 + $0x28] sm:$0xff]  }
 0x45a   : > { %v1285_v23 = vpack.i.b16 %v1284_v10, %v1283_v16  ;;  %v1311_v25 = vcombine.low %v1281_v15, %v1297_v17  ;;  %v4530_v10 = vld [vmem:[%s5635_s3 + $0x18] sm:$0xff]  }
 0x45b   : > { %v1301_v27 = vpack.i.b16 %v1300_v18, %v1299_v21  ;;  %v1328_v29 = vcombine.low %v1277_v14, %v1293_v19  ;;  %v1310_v30 = vrot.slane %v1303_v22, %v5185_v49 }
 0x45c   : > { %v1318_v31 = vrot.slane %v1311_v25, %v5185_v49 }
 0x45d   : > { %v1336_v33 = vcombine.low %v1285_v23, %v1301_v27  ;;  %v1335_v38 = vrot.slane %v1328_v29, %v5185_v49 }
 0x45e   : > { %v1319_v36 = vcombine.low %v1310_v30, %v1318_v31 }
 0x45f   : > { %v1343_v39 = vrot.slane %v1336_v33, %v5185_v49 }
 0x460   : > { %v1326_v40 = vrot.slane %v1319_v36, %v5188_v52 }
 0x461   : > { %v1344_v41 = vcombine.low %v1335_v38, %v1343_v39 }
 0x462   : > { %v1327_v43 = vcombine.high %v1326_v40, %v4860_v0  ;;  %v1356_v48 = vshrl.u32 %v1326_v40, 16 }
 0x463   : > { %v1351_v45 = vrot.slane %v1344_v41, %v5188_v52 }
 0x464   : > { %v1362_v54 = vshrl.u32 %v1327_v43, 16 }
 0x465   : > { %v1355_v47 = vpack.i.b16 %v1351_v45, %v1326_v40  ;;  %v1357_v50 = vshrl.u32 %v1351_v45, 16  ;;  %v1352_v51 = vcombine.high %v1351_v45, %v4860_v0 }
 0x467   : > { %v1604_v55 = vsel %vm1602_vm3, %v1355_v47, 0  ;;  %v1358_v56 = vpack.i.b16 %v1357_v50, %v1356_v48  ;;  %v1361_v57 = vpack.i.b16 %v1352_v51, %v1327_v43  ;;  %v1363_v58 = vshrl.u32 %v1352_v51, 16  ;;  %v4533_v50 = vld [vmem:[%s5635_s3 + $0x30] sm:$0xff]  }
 0x468   : > { %4281 = vmatpush3.bf16.msra.mxu0 %v1604_v55 }
 0x469   : > { %v1650_v59 = vsel %vm1602_vm3, %v1358_v56, 0  ;;  %4292 = vmatprep.subr.bf16.mxu0 %v4861_v20  ;;  %v1364_v32 = vpack.i.b16 %v1363_v58, %v1362_v54  ;;  %v1696_v61 = vsel %vm1602_vm3, %v1361_v57, 0 }
 0x46a   : > { %4287 = vmatpush3.bf16.msra.mxu1 %v1650_v59 }
 0x46b   : > { %4283 = vmatmul.mubr.msk.bf16.vlgmr.msra.gmra.mrb[4].mxu0 %vm1550_vm2, %v1595_v60  ;;  %4298 = vmatprep.subr.bf16.mxu1 %v4861_v20  ;;  %v1742_v34 = vsel %vm1602_vm3, %v1364_v32, 0 }
 0x46c   : > { %4293 = vmatpush3.bf16.msra.mxu0 %v1696_v61  ;;  %4294 = vmatprep.mubr.msk.bf16.mxu0 %vm4865_vm0, %v4861_v20 }
 0x46d   : > { %4289 = vmatmul.mubr.msk.bf16.vlgmr.msra.gmra.mrb[20].mxu1 %vm1550_vm2, %v1596_v62  ;;  %4304 = vmatprep.subr.bf16.mxu0 %v4861_v20 }
 0x46e   : > { %4299 = vmatpush3.bf16.msra.mxu1 %v1742_v34  ;;  %4300 = vmatprep.mubr.msk.bf16.mxu1 %vm4865_vm0, %v4861_v20  ;;  %v4534_v34 = vld [vmem:[%s5635_s3 + $0x38] sm:$0xff]  }
 0x46f   : > { %4324 = vmatprep.subr.bf16.mxu1 %v4861_v20 }
 0x478   : > { %v1583_v63 = vpop.xlane.xlu1 %1582 }
 0x479   : > { %4627 = vrcp.f32 %v1583_v63 }
 0x480   : > { %v1586_v1 = vpop.xlane.xlu0 %1585 }
 0x481   : > { %4629 = vrcp.f32 %v1586_v1 }
 0x483   : > { %v4628_v2 = vpop.eup %4627 }
 0x484   : > { %v1593_v3 = vmul.f32 %v4628_v2, %v5270_v42  ;;  %v4528_v42 = vld [vmem:[%s5635_s3 + $0x8] sm:$0xff]  }
 0x486   : > { %v1597_v4 = vpack.c.bf16 %v1593_v3, %v1593_v3 }
 0x488   : > { %4295 = vmatmul.mubr.msk.bf16.vlgmr.msra.gmra.mrb[8].mxu0 %vm1550_vm2, %v1597_v4 }
 0x489   : > { %4320 = vmatprep.mubr.msk.bf16.mxu0 %vm4865_vm0, %v4861_v20  ;;  %4305 = vmatpush3.bf16.msra.mxu0 %v4527_v9 }
 0x48a   : > { %4306 = vmatprep.subr.bf16.mxu0 %v4861_v20 }
 0x48b   : > { %v4630_v5 = vpop.eup %4629 }
 0x48c   : > { %v1594_v6 = vmul.f32 %v4630_v5, %v5274_v44  ;;  %v4529_v44 = vld [vmem:[%s5635_s3 + $0x10] sm:$0xff]  }
 0x48d   : > { %4307 = vmatpush3.bf16.msra.mxu0 %v4528_v42 }
 0x48e   : > { %v1598_v7 = vpack.c.bf16 %v1594_v6, %v1594_v6  ;;  %4308 = vmatprep.subr.bf16.mxu0 %v4861_v20 }
 0x490   : > { %4301 = vmatmul.mubr.msk.bf16.vlgmr.msra.gmra.mrb[24].mxu1 %vm1550_vm2, %v1598_v7 }
 0x491   : > { %4340 = vmatprep.mubr.msk.bf16.mxu1 %vm4865_vm0, %v4861_v20  ;;  %4309 = vmatpush3.bf16.msra.mxu0 %v4529_v44 }
 0x492   : > { %4310 = vmatprep.subr.bf16.mxu0 %v4861_v20 }
 0x495   : > { %4311 = vmatpush3.bf16.msra.mxu0 %v4530_v10 }
 0x496   : > { %4312 = vmatprep.subr.bf16.mxu0 %v4861_v20 }
 0x499   : > { %4313 = vmatpush3.bf16.msra.mxu0 %v4531_v11 }
 0x49a   : > { %4314 = vmatprep.subr.bf16.mxu0 %v4861_v20 }
 0x49d   : > { %4315 = vmatpush3.bf16.msra.mxu0 %v4532_v12 }
 0x49e   : > { %4316 = vmatprep.subr.bf16.mxu0 %v4861_v20 }
 0x4a1   : > { %4317 = vmatpush3.bf16.msra.mxu0 %v4533_v50  ;;  %v4555_v50 = vld [vmem:[#allocation6 + $0x64] ss:$8 sps:$4 sm:$0xff]  }
 0x4a2   : > { %4318 = vmatprep.subr.bf16.mxu0 %v4861_v20 }
 0x4a5   : > { %4319 = vmatpush3.bf16.msra.mxu0 %v4534_v34  ;;  %v4564_v34 = vld [vmem:[#allocation4 + $0x28] sm:$0xff]  }
 0x53e   : > { %v1640_v13 = vpop.f32.mrb[4].mxu0 }
 0x53f   : > { %v4284_v14 = vpop.f32.mrb[5].mxu0 }
 0x540   : > { %v1643_v15 = vpop.f32.mrb[6].mxu0  ;;  %v1686_v16 = vpop.f32.mrb[20].mxu1 }
 0x541   : > { %v4285_v17 = vpop.f32.mrb[7].mxu0  ;;  %v4290_v18 = vpop.f32.mrb[21].mxu1 }
 0x542   : > { %v1689_v19 = vpop.f32.mrb[22].mxu1  ;;  %v5379_v18 = vld [vmem:[%s5644_s12] sm:$0xf] }
 0x543   : > { %v4291_v21 = vpop.f32.mrb[23].mxu1  ;;  %v1957_v19 = vrot.slane %v5379_v18, %v5161_v28 }
 0x55b   : > { %v1732_v22 = vpop.f32.mrb[8].mxu0 }
 0x55c   : > { %v1784_v23 = vcombine.low %v1640_v13, %v1732_v22  ;;  %v1785_v25 = vcombine.high %v1640_v13, %v1732_v22  ;;  %v4296_v27 = vpop.f32.mrb[9].mxu0 }
 0x55d   : > { %v1735_v29 = vpop.f32.mrb[10].mxu0 }
 0x55e   : > { %v4297_v30 = vpop.f32.mrb[11].mxu0  ;;  %v1792_v38 = vrot.slane %v1784_v23, %v5185_v49  ;;  %v1799_v39 = vrot.slane %v1785_v25, %v5185_v49  ;;  %v4653_v29 = vld [vmem:[%s5142_s16] sm:$0xff] }
 0x563   : > { %v1778_v31 = vpop.f32.mrb[24].mxu1 }
 0x564   : > { %v1800_v33 = vcombine.low %v1686_v16, %v1778_v31  ;;  %v1801_v35 = vcombine.high %v1686_v16, %v1778_v31  ;;  %v4302_v36 = vpop.f32.mrb[25].mxu1  ;;  %v4535_v31 = vld [vmem:[#allocation6] ss:$8 sps:$4 sm:$0xff]  }
 0x565   : > { %v1781_v37 = vpop.f32.mrb[26].mxu1  ;;  %v4538_v36 = vld [vmem:[#allocation6 + $0x10] ss:$8 sps:$4 sm:$0xff]  }
 0x566   : > { %v1808_v40 = vrot.slane %v1800_v33, %v5185_v49  ;;  %v1815_v41 = vrot.slane %v1801_v35, %v5185_v49  ;;  %v4303_v43 = vpop.f32.mrb[27].mxu1  ;;  %v4537_v33 = vld [vmem:[#allocation6 + $0x4] ss:$8 sps:$4 sm:$0xff]   ;;  %v4540_v35 = vld [vmem:[#allocation6 + $0x14] ss:$8 sps:$4 sm:$0xff]  }
 0x567   : > { %2288 = vmatprep.subr.bf16.mxu0 %v4537_v33  ;;  %v4543_v37 = vld [vmem:[#allocation6 + $0x24] ss:$8 sps:$4 sm:$0xff]   ;;  %v4544_v43 = vld [vmem:[#allocation6 + $0x30] ss:$8 sps:$4 sm:$0xff]  }
 0x568   : > { %v1816_v45 = vcombine.low %v1792_v38, %v1808_v40  ;;  %v1817_v46 = vcombine.high %v1792_v38, %v1808_v40  ;;  %v1832_v47 = vcombine.low %v1799_v39, %v1815_v41  ;;  %v1833_v48 = vcombine.high %v1799_v39, %v1815_v41  ;;  %v4559_v38 = vld [vmem:[#allocation4] sm:$0xff]   ;;  %v4560_v40 = vld [vmem:[#allocation4 + $0x8] sm:$0xff]   ;;  %v4546_v41 = vld [vmem:[#allocation6 + $0x34] ss:$8 sps:$4 sm:$0xff]  }
 0x569   : > { %v4541_v39 = vld [vmem:[#allocation6 + $0x20] ss:$8 sps:$4 sm:$0xff]   ;;  %4325 = vmatpush3.bf16.msra.mxu1 %v4559_v38 }
 0x56a   : > { %v1824_v51 = vrot.slane %v1816_v45, %v5188_v52  ;;  %v1831_v53 = vrot.slane %v1817_v46, %v5188_v52  ;;  %v1840_v54 = vrot.slane %v1832_v47, %v5188_v52  ;;  %v1847_v55 = vrot.slane %v1833_v48, %v5188_v52  ;;  %4326 = vmatprep.subr.bf16.mxu1 %v4861_v20  ;;  %v4549_v45 = vld [vmem:[#allocation6 + $0x44] ss:$8 sps:$4 sm:$0xff]   ;;  %v4547_v46 = vld [vmem:[#allocation6 + $0x40] ss:$8 sps:$4 sm:$0xff]   ;;  %v4552_v47 = vld [vmem:[#allocation6 + $0x54] ss:$8 sps:$4 sm:$0xff]  }
 0x56b   : > { %v4550_v48 = vld [vmem:[#allocation6 + $0x50] ss:$8 sps:$4 sm:$0xff]  }
 0x56c   : > { %v1852_v56 = vcombine.low %v1824_v51, %v1831_v53  ;;  %v4060_v57 = vcombine.high %v1824_v51, %v1831_v53  ;;  %v1868_v58 = vcombine.low %v1840_v54, %v1847_v55  ;;  %v4061_v59 = vcombine.high %v1840_v54, %v1847_v55  ;;  %v4553_v51 = vld [vmem:[#allocation6 + $0x60] ss:$8 sps:$4 sm:$0xff]   ;;  %v4558_v53 = vld [vmem:[#allocation6 + $0x74] ss:$8 sps:$4 sm:$0xff]   ;;  %v4556_v54 = vld [vmem:[#allocation6 + $0x70] ss:$8 sps:$4 sm:$0xff]  }
 0x56d   : > { %4327 = vmatpush3.bf16.msra.mxu1 %v4560_v40  ;;  %v2178_v55 = vld [vmem:[%s590_s22] sm:$0xff] }
 0x56e   : > { %v1859_v60 = vrot.slane %v1852_v56, %v5185_v49  ;;  %v1867_v32 = vrot.slane %v4060_v57, %v5185_v49  ;;  %v1875_v61 = vrot.slane %v1868_v58, %v5185_v49  ;;  %v1883_v62 = vrot.slane %v4061_v59, %v5185_v49  ;;  %4328 = vmatprep.subr.bf16.mxu1 %v4861_v20 }
 0x56f   : > { %v2179_v56 = vpack.c.bf16 %v2178_v55, %v2178_v55 }
 0x570   : > { %v1885_v63 = vcombine.high %v1859_v60, %v1867_v32  ;;  %v1901_v1 = vcombine.high %v1875_v61, %v1883_v62  ;;  %v1884_v2 = vcombine.low %v1859_v60, %v1867_v32  ;;  %v1900_v3 = vcombine.low %v1875_v61, %v1883_v62  ;;  %v4561_v32 = vld [vmem:[#allocation4 + $0x10] sm:$0xff]   ;;  %v4562_v61 = vld [vmem:[#allocation4 + $0x18] sm:$0xff]   ;;  %v4563_v62 = vld [vmem:[#allocation4 + $0x20] sm:$0xff]  }
 0x571   : > { %4329 = vmatpush3.bf16.msra.mxu1 %v4561_v32 }
 0x572   : > { %v1899_v4 = vrot.slane %v1885_v63, %v5188_v52  ;;  %v1915_v5 = vrot.slane %v1901_v1, %v5188_v52  ;;  %v1892_v6 = vrot.slane %v1884_v2, %v5188_v52  ;;  %v1908_v7 = vrot.slane %v1900_v3, %v5188_v52  ;;  %4330 = vmatprep.subr.bf16.mxu1 %v4861_v20  ;;  %v4565_v63 = vld [vmem:[#allocation4 + $0x30] sm:$0xff]   ;;  %v4566_v1 = vld [vmem:[#allocation4 + $0x38] sm:$0xff]  }
 0x573   : > { %v5402_v2 = vld [vmem:[%s5642_s10] sm:$0x3] }
 0x574   : > { %v1918_v9 = vcombine.low %v1899_v4, %v1915_v5  ;;  %v1917_v42 = vcombine.high %v1892_v6, %v1908_v7  ;;  %v1919_v44 = vcombine.high %v1899_v4, %v1915_v5  ;;  %v1916_v10 = vcombine.low %v1892_v6, %v1908_v7 }
 0x575   : > { %4331 = vmatpush3.bf16.msra.mxu1 %v4562_v61  ;;  %v2201_v3 = vrot.slane %v5402_v2, %v5161_v28 }
 0x576   : > { %1925 = vrot.lane.b32.xlu1 %v1918_v9, %s4864_s2  ;;  %1921 = vrot.lane.b32.xlu0 %v1917_v42, %s4862_s27 }
 0x577   : > { %4332 = vmatprep.subr.bf16.mxu1 %v4861_v20 }
 0x579   : > { %4333 = vmatpush3.bf16.msra.mxu1 %v4563_v62 }
 0x57a   : > { %1929 = vrot.lane.b32.xlu1 %v1919_v44, %s4863_s28  ;;  %4334 = vmatprep.subr.bf16.mxu1 %v4861_v20 }
 0x57d   : > { %4335 = vmatpush3.bf16.msra.mxu1 %v4564_v34 }
 0x57e   : > { %4336 = vmatprep.subr.bf16.mxu1 %v4861_v20 }
 0x581   : > { %4337 = vmatpush3.bf16.msra.mxu1 %v4565_v63 }
 0x582   : > { %4338 = vmatprep.subr.bf16.mxu1 %v4861_v20 }
 0x585   : > { %4339 = vmatpush3.bf16.msra.mxu1 %v4566_v1 }
 0x586   : > { %4344 = vmatprep.subr.bf16.mxu1 %v4861_v20 }
 0x5e8   : > { %v1926_v11 = vpop.permute.xlu1 %1925  ;;  %v1922_v12 = vpop.permute.xlu0 %1921 }
 0x5e9   : > { %v1932_v13 = vsel %vm1365_vm1, %v1916_v10, %v1922_v12  ;;  %v5414_v12 = vld [vmem:[%s5645_s13] sm:$0x3f] }
 0x5ea   : > { %v1934_v15 = vsel %vm1933_vm4, %v1932_v13, %v1926_v11  ;;  %v2062_v13 = vrot.slane %v5414_v12, %v5161_v28 }
 0x5ec   : > { %v1930_v14 = vpop.permute.xlu1 %1929 }
 0x5ed   : > { %v1936_v16 = vsel %vm1935_vm5, %v1934_v15, %v1930_v14 }
 0x5ee   : > { %v1937_v17 = vpack.c.bf16 %v1936_v16, %v1936_v16  ;;  %v2067_v16 = vrot.slane %v5414_v12, %v5153_v26 }
 0x5f0   : > { %4321 = vmatmul.mubr.bf16.vlgmr.msra.gmra.mrb[12].mxu0 %v1937_v17 }
 0x5f1   : > { %2320 = vmatprep.mubr.bf16.mxu0 %v4860_v0  ;;  %2289 = vmatpush1.bf16.msra.mxu0 %v4535_v31 }
 0x5f2   : > { %2290 = vmatprep.subr.bf16.mxu0 %v4540_v35 }
 0x5f5   : > { %2291 = vmatpush1.bf16.msra.mxu0 %v4538_v36 }
 0x5f6   : > { %2292 = vmatprep.subr.bf16.mxu0 %v4543_v37 }
 0x5f9   : > { %2293 = vmatpush1.bf16.msra.mxu0 %v4541_v39 }
 0x5fa   : > { %2294 = vmatprep.subr.bf16.mxu0 %v4546_v41 }
 0x5fd   : > { %2295 = vmatpush1.bf16.msra.mxu0 %v4544_v43 }
 0x5fe   : > { %2296 = vmatprep.subr.bf16.mxu0 %v4549_v45 }
 0x601   : > { %2297 = vmatpush1.bf16.msra.mxu0 %v4547_v46 }
 0x602   : > { %2298 = vmatprep.subr.bf16.mxu0 %v4552_v47 }
 0x605   : > { %2299 = vmatpush1.bf16.msra.mxu0 %v4550_v48 }
 0x606   : > { %2300 = vmatprep.subr.bf16.mxu0 %v4555_v50 }
 0x609   : > { %2301 = vmatpush1.bf16.msra.mxu0 %v4553_v51 }
 0x60a   : > { %2302 = vmatprep.subr.bf16.mxu0 %v4558_v53 }
 0x60d   : > { %2303 = vmatpush1.bf16.msra.mxu0 %v4556_v54 }
 0x60e   : > { %4368 = vmatprep.subr.bf16.mxu0 %v4861_v20 }
 0x610   : > { %2321 = vmatmul.mubr.bf16.vlgmr.msra.gmra.mrb[16].mxu0 %v2179_v56 }
 0x611   : > { %4370 = vmatprep.mubr.msk.bf16.mxu0 %vm4865_vm0, %v4861_v20 }
 0x6c3   : > { %v2040_v21 = vpop.f32.mrb[12].mxu0 }
 0x6c4   : > { %v2041_v22 = vadd.f32 %v2040_v21, %v1957_v19  ;;  %v4322_v23 = vpop.f32.mrb[13].mxu0 }
 0x6c5   : > { %v2043_v25 = vpop.f32.mrb[14].mxu0 }
 0x6c6   : > { %v4323_v27 = vpop.f32.mrb[15].mxu0  ;;  %v2046_v30 = vadd.f32 %v4653_v29, %v2041_v22 }
 0x6c8   : > { %2047 = vadd.xlane.f32.xlu0 %v2046_v30 }
 0x6e3   : > { %v2322_v4 = vpop.f32.mrb[16].mxu0 }
 0x6e4   : > { %v2323_v5 = vadd.f32 %v2322_v4, %v2201_v3  ;;  %v5406_v6 = vpop.f32.mrb[17].mxu0 }
 0x6e5   : > { %v2326_v7 = vpop.f32.mrb[18].mxu0 }
 0x6e6   : > { %v2498_v9 = vpack.c.bf16 %v2323_v5, %v2323_v5  ;;  %v2327_v42 = vpop.f32.mrb[19].mxu0 }
 0x6e8   : > { %2500 = vrot.lane.b32.xlu0 %v2498_v9, %s4863_s28  ;;  %v2512_v22 = vrot.slane %v2498_v9, %v5185_v49 }
 0x6ec   : > { %2504 = vrot.lane.b32.xlu0 %v2498_v9, %s4862_s27 }
 0x755   : > { %v2048_v57 = vpop.xlane.xlu0 %2047 }
 0x756   : > { %v2050_v58 = vmul.f32 0.0078125, %v2048_v57 }
 0x758   : > { %v2051_v59 = vsub.f32 %v2046_v30, %v2050_v58 }
 0x75a   : > { %v2052_v60 = vmul.f32 %v2051_v59, %v2051_v59  ;;  %v2501_v23 = vpop.permute.xlu0 %2500 }
 0x75b   : > { %v2546_v31 = vrot.slane %v2501_v23, %v5185_v49 }
 0x75c   : > { %2053 = vadd.xlane.f32.xlu1 %v2052_v60 }
 0x75e   : > { %v2505_v33 = vpop.permute.xlu0 %2504 }
 0x75f   : > { %v2554_v37 = vrot.slane %v2505_v33, %v5185_v49  ;;  %v2089_v33 = vrot.slane %v5379_v18, %v5153_v26 }
 0x761   : > { %v2555_v39 = vcombine.low %v2546_v31, %v2554_v37  ;;  %v2556_v40 = vcombine.high %v2546_v31, %v2554_v37 }
 0x763   : > { %v2563_v45 = vrot.slane %v2555_v39, %v5188_v52  ;;  %v2570_v46 = vrot.slane %v2556_v40, %v5188_v52 }
 0x765   : > { %v2571_v50 = vcombine.high %v2563_v45, %v4860_v0  ;;  %v2572_v51 = vcombine.high %v2570_v46, %v4860_v0  ;;  %v2578_v54 = vshrl.u32 %v2563_v45, 16  ;;  %v2594_v57 = vshrl.u32 %v2570_v46, 16 }
 0x767   : > { %v2586_v60 = vshrl.u32 %v2571_v50, 16  ;;  %v2602_v62 = vshrl.u32 %v2572_v51, 16 }
 0x76d   : > { %2502 = vrot.lane.b32.xlu1 %v2498_v9, %s4864_s2 }
 0x7e9   : > { %v2054_v44 = vpop.xlane.xlu1 %2053 }
 0x7ea   : > { %v2055_v10 = vmul.f32 0.0078125, %v2054_v44 }
 0x7ec   : > { %v2056_v11 = vadd.f32 1e-05, %v2055_v10 }
 0x7ed   : > { %v2503_v25 = vpop.permute.xlu1 %2502 }
 0x7ee   : > { %4631 = vrsqrt.f32 %v2056_v11  ;;  %v2520_v27 = vrot.slane %v2503_v25, %v5185_v49 }
 0x7f0   : > { %v2521_v29 = vcombine.low %v2512_v22, %v2520_v27  ;;  %v2522_v30 = vcombine.high %v2512_v22, %v2520_v27 }
 0x7f2   : > { %v2529_v35 = vrot.slane %v2521_v29, %v5188_v52  ;;  %v2536_v36 = vrot.slane %v2522_v30, %v5188_v52 }
 0x7f4   : > { %v2537_v38 = vcombine.high %v2529_v35, %v4860_v0  ;;  %v2538_v41 = vcombine.high %v2536_v36, %v4860_v0  ;;  %v2577_v43 = vshrl.u32 %v2529_v35, 16  ;;  %v2593_v48 = vshrl.u32 %v2536_v36, 16 }
 0x7f5   : > { %v2575_v53 = vpack.i.b16 %v2563_v45, %v2529_v35  ;;  %v2591_v56 = vpack.i.b16 %v2570_v46, %v2536_v36 }
 0x7f6   : > { %v2585_v47 = vshrl.u32 %v2537_v38, 16  ;;  %v2601_v55 = vshrl.u32 %v2538_v41, 16  ;;  %v2579_v58 = vpack.i.b16 %v2578_v54, %v2577_v43  ;;  %v2599_v32 = vpack.i.b16 %v2572_v51, %v2538_v41 }
 0x7f7   : > { %v2595_v61 = vpack.i.b16 %v2594_v57, %v2593_v48  ;;  %v2605_v34 = vcombine.low %v2575_v53, %v2591_v56 }
 0x7f8   : > { %v4632_v14 = vpop.eup %4631  ;;  %v2587_v63 = vpack.i.b16 %v2586_v60, %v2585_v47  ;;  %v2603_v1 = vpack.i.b16 %v2602_v62, %v2601_v55 }
 0x7f9   : > { %v2058_v15 = vmul.f32 %v4632_v14, %v2051_v59  ;;  %v2583_v59 = vpack.i.b16 %v2571_v50, %v2537_v38  ;;  %v2630_v4 = vcombine.low %v2579_v58, %v2595_v61  ;;  %v2612_v5 = vrot.slane %v2605_v34, %v5185_v49 }
 0x7fa   : > { %v2638_v7 = vcombine.low %v2587_v63, %v2603_v1 }
 0x7fb   : > { %v2063_v17 = vmul.f32 %v2062_v13, %v2058_v15  ;;  %v2613_v3 = vcombine.low %v2583_v59, %v2599_v32  ;;  %v2637_v42 = vrot.slane %v2630_v4, %v5185_v49 }
 0x7fc   : > { %v2645_v44 = vrot.slane %v2638_v7, %v5185_v49 }
 0x7fd   : > { %v5420_v19 = vadd.f32 %v2067_v16, %v2063_v17  ;;  %v2620_v9 = vrot.slane %v2613_v3, %v5185_v49 }
 0x7fe   : > { %v2646_v11 = vcombine.low %v2637_v42, %v2645_v44 }
 0x7ff   : > { %v2069_v21 = vpack.c.bf16 %v5420_v19, %v5420_v19  ;;  %v2621_v10 = vcombine.low %v2612_v5, %v2620_v9 }
 0x800   : > { %v2653_v14 = vrot.slane %v2646_v11, %v5188_v52 }
 0x801   : > { %4341 = vmatmul.mubr.bf16.vlgmr.msra.gmra.mrb[28].mxu1 %v2069_v21  ;;  %v2628_v13 = vrot.slane %v2621_v10, %v5188_v52 }
 0x802   : > { %4346 = vmatprep.mubr.msk.bf16.mxu1 %vm4865_vm0, %v4861_v20  ;;  %v2659_v17 = vshrl.u32 %v2653_v14, 16  ;;  %v5448_v22 = vcombine.high %v2653_v14, %v4860_v0 }
 0x803   : > { %v2657_v15 = vpack.i.b16 %v2653_v14, %v2628_v13  ;;  %v2658_v16 = vshrl.u32 %v2628_v13, 16  ;;  %v5445_v21 = vcombine.high %v2628_v13, %v4860_v0 }
 0x804   : > { %v2665_v30 = vshrl.u32 %v5448_v22, 16 }
 0x805   : > { %v2840_v23 = vsel %vm1365_vm1, %v2657_v15, 0  ;;  %v5451_v25 = vpack.i.b16 %v2659_v17, %v2658_v16  ;;  %v2663_v27 = vpack.i.b16 %v5448_v22, %v5445_v21  ;;  %v2664_v29 = vshrl.u32 %v5445_v21, 16 }
 0x806   : > { %4345 = vmatpush3.bf16.xpose.msra.mxu1 %v2840_v23 }
 0x807   : > { %4350 = vmatprep.subr.bf16.mxu1 %v4861_v20  ;;  %v5458_v31 = vpack.i.b16 %v2665_v30, %v2664_v29 }
 0x8d4   : > { %v2172_v35 = vpop.f32.mrb[28].mxu1 }
 0x8d5   : > { %v2173_v36 = vadd.f32 %v2172_v35, %v2089_v33  ;;  %v4342_v37 = vpop.f32.mrb[29].mxu1 }
 0x8d6   : > { %v2175_v38 = vpop.f32.mrb[30].mxu1 }
 0x8d7   : > { %v2329_v39 = vpack.c.bf16 %v2173_v36, %v2173_v36  ;;  %v4343_v40 = vpop.f32.mrb[31].mxu1 }
 0x8d9   : > { %2333 = vrot.lane.b32.xlu0 %v2329_v39, %s4864_s2  ;;  %2331 = vrot.lane.b32.xlu1 %v2329_v39, %s4863_s28  ;;  %v2343_v45 = vrot.slane %v2329_v39, %v5185_v49 }
 0x8dd   : > { %2335 = vrot.lane.b32.xlu1 %v2329_v39, %s4862_s27 }
 0x94b   : > { %v2334_v41 = vpop.permute.xlu0 %2333  ;;  %v2332_v43 = vpop.permute.xlu1 %2331 }
 0x94c   : > { %v2351_v46 = vrot.slane %v2334_v41, %v5185_v49  ;;  %v2377_v54 = vrot.slane %v2332_v43, %v5185_v49 }
 0x94e   : > { %v2352_v47 = vcombine.low %v2343_v45, %v2351_v46  ;;  %v2353_v48 = vcombine.high %v2343_v45, %v2351_v46  ;;  %v2886_v45 = vsel %vm1365_vm1, %v5451_v25, 0 }
 0x94f   : > { %v2336_v50 = vpop.permute.xlu1 %2335 }
 0x950   : > { %v2360_v51 = vrot.slane %v2352_v47, %v5188_v52  ;;  %v2385_v53 = vrot.slane %v2336_v50, %v5185_v49  ;;  %v2367_v55 = vrot.slane %v2353_v48, %v5188_v52  ;;  %v2932_v50 = vsel %vm1365_vm1, %v2663_v27, 0 }
 0x952   : > { %v2386_v56 = vcombine.low %v2377_v54, %v2385_v53  ;;  %v2387_v57 = vcombine.high %v2377_v54, %v2385_v53  ;;  %v2368_v58 = vcombine.high %v2360_v51, %v4860_v0  ;;  %v2369_v32 = vcombine.high %v2367_v55, %v4860_v0 }
 0x953   : > { %v2408_v61 = vshrl.u32 %v2360_v51, 16  ;;  %v2424_v4 = vshrl.u32 %v2367_v55, 16  ;;  %v2978_v54 = vsel %vm1365_vm1, %v5458_v31, 0 }
 0x954   : > { %v2394_v59 = vrot.slane %v2386_v56, %v5188_v52  ;;  %v2401_v60 = vrot.slane %v2387_v57, %v5188_v52  ;;  %v2416_v3 = vshrl.u32 %v2368_v58, 16  ;;  %v2432_v11 = vshrl.u32 %v2369_v32, 16 }
 0x956   : > { %v2402_v62 = vcombine.high %v2394_v59, %v4860_v0  ;;  %v2403_v34 = vcombine.high %v2401_v60, %v4860_v0  ;;  %v2406_v63 = vpack.i.b16 %v2394_v59, %v2360_v51  ;;  %v2409_v1 = vshrl.u32 %v2394_v59, 16 }
 0x957   : > { %v2422_v5 = vpack.i.b16 %v2401_v60, %v2367_v55  ;;  %v2425_v7 = vshrl.u32 %v2401_v60, 16 }
 0x958   : > { %v2410_v9 = vpack.i.b16 %v2409_v1, %v2408_v61  ;;  %v2414_v42 = vpack.i.b16 %v2402_v62, %v2368_v58  ;;  %v2417_v44 = vshrl.u32 %v2402_v62, 16  ;;  %v2430_v10 = vpack.i.b16 %v2403_v34, %v2369_v32 }
 0x959   : > { %v2426_v13 = vpack.i.b16 %v2425_v7, %v2424_v4  ;;  %v2433_v14 = vshrl.u32 %v2403_v34, 16  ;;  %v2436_v15 = vcombine.low %v2406_v63, %v2422_v5  ;;  %v2205_v63 = vrot.slane %v5402_v2, %v5153_v26 }
 0x95a   : > { %v2418_v16 = vpack.i.b16 %v2417_v44, %v2416_v3  ;;  %v2444_v17 = vcombine.low %v2414_v42, %v2430_v10 }
 0x95b   : > { %v2434_v23 = vpack.i.b16 %v2433_v14, %v2432_v11  ;;  %v2461_v29 = vcombine.low %v2410_v9, %v2426_v13  ;;  %v2443_v33 = vrot.slane %v2436_v15, %v5185_v49  ;;  %v2325_v7 = vadd.f32 %v5406_v6, %v2205_v63 }
 0x95c   : > { %v2451_v30 = vrot.slane %v2444_v17, %v5185_v49 }
 0x95d   : > { %v2469_v35 = vcombine.low %v2418_v16, %v2434_v23  ;;  %v2468_v37 = vrot.slane %v2461_v29, %v5185_v49  ;;  %v2667_v42 = vpack.c.bf16 %v2325_v7, %v2325_v7 }
 0x95e   : > { %v2452_v36 = vcombine.low %v2443_v33, %v2451_v30 }
 0x95f   : > { %v2476_v38 = vrot.slane %v2469_v35, %v5185_v49 }
 0x960   : > { %v2459_v40 = vrot.slane %v2452_v36, %v5188_v52 }
 0x961   : > { %v2477_v39 = vcombine.low %v2468_v37, %v2476_v38 }
 0x962   : > { %v2489_v47 = vshrl.u32 %v2459_v40, 16  ;;  %v2460_v51 = vcombine.high %v2459_v40, %v4860_v0 }
 0x963   : > { %v2484_v41 = vrot.slane %v2477_v39, %v5188_v52 }
 0x964   : > { %v2495_v22 = vshrl.u32 %v2460_v51, 16 }
 0x965   : > { %v2488_v43 = vpack.i.b16 %v2484_v41, %v2459_v40  ;;  %v2490_v46 = vshrl.u32 %v2484_v41, 16  ;;  %v2485_v25 = vcombine.high %v2484_v41, %v4860_v0 }
 0x967   : > { %4347 = vmatmul.mubr.msk.bf16.vlgmr.msra.gmra.mrb[32].mxu1 %vm1365_vm1, %v2488_v43  ;;  %v2491_v48 = vpack.i.b16 %v2490_v46, %v2489_v47  ;;  %v2494_v53 = vpack.i.b16 %v2485_v25, %v2460_v51  ;;  %v2496_v21 = vshrl.u32 %v2485_v25, 16 }
 0x968   : > { %4351 = vmatpush3.bf16.xpose.msra.mxu1 %v2886_v45  ;;  %4352 = vmatprep.mubr.msk.bf16.mxu1 %vm4865_vm0, %v4861_v20 }
 0x969   : > { %4356 = vmatprep.subr.bf16.mxu1 %v4861_v20  ;;  %v2497_v27 = vpack.i.b16 %v2496_v21, %v2495_v22 }
 0x96f   : > { %4353 = vmatmul.mubr.msk.bf16.vlgmr.msra.gmra.mrb[36].mxu1 %vm1365_vm1, %v2491_v48 }
 0x970   : > { %4357 = vmatpush3.bf16.xpose.msra.mxu1 %v2932_v50  ;;  %4358 = vmatprep.mubr.msk.bf16.mxu1 %vm4865_vm0, %v4861_v20 }
 0x971   : > { %4362 = vmatprep.subr.bf16.mxu1 %v4861_v20 }
 0x977   : > { %4359 = vmatmul.mubr.msk.bf16.vlgmr.msra.gmra.mrb[40].mxu1 %vm1365_vm1, %v2494_v53 }
 0x978   : > { %4363 = vmatpush3.bf16.xpose.msra.mxu1 %v2978_v54  ;;  %4364 = vmatprep.mubr.msk.bf16.mxu1 %vm4865_vm0, %v4861_v20 }
 0x979   : > { %4374 = vmatprep.subr.bf16.mxu1 %v4861_v20 }
 0x97f   : > { %4365 = vmatmul.mubr.msk.bf16.vlgmr.msra.gmra.mrb[44].mxu1 %vm1365_vm1, %v2497_v27 }
 0x980   : > { %4376 = vmatprep.mubr.msk.bf16.mxu1 %vm4865_vm0, %v4861_v20 }
 0xa3a   : > { %v2876_v55 = vpop.f32.mrb[32].mxu1 }
 0xa3b   : > { %v4348_v56 = vpop.f32.mrb[33].mxu1  ;;  %v3020_v57 = vsel %vm1550_vm2, %v2876_v55, -inf }
 0xa3c   : > { %3021 = vmax.xlane.f32.xlu0 %v3020_v57  ;;  %v2879_v31 = vpop.f32.mrb[34].mxu1 }
 0xa3d   : > { %v4349_v58 = vpop.f32.mrb[35].mxu1 }
 0xa42   : > { %v2922_v59 = vpop.f32.mrb[36].mxu1 }
 0xa43   : > { %v4354_v60 = vpop.f32.mrb[37].mxu1  ;;  %v3023_v32 = vsel %vm1550_vm2, %v2922_v59, -inf }
 0xa44   : > { %3024 = vmax.xlane.f32.xlu1 %v3023_v32  ;;  %v2925_v61 = vpop.f32.mrb[38].mxu1 }
 0xa45   : > { %v4355_v62 = vpop.f32.mrb[39].mxu1 }
 0xa4a   : > { %v2968_v34 = vpop.f32.mrb[40].mxu1 }
 0xa4b   : > { %v4360_v1 = vpop.f32.mrb[41].mxu1  ;;  %v3026_v3 = vsel %vm1550_vm2, %v2968_v34, -inf }
 0xa4c   : > { %3027 = vmax.xlane.f32.xlu0 %v3026_v3  ;;  %v2971_v4 = vpop.f32.mrb[42].mxu1 }
 0xa4d   : > { %v4361_v5 = vpop.f32.mrb[43].mxu1 }
 0xa52   : > { %v3014_v9 = vpop.f32.mrb[44].mxu1 }
 0xa53   : > { %v4366_v44 = vpop.f32.mrb[45].mxu1  ;;  %v3029_v10 = vsel %vm1550_vm2, %v3014_v9, -inf }
 0xa54   : > { %3030 = vmax.xlane.f32.xlu0 %v3029_v10  ;;  %v3017_v11 = vpop.f32.mrb[46].mxu1 }
 0xa55   : > { %2669 = vrot.lane.b32.xlu1 %v2667_v42, %s4863_s28  ;;  %v4367_v13 = vpop.f32.mrb[47].mxu1 }
 0xac9   : > { %v3022_v14 = vpop.xlane.xlu0 %3021 }
 0xaca   : > { %v3032_v2 = vsub.f32 %v2876_v55, %v3022_v14  ;;  %v2681_v55 = vrot.slane %v2667_v42, %v5185_v49 }
 0xacc   : > { %v3036_v15 = vmul.f32 1.442695, %v3032_v2 }
 0xace   : > { %4633 = vpow2.f32 %v3036_v15 }
 0xad1   : > { %v3025_v16 = vpop.xlane.xlu1 %3024 }
 0xad2   : > { %v3033_v17 = vsub.f32 %v2922_v59, %v3025_v16 }
 0xad4   : > { %v3038_v23 = vmul.f32 1.442695, %v3033_v17 }
 0xad5   : > { %v2670_v47 = vpop.permute.xlu1 %2669 }
 0xad6   : > { %4635 = vpow2.f32 %v3038_v23  ;;  %v2715_v51 = vrot.slane %v2670_v47, %v5185_v49 }
 0xad8   : > { %v5516_v29 = vpop.eup %4633 }
 0xad9   : > { %v3044_v6 = vsel %vm1550_vm2, %v5516_v29, 0.0  ;;  %v3028_v35 = vpop.xlane.xlu0 %3027 }
 0xada   : > { %3045 = vadd.xlane.f32.xlu1 %v3044_v6  ;;  %v3034_v36 = vsub.f32 %v2968_v34, %v3028_v35 }
 0xadc   : > { %v3040_v37 = vmul.f32 1.442695, %v3034_v36 }
 0xade   : > { %4637 = vpow2.f32 %v3040_v37 }
 0xae0   : > { %v5520_v30 = vpop.eup %4635 }
 0xae1   : > { %v3047_v33 = vsel %vm1550_vm2, %v5520_v30, 0.0  ;;  %v3031_v38 = vpop.xlane.xlu0 %3030 }
 0xae2   : > { %3048 = vadd.xlane.f32.xlu0 %v3047_v33  ;;  %v3035_v39 = vsub.f32 %v3014_v9, %v3031_v38 }
 0xae4   : > { %v3042_v40 = vmul.f32 1.442695, %v3035_v39 }
 0xae6   : > { %4639 = vpow2.f32 %v3042_v40 }
 0xae8   : > { %v5526_v41 = vpop.eup %4637 }
 0xae9   : > { %v3050_v43 = vsel %vm1550_vm2, %v5526_v41, 0.0 }
 0xaeb   : > { %2673 = vrot.lane.b32.xlu1 %v2667_v42, %s4862_s27 }
 0xaf0   : > { %v5530_v45 = vpop.eup %4639 }
 0xaf1   : > { %v3053_v46 = vsel %vm1550_vm2, %v5530_v45, 0.0 }
 0xaf8   : > { %2671 = vrot.lane.b32.xlu0 %v2667_v42, %s4864_s2 }
 0xb0f   : > { %3051 = vadd.xlane.f32.xlu1 %v3050_v43 }
 0xb17   : > { %3054 = vadd.xlane.f32.xlu0 %v3053_v46 }
 0xb67   : > { %v3046_v48 = vpop.xlane.xlu1 %3045 }
 0xb68   : > { %4641 = vrcp.f32 %v3046_v48 }
 0xb6b   : > { %v2674_v50 = vpop.permute.xlu1 %2673 }
 0xb6c   : > { %v2723_v25 = vrot.slane %v2674_v50, %v5185_v49 }
 0xb6e   : > { %v2724_v53 = vcombine.low %v2715_v51, %v2723_v25  ;;  %v2725_v21 = vcombine.high %v2715_v51, %v2723_v25 }
 0xb6f   : > { %v3049_v54 = vpop.xlane.xlu0 %3048 }
 0xb70   : > { %v2732_v22 = vrot.slane %v2724_v53, %v5188_v52  ;;  %v2739_v57 = vrot.slane %v2725_v21, %v5188_v52  ;;  %4643 = vrcp.f32 %v3049_v54 }
 0xb72   : > { %v2740_v59 = vcombine.high %v2732_v22, %v4860_v0  ;;  %v2741_v61 = vcombine.high %v2739_v57, %v4860_v0  ;;  %v2747_v62 = vshrl.u32 %v2732_v22, 16  ;;  %v2763_v5 = vshrl.u32 %v2739_v57, 16  ;;  %v4642_v37 = vpop.eup %4641 }
 0xb73   : > { %v2672_v27 = vpop.permute.xlu0 %2671  ;;  %v3060_v25 = vmul.f32 %v4642_v37, %v5516_v29 }
 0xb74   : > { %v2689_v56 = vrot.slane %v2672_v27, %v5185_v49  ;;  %v2755_v4 = vshrl.u32 %v2740_v59, 16  ;;  %v2771_v13 = vshrl.u32 %v2741_v61, 16 }
 0xb76   : > { %v2690_v31 = vcombine.low %v2681_v55, %v2689_v56  ;;  %v2691_v58 = vcombine.high %v2681_v55, %v2689_v56 }
 0xb78   : > { %v2698_v60 = vrot.slane %v2690_v31, %v5188_v52  ;;  %v2705_v32 = vrot.slane %v2691_v58, %v5188_v52 }
 0xb7a   : > { %v2706_v34 = vcombine.high %v2698_v60, %v4860_v0  ;;  %v2707_v63 = vcombine.high %v2705_v32, %v4860_v0  ;;  %v2744_v1 = vpack.i.b16 %v2732_v22, %v2698_v60  ;;  %v2746_v3 = vshrl.u32 %v2698_v60, 16  ;;  %v4644_v39 = vpop.eup %4643 }
 0xb7b   : > { %v2760_v7 = vpack.i.b16 %v2739_v57, %v2705_v32  ;;  %v2762_v9 = vshrl.u32 %v2705_v32, 16  ;;  %v3061_v22 = vmul.f32 %v4644_v39, %v5520_v30 }
 0xb7c   : > { %v2748_v42 = vpack.i.b16 %v2747_v62, %v2746_v3  ;;  %v2752_v44 = vpack.i.b16 %v2740_v59, %v2706_v34  ;;  %v2754_v10 = vshrl.u32 %v2706_v34, 16  ;;  %v2768_v11 = vpack.i.b16 %v2741_v61, %v2707_v63 }
 0xb7d   : > { %v2764_v14 = vpack.i.b16 %v2763_v5, %v2762_v9  ;;  %v2770_v2 = vshrl.u32 %v2707_v63, 16  ;;  %v2774_v15 = vcombine.low %v2744_v1, %v2760_v7  ;;  %v3064_v59 = vpack.c.bf16 %v3060_v25, %v3060_v25  ;;  %v4567_v7 = vld [vmem:[#allocation7] sm:$0xff]   ;;  %v4568_v9 = vld [vmem:[#allocation7 + $0x8] sm:$0xff]  }
 0xb7e   : > { %v2756_v16 = vpack.i.b16 %v2755_v4, %v2754_v10  ;;  %v2782_v17 = vcombine.low %v2752_v44, %v2768_v11  ;;  %v3065_v32 = vpack.c.bf16 %v3061_v22, %v3061_v22  ;;  %v4572_v44 = vld [vmem:[#allocation7 + $0x28] sm:$0xff]   ;;  %v4573_v22 = vld [vmem:[#allocation7 + $0x30] sm:$0xff]  }
 0xb7f   : > { %v2772_v23 = vpack.i.b16 %v2771_v13, %v2770_v2  ;;  %v2799_v6 = vcombine.low %v2748_v42, %v2764_v14  ;;  %v2781_v33 = vrot.slane %v2774_v15, %v5185_v49  ;;  %v4570_v42 = vld [vmem:[#allocation7 + $0x18] sm:$0xff]  }
 0xb80   : > { %v2789_v35 = vrot.slane %v2782_v17, %v5185_v49 }
 0xb81   : > { %v2807_v36 = vcombine.low %v2756_v16, %v2772_v23  ;;  %v2806_v40 = vrot.slane %v2799_v6, %v5185_v49 }
 0xb82   : > { %v2790_v38 = vcombine.low %v2781_v33, %v2789_v35 }
 0xb83   : > { %v2814_v43 = vrot.slane %v2807_v36, %v5185_v49 }
 0xb84   : > { %v2797_v46 = vrot.slane %v2790_v38, %v5188_v52 }
 0xb85   : > { %v2815_v47 = vcombine.low %v2806_v40, %v2814_v43 }
 0xb86   : > { %v2798_v48 = vcombine.high %v2797_v46, %v4860_v0  ;;  %v2827_v53 = vshrl.u32 %v2797_v46, 16 }
 0xb87   : > { %v2822_v50 = vrot.slane %v2815_v47, %v5188_v52 }
 0xb88   : > { %v2833_v27 = vshrl.u32 %v2798_v48, 16 }
 0xb89   : > { %v2826_v51 = vpack.i.b16 %v2822_v50, %v2797_v46  ;;  %v2828_v54 = vshrl.u32 %v2822_v50, 16  ;;  %v2823_v21 = vcombine.high %v2822_v50, %v4860_v0 }
 0xb8b   : > { %v3072_v55 = vsel %vm1602_vm3, %v2826_v51, 0  ;;  %v2829_v56 = vpack.i.b16 %v2828_v54, %v2827_v53  ;;  %v2832_v57 = vpack.i.b16 %v2823_v21, %v2798_v48  ;;  %v2834_v31 = vshrl.u32 %v2823_v21, 16 }
 0xb8c   : > { %4369 = vmatpush3.bf16.msra.mxu0 %v3072_v55 }
 0xb8d   : > { %v3118_v58 = vsel %vm1602_vm3, %v2829_v56, 0  ;;  %4380 = vmatprep.subr.bf16.mxu0 %v4861_v20  ;;  %v2835_v29 = vpack.i.b16 %v2834_v31, %v2833_v27  ;;  %v3164_v60 = vsel %vm1602_vm3, %v2832_v57, 0 }
 0xb8e   : > { %4375 = vmatpush3.bf16.msra.mxu1 %v3118_v58 }
 0xb8f   : > { %4371 = vmatmul.mubr.msk.bf16.vlgmr.msra.gmra.mrb[20].mxu0 %vm1550_vm2, %v3064_v59  ;;  %4386 = vmatprep.subr.bf16.mxu1 %v4861_v20  ;;  %v3210_v30 = vsel %vm1602_vm3, %v2835_v29, 0 }
 0xb90   : > { %4381 = vmatpush3.bf16.msra.mxu0 %v3164_v60  ;;  %4382 = vmatprep.mubr.msk.bf16.mxu0 %vm4865_vm0, %v4861_v20  ;;  %v4574_v60 = vld [vmem:[#allocation7 + $0x38] sm:$0xff]  }
 0xb91   : > { %4377 = vmatmul.mubr.msk.bf16.vlgmr.msra.gmra.mrb[48].mxu1 %vm1550_vm2, %v3065_v32  ;;  %4392 = vmatprep.subr.bf16.mxu0 %v4861_v20 }
 0xb92   : > { %4387 = vmatpush3.bf16.msra.mxu1 %v3210_v30  ;;  %4388 = vmatprep.mubr.msk.bf16.mxu1 %vm4865_vm0, %v4861_v20 }
 0xb9c   : > { %v3052_v61 = vpop.xlane.xlu1 %3051 }
 0xb9d   : > { %4645 = vrcp.f32 %v3052_v61 }
 0xba4   : > { %v3055_v62 = vpop.xlane.xlu0 %3054 }
 0xba5   : > { %4647 = vrcp.f32 %v3055_v62 }
 0xba7   : > { %v4646_v34 = vpop.eup %4645 }
 0xba8   : > { %v3062_v63 = vmul.f32 %v4646_v34, %v5526_v41  ;;  %v4569_v41 = vld [vmem:[#allocation7 + $0x10] sm:$0xff]  }
 0xbaa   : > { %v3066_v1 = vpack.c.bf16 %v3062_v63, %v3062_v63 }
 0xbac   : > { %4383 = vmatmul.mubr.msk.bf16.vlgmr.msra.gmra.mrb[24].mxu0 %vm1550_vm2, %v3066_v1 }
 0xbad   : > { %4408 = vmatprep.mubr.msk.bf16.mxu0 %vm4865_vm0, %v4861_v20  ;;  %4393 = vmatpush3.bf16.msra.mxu0 %v4567_v7 }
 0xbae   : > { %4394 = vmatprep.subr.bf16.mxu0 %v4861_v20 }
 0xbaf   : > { %v4648_v3 = vpop.eup %4647 }
 0xbb0   : > { %v3063_v4 = vmul.f32 %v4648_v3, %v5530_v45  ;;  %v4571_v45 = vld [vmem:[#allocation7 + $0x20] sm:$0xff]  }
 0xbb1   : > { %4395 = vmatpush3.bf16.msra.mxu0 %v4568_v9 }
 0xbb2   : > { %v3067_v5 = vpack.c.bf16 %v3063_v4, %v3063_v4  ;;  %4396 = vmatprep.subr.bf16.mxu0 %v4861_v20 }
 0xbb4   : > { %4389 = vmatmul.mubr.msk.bf16.vlgmr.msra.gmra.mrb[52].mxu1 %vm1550_vm2, %v3067_v5 }
 0xbb5   : > { %3675 = vmatprep.mubr.bf16.mxu1 %v4860_v0  ;;  %4397 = vmatpush3.bf16.msra.mxu0 %v4569_v41 }
 0xbb6   : > { %4398 = vmatprep.subr.bf16.mxu0 %v4861_v20 }
 0xbb9   : > { %4399 = vmatpush3.bf16.msra.mxu0 %v4570_v42 }
 0xbba   : > { %4400 = vmatprep.subr.bf16.mxu0 %v4861_v20 }
 0xbbd   : > { %4401 = vmatpush3.bf16.msra.mxu0 %v4571_v45 }
 0xbbe   : > { %4402 = vmatprep.subr.bf16.mxu0 %v4861_v20 }
 0xbc1   : > { %4403 = vmatpush3.bf16.msra.mxu0 %v4572_v44 }
 0xbc2   : > { %4404 = vmatprep.subr.bf16.mxu0 %v4861_v20 }
 0xbc5   : > { %4405 = vmatpush3.bf16.msra.mxu0 %v4573_v22  ;;  %v4596_v22 = vld [vmem:[#allocation9 + $0x70] ss:$8 sps:$4 sm:$0xff]  }
 0xbc6   : > { %4406 = vmatprep.subr.bf16.mxu0 %v4861_v20 }
 0xbc9   : > { %4407 = vmatpush3.bf16.msra.mxu0 %v4574_v60  ;;  %v4607_v60 = vld [vmem:[#allocation10 + $0x60] sm:$0xff]  }
 0xc62   : > { %v3108_v0 = vpop.f32.mrb[20].mxu0 }
 0xc63   : > { %v4372_v10 = vpop.f32.mrb[21].mxu0 }
 0xc64   : > { %v3111_v11 = vpop.f32.mrb[22].mxu0  ;;  %v3154_v13 = vpop.f32.mrb[48].mxu1 }
 0xc65   : > { %v4373_v14 = vpop.f32.mrb[23].mxu0  ;;  %v4378_v2 = vpop.f32.mrb[49].mxu1 }
 0xc66   : > { %v3157_v15 = vpop.f32.mrb[50].mxu1  ;;  %v3423_v14 = vrot.slane %v5379_v18, %v5253_v8 }
 0xc67   : > { %v4379_v16 = vpop.f32.mrb[51].mxu1 }
 0xc7f   : > { %v3200_v17 = vpop.f32.mrb[24].mxu0 }
 0xc80   : > { %v3252_v23 = vcombine.low %v3108_v0, %v3200_v17  ;;  %v3253_v6 = vcombine.high %v3108_v0, %v3200_v17  ;;  %v4384_v33 = vpop.f32.mrb[25].mxu0 }
 0xc81   : > { %v3203_v35 = vpop.f32.mrb[26].mxu0  ;;  %v4575_v33 = vld [vmem:[#allocation9] ss:$8 sps:$4 sm:$0xff]  }
 0xc82   : > { %v4385_v36 = vpop.f32.mrb[27].mxu0  ;;  %v3260_v46 = vrot.slane %v3252_v23, %v5185_v49  ;;  %v3267_v47 = vrot.slane %v3253_v6, %v5185_v49  ;;  %v4577_v35 = vld [vmem:[#allocation9 + $0x4] ss:$8 sps:$4 sm:$0xff]  }
 0xc83   : > { %v4580_v36 = vld [vmem:[#allocation9 + $0x14] ss:$8 sps:$4 sm:$0xff]   ;;  %3643 = vmatprep.subr.bf16.mxu1 %v4577_v35 }
 0xc84   : > { %3644 = vmatpush1.bf16.msra.mxu1 %v4575_v33  ;;  %v4654_v33 = vld [vmem:[%s5644_s12] sm:$0xf] }
 0xc85   : > { %3645 = vmatprep.subr.bf16.mxu1 %v4580_v36 }
 0xc87   : > { %v3246_v37 = vpop.f32.mrb[52].mxu1 }
 0xc88   : > { %v3268_v38 = vcombine.low %v3154_v13, %v3246_v37  ;;  %v3269_v39 = vcombine.high %v3154_v13, %v3246_v37  ;;  %v4390_v40 = vpop.f32.mrb[53].mxu1  ;;  %v4578_v37 = vld [vmem:[#allocation9 + $0x10] ss:$8 sps:$4 sm:$0xff]  }
 0xc89   : > { %v3249_v43 = vpop.f32.mrb[54].mxu1  ;;  %3646 = vmatpush1.bf16.msra.mxu1 %v4578_v37 }
 0xc8a   : > { %v3276_v48 = vrot.slane %v3268_v38, %v5185_v49  ;;  %v3283_v50 = vrot.slane %v3269_v39, %v5185_v49  ;;  %v4391_v25 = vpop.f32.mrb[55].mxu1  ;;  %v4583_v38 = vld [vmem:[#allocation9 + $0x24] ss:$8 sps:$4 sm:$0xff]   ;;  %v4581_v39 = vld [vmem:[#allocation9 + $0x20] ss:$8 sps:$4 sm:$0xff]  }
 0xc8b   : > { %3647 = vmatprep.subr.bf16.mxu1 %v4583_v38  ;;  %v4592_v25 = vld [vmem:[#allocation9 + $0x54] ss:$8 sps:$4 sm:$0xff]  }
 0xc8c   : > { %v3284_v51 = vcombine.low %v3260_v46, %v3276_v48  ;;  %v3285_v53 = vcombine.high %v3260_v46, %v3276_v48  ;;  %v3300_v54 = vcombine.low %v3267_v47, %v3283_v50  ;;  %v3301_v21 = vcombine.high %v3267_v47, %v3283_v50  ;;  %v4586_v47 = vld [vmem:[#allocation9 + $0x34] ss:$8 sps:$4 sm:$0xff]   ;;  %v4589_v48 = vld [vmem:[#allocation9 + $0x44] ss:$8 sps:$4 sm:$0xff]   ;;  %v4587_v50 = vld [vmem:[#allocation9 + $0x40] ss:$8 sps:$4 sm:$0xff]  }
 0xc8d   : > { %3648 = vmatpush1.bf16.msra.mxu1 %v4581_v39 }
 0xc8e   : > { %v3292_v27 = vrot.slane %v3284_v51, %v5188_v52  ;;  %v3299_v55 = vrot.slane %v3285_v53, %v5188_v52  ;;  %v3308_v56 = vrot.slane %v3300_v54, %v5188_v52  ;;  %v3315_v57 = vrot.slane %v3301_v21, %v5188_v52  ;;  %3649 = vmatprep.subr.bf16.mxu1 %v4586_v47  ;;  %v4590_v51 = vld [vmem:[#allocation9 + $0x50] ss:$8 sps:$4 sm:$0xff]   ;;  %v4595_v53 = vld [vmem:[#allocation9 + $0x64] ss:$8 sps:$4 sm:$0xff]   ;;  %v4593_v54 = vld [vmem:[#allocation9 + $0x60] ss:$8 sps:$4 sm:$0xff]  }
 0xc8f   : > { %v4598_v21 = vld [vmem:[#allocation9 + $0x74] ss:$8 sps:$4 sm:$0xff]  }
 0xc90   : > { %v3320_v31 = vcombine.low %v3292_v27, %v3299_v55  ;;  %v4102_v58 = vcombine.high %v3292_v27, %v3299_v55  ;;  %v3336_v59 = vcombine.low %v3308_v56, %v3315_v57  ;;  %v4103_v29 = vcombine.high %v3308_v56, %v3315_v57  ;;  %v4599_v27 = vld [vmem:[#allocation10 + $0x40] sm:$0xff]   ;;  %v4601_v56 = vld [vmem:[#allocation10 + $0x48] sm:$0xff]  }
 0xc91   : > { %v4600_v55 = vld [vmem:[#allocation10] sm:$0xff]   ;;  %4214 = vmatprep.subr.bf16.mxu0 %v4599_v27  ;;  %v4602_v57 = vld [vmem:[#allocation10 + $0x8] sm:$0xff]  }
 0xc92   : > { %v3327_v32 = vrot.slane %v3320_v31, %v5185_v49  ;;  %v3335_v30 = vrot.slane %v4102_v58, %v5185_v49  ;;  %v3343_v61 = vrot.slane %v3336_v59, %v5185_v49  ;;  %v3351_v62 = vrot.slane %v4103_v29, %v5185_v49  ;;  %v4603_v31 = vld [vmem:[#allocation10 + $0x50] sm:$0xff]   ;;  %v4605_v59 = vld [vmem:[#allocation10 + $0x58] sm:$0xff]  }
 0xc93   : > { %v4604_v58 = vld [vmem:[#allocation10 + $0x10] sm:$0xff]   ;;  %v4606_v29 = vld [vmem:[#allocation10 + $0x18] sm:$0xff]  }
 0xc94   : > { %v3353_v34 = vcombine.high %v3327_v32, %v3335_v30  ;;  %v3369_v63 = vcombine.high %v3343_v61, %v3351_v62  ;;  %v3352_v1 = vcombine.low %v3327_v32, %v3335_v30  ;;  %v3368_v3 = vcombine.low %v3343_v61, %v3351_v62  ;;  %v4608_v32 = vld [vmem:[#allocation10 + $0x20] sm:$0xff]   ;;  %v4609_v30 = vld [vmem:[#allocation10 + $0x68] sm:$0xff]  }
 0xc95   : > { %v4610_v61 = vld [vmem:[#allocation10 + $0x28] sm:$0xff]  }
 0xc96   : > { %v3367_v20 = vrot.slane %v3353_v34, %v5188_v52  ;;  %v3383_v4 = vrot.slane %v3369_v63, %v5188_v52  ;;  %v3360_v5 = vrot.slane %v3352_v1, %v5188_v52  ;;  %v3376_v7 = vrot.slane %v3368_v3, %v5188_v52 }
 0xc97   : > { %v3531_v1 = vsub.s32 3, %v5150_v24  ;;  %v3527_v3 = vrot.slane %v5414_v12, %v5253_v8 }
 0xc98   : > { %v3386_v9 = vcombine.low %v3367_v20, %v3383_v4  ;;  %v3385_v41 = vcombine.high %v3360_v5, %v3376_v7  ;;  %v3387_v42 = vcombine.high %v3367_v20, %v3383_v4  ;;  %v3384_v45 = vcombine.low %v3360_v5, %v3376_v7 }
 0xc99   : > { %v3532_v5 = vrot.slane %v5414_v12, %v3531_v1 }
 0xc9a   : > { %3393 = vrot.lane.b32.xlu1 %v3386_v9, %s4864_s2  ;;  %3389 = vrot.lane.b32.xlu0 %v3385_v41, %s4862_s27  ;;  %s5674_s2 = sld [smem:[#allocation19_spill]] }
 0xc9e   : > { %3397 = vrot.lane.b32.xlu1 %v3387_v42, %s4863_s28  ;;  %v4611_v42 = vld [vmem:[#allocation10 + $0x70] sm:$0xff]  }
 0xca0   : > { %v3551_v8 = vld [vmem:[%s5674_s2] sm:$0x3] }
 0xca1   : > { %v3560_v12 = vrot.slane %v3551_v8, %v5153_v26 }
 0xd0c   : > { %v3394_v49 = vpop.permute.xlu1 %3393  ;;  %v3390_v44 = vpop.permute.xlu0 %3389 }
 0xd0d   : > { %v3400_v0 = vsel %vm1365_vm1, %v3384_v45, %v3390_v44  ;;  %v4612_v45 = vld [vmem:[#allocation10 + $0x30] sm:$0xff]   ;;  %v4614_v44 = vld [vmem:[#allocation10 + $0x38] sm:$0xff]  }
 0xd0e   : > { %v3401_v11 = vsel %vm1933_vm4, %v3400_v0, %v3394_v49  ;;  %v4613_v49 = vld [vmem:[#allocation10 + $0x78] sm:$0xff]   ;;  %v3556_v0 = vrot.slane %v3551_v8, %v5161_v28  ;;  %v3723_v28 = vrot.slane %v4654_v33, %v3531_v1 }
 0xd10   : > { %v3398_v10 = vpop.permute.xlu1 %3397 }
 0xd11   : > { %v3402_v13 = vsel %vm1935_vm5, %v3401_v11, %v3398_v10 }
 0xd12   : > { %v3403_v52 = vpack.c.bf16 %v3402_v13, %v3402_v13 }
 0xd14   : > { %4409 = vmatmul.mubr.bf16.vlgmr.msra.gmra.mrb[28].mxu0 %v3403_v52 }
 0xd15   : > { %4215 = vmatpush3.bf16.msra.mxu0 %v4600_v55 }
 0xd16   : > { %4216 = vmatprep.subr.bf16.mxu0 %v4601_v56 }
 0xd19   : > { %4217 = vmatpush3.bf16.msra.mxu0 %v4602_v57 }
 0xd1a   : > { %4218 = vmatprep.subr.bf16.mxu0 %v4603_v31 }
 0xd1d   : > { %4219 = vmatpush3.bf16.msra.mxu0 %v4604_v58 }
 0xd1e   : > { %4220 = vmatprep.subr.bf16.mxu0 %v4605_v59 }
 0xd21   : > { %4221 = vmatpush3.bf16.msra.mxu0 %v4606_v29 }
 0xd22   : > { %4222 = vmatprep.subr.bf16.mxu0 %v4607_v60 }
 0xd25   : > { %4223 = vmatpush3.bf16.msra.mxu0 %v4608_v32 }
 0xd26   : > { %4224 = vmatprep.subr.bf16.mxu0 %v4609_v30 }
 0xd29   : > { %4225 = vmatpush3.bf16.msra.mxu0 %v4610_v61 }
 0xd2a   : > { %4226 = vmatprep.subr.bf16.mxu0 %v4611_v42 }
 0xd2d   : > { %4227 = vmatpush3.bf16.msra.mxu0 %v4612_v45 }
 0xd2e   : > { %4228 = vmatprep.subr.bf16.mxu0 %v4613_v49 }
 0xd31   : > { %4229 = vmatpush3.bf16.msra.mxu0 %v4614_v44 }
 0xde7   : > { %v3506_v2 = vpop.f32.mrb[28].mxu0 }
 0xde8   : > { %v3507_v15 = vadd.f32 %v3506_v2, %v3423_v14  ;;  %v4410_v16 = vpop.f32.mrb[29].mxu0 }
 0xde9   : > { %v3509_v17 = vpop.f32.mrb[30].mxu0 }
 0xdea   : > { %v4411_v23 = vpop.f32.mrb[31].mxu0  ;;  %v3512_v6 = vadd.f32 %v3507_v15, %v5420_v19  ;;  %v4584_v19 = vld [vmem:[#allocation9 + $0x30] ss:$8 sps:$4 sm:$0xff]  }
 0xdeb   : > { %3650 = vmatpush1.bf16.msra.mxu1 %v4584_v19 }
 0xdec   : > { %3513 = vadd.xlane.f32.xlu0 %v3512_v6  ;;  %3651 = vmatprep.subr.bf16.mxu1 %v4589_v48 }
 0xdef   : > { %3652 = vmatpush1.bf16.msra.mxu1 %v4587_v50  ;;  %v3874_v50 = vsub.s32 4, %v5150_v24 }
 0xdf0   : > { %3653 = vmatprep.subr.bf16.mxu1 %v4592_v25  ;;  %v3879_v25 = vsub.s32 5, %v5150_v24 }
 0xdf3   : > { %3654 = vmatpush1.bf16.msra.mxu1 %v4590_v51  ;;  %v4655_v51 = vld [vmem:[%s5645_s13] sm:$0x3f] }
 0xdf4   : > { %3655 = vmatprep.subr.bf16.mxu1 %v4595_v53  ;;  %v3875_v53 = vrot.slane %v4655_v51, %v3874_v50 }
 0xdf7   : > { %3656 = vmatpush1.bf16.msra.mxu1 %v4593_v54 }
 0xdf8   : > { %3657 = vmatprep.subr.bf16.mxu1 %v4598_v21  ;;  %v3880_v21 = vrot.slane %v4655_v51, %v3879_v25 }
 0xdfb   : > { %3658 = vmatpush1.bf16.msra.mxu1 %v4596_v22 }
 0xe79   : > { %v3514_v18 = vpop.xlane.xlu0 %3513 }
 0xe7a   : > { %v3515_v40 = vmul.f32 0.0078125, %v3514_v18 }
 0xe7c   : > { %v3516_v43 = vsub.f32 %v3512_v6, %v3515_v40 }
 0xe7e   : > { %v3517_v46 = vmul.f32 %v3516_v43, %v3516_v43 }
 0xe80   : > { %3518 = vadd.xlane.f32.xlu1 %v3517_v46 }
 0xf0d   : > { %v3519_v62 = vpop.xlane.xlu1 %3518 }
 0xf0e   : > { %v3520_v34 = vmul.f32 0.0078125, %v3519_v62 }
 0xf10   : > { %v3521_v63 = vadd.f32 1e-05, %v3520_v34 }
 0xf12   : > { %4649 = vrsqrt.f32 %v3521_v63 }
 0xf1c   : > { %v4650_v20 = vpop.eup %4649 }
 0xf1d   : > { %v3523_v4 = vmul.f32 %v4650_v20, %v3516_v43 }
 0xf1f   : > { %v3528_v7 = vmul.f32 %v3527_v3, %v3523_v4 }
 0xf21   : > { %v3533_v9 = vadd.f32 %v3532_v5, %v3528_v7 }
 0xf23   : > { %v3534_v41 = vpack.c.bf16 %v3533_v9, %v3533_v9 }
 0xf25   : > { %3676 = vmatmul.mubr.bf16.vlgmr.msra.gmra.mrb[56].mxu1 %v3534_v41 }
 0xff8   : > { %v3677_v10 = vpop.f32.mrb[56].mxu1 }
 0xff9   : > { %v3678_v11 = vadd.f32 %v3677_v10, %v3556_v0  ;;  %v3679_v13 = vpop.f32.mrb[57].mxu1 }
 0xffa   : > { %v3680_v52 = vadd.f32 %v3679_v13, %v3560_v12  ;;  %v3681_v14 = vpop.f32.mrb[58].mxu1 }
 0xffb   : > { %v3684_v2 = vmax.f32 %v3678_v11, 0.0  ;;  %v3682_v15 = vpop.f32.mrb[59].mxu1 }
 0xffc   : > { %v3685_v16 = vmax.f32 %v3680_v52, 0.0 }
 0xffd   : > { %v3686_v23 = vpack.c.bf16 %v3684_v2, %v3684_v2 }
 0xffe   : > { %v3687_v17 = vpack.c.bf16 %v3685_v16, %v3685_v16 }
0x1000   : > { %3852 = vmatprep.mubr.bf16.mxu0 %v3687_v17 }
0x1001   : > { %3853 = vmatmul.mubr.bf16.vlgmr.msra.gmra.mrb[32].mxu0 %v3686_v23 }
0x10d4   : > { %v4230_v6 = vpop.f32.mrb[32].mxu0 }
0x10d5   : > { %v4231_v35 = vpop.f32.mrb[33].mxu0 }
0x10d6   : > { %v4232_v26 = vadd.f32 %v4231_v35, %v4230_v6  ;;  %v4233_v36 = vpop.f32.mrb[34].mxu0 }
0x10d7   : > { %v4234_v37 = vpop.f32.mrb[35].mxu0 }
0x10d8   : > { %v3855_v38 = vadd.f32 %v4232_v26, %v3723_v28 }
0x10da   : > { %v3860_v39 = vadd.f32 %v3855_v38, %v3533_v9 }
0x10dc   : > { %3861 = vadd.xlane.f32.xlu0 %v3860_v39 }
0x1169   : > { %v3862_v18 = vpop.xlane.xlu0 %3861 }
0x116a   : > { %v3863_v40 = vmul.f32 0.0078125, %v3862_v18 }
0x116c   : > { %v3864_v43 = vsub.f32 %v3860_v39, %v3863_v40 }
0x116e   : > { %v3865_v46 = vmul.f32 %v3864_v43, %v3864_v43 }
0x1170   : > { %3866 = vadd.xlane.f32.xlu0 %v3865_v46 }
0x11fd   : > { %v3867_v47 = vpop.xlane.xlu0 %3866 }
0x11fe   : > { %v3868_v19 = vmul.f32 0.0078125, %v3867_v47 }
0x1200   : > { %v3869_v48 = vadd.f32 1e-05, %v3868_v19 }
0x1202   : > { %4651 = vrsqrt.f32 %v3869_v48 }
0x120c   : > { %v4652_v54 = vpop.eup %4651 }
0x120d   : > { %v3871_v22 = vmul.f32 %v4652_v54, %v3864_v43 }
0x120f   : > { %v3876_v27 = vmul.f32 %v3875_v53, %v3871_v22 }
0x1211   : > { %v3881_v55 = vadd.f32 %v3880_v21, %v3876_v27 }
0x1213   : > { %3882 = vst [vmem:[%s594_s15] sm:$0xff] %v3881_v55 }
0x1214 PF: > { %s5676_s29 = sld [smem:[#allocation16_spill]] }
0x121a   : > { %s29_s18 = sadd.s32 1, %s5676_s29  }
0x121b   : > { %p26_p9 = scmp.ge.s32.totalorder %s29_s18, 4  }
0x121d   :  { %28 = sbr.rel (!%p26_p9) target bundleno = 9 (0x9), region = 138 }
0x1224   :  { %3902 = vsyncpa [#allocation3], 1 }
0x1225   :  { %3904 = vsyncpa [#allocation3 + $0x1], 1 }
0x1226   :  { %3905 = vsyncpa [#allocation5], 1 }
0x1227   :  { %3906 = vsyncpa [#allocation8], 1 }
0x1228   :  { %3907 = vsyncpa [#allocation11], 1 }

</bundles_post_ra>
